<compile_context>
chip_gen: v7x
topology: tpu7x:2x2x1
jax: 0.10.0
libtpu: 0.0.40
codegen_flags: <defaults>
</compile_context>

<pallas_src>
import math

import jax
import jax.numpy as jnp
from jax.experimental import pallas as pl
from jax.experimental.pallas import tpu as pltpu


def mlp_basis_kernel(x_ref,
                     wq_ref, bq_ref, wkv_ref, bkv_ref,
                     wa_ref, ba_ref, wb_ref, bb_ref,
                     erc_ref,
                     out1_ref, out2_ref):
    f32 = jnp.float32
    x = x_ref[...]                                    # (Bt, N, D)
    Bt, N, D = x.shape
    DD = D * D

    # Fold the batch tile into the GEMM M dimension (N is a multiple of 8, so this
    # reshape only regroups whole sublane tiles).
    xf = x.reshape(Bt * N, D)                         # (Bt*N, D)

    # ---- LinearAttention ----
    pooled = jnp.mean(x, axis=1)                      # (Bt, D): AdaptiveAvgPool1d over N
    # 1/sqrt(D) is folded into wq/bq in the wrapper.
    q = jnp.dot(pooled.astype(wq_ref.dtype), wq_ref[...],
                preferred_element_type=f32) + bq_ref[...]            # (Bt, D)

    # Fused K|V projection: one (Bt*N, D) @ (D, 2D) GEMM.
    kv = jnp.dot(xf.astype(wkv_ref.dtype), wkv_ref[...],
                 preferred_element_type=f32) + bkv_ref[...]          # (Bt*N, 2D)
    kv3 = kv.reshape(Bt, N, 2 * D)
    k3 = kv3[:, :, :D]                                               # (Bt, N, D)
    v3 = kv3[:, :, D:]                                               # (Bt, N, D)

    # scores[b, n] = <q[b], k[b, n]>   (VPU multiply + lane reduction)
    scores = jnp.sum(k3 * q[:, None, :], axis=-1, keepdims=True)     # (Bt, N, 1)

    # Numerically-stable softmax over N; normalization folded into Bt scalars below.
    mx = jnp.max(scores, axis=1, keepdims=True)                      # (Bt, 1, 1)
    e = jnp.exp(scores - mx)                                         # (Bt, N, 1)
    denom = jnp.sum(e, axis=1)                                       # (Bt, 1)

    # w0 = mean_n( softmax(scores)_n * V_n )
    w0 = jnp.sum(e * v3, axis=1)                                     # (Bt, D)
    w0 = w0 * (1.0 / (denom * f32(N)))   # exact divide on Bt scalars (keeps parity)

    # ---- two MLP heads; first layers fused (D, 2H), second layers block-diag (2H, 2D)
    h = jnp.maximum(
        jnp.dot(w0.astype(wa_ref.dtype), wa_ref[...],
                preferred_element_type=f32) + ba_ref[...], 0.0)      # (Bt, 2H)
    vv = jnp.maximum(
        jnp.dot(h.astype(wb_ref.dtype), wb_ref[...],
                preferred_element_type=f32) + bb_ref[...], 0.0)      # (Bt, 2D)
    v1 = vv[:, :D]                                                   # (Bt, D)
    v2 = vv[:, D:]                                                   # (Bt, D)

    # ---- outer products, lane-dense, one erc GEMM for BOTH heads ----
    # erc = [E_row | E_col]:  (v @ E_row)[b, i*D+j] = v[b, i]
    #                         (v @ E_col)[b, i*D+j] = v[b, j]
    v12 = jnp.concatenate([v1, v2], axis=0)                          # (2*Bt, D)
    rc = jnp.dot(v12.astype(erc_ref.dtype), erc_ref[...],
                 preferred_element_type=f32)                         # (2*Bt, 2*D*D)
    out1_ref[...] = (rc[:Bt, :DD] * rc[:Bt, DD:]).astype(out1_ref.dtype)
    out2_ref[...] = (rc[Bt:, :DD] * rc[Bt:, DD:]).astype(out2_ref.dtype)


def _default_block_b(B):
    # >=2 grid steps so v7x's two TensorCores both get work; sublane-aligned; <=32
    # rows/step keeps the rc slabs + double-buffered outputs inside v7x's 64 MiB VMEM
    # at production D.
    for cand in (32, 16, 8):
        if cand <= B // 2 and B % cand == 0:
            return cand
    return B


def mlp_basis(x, params, *, block_b=None, compute_dtype=jnp.float32,
              out_dtype=jnp.float32, single_buffer_weights=True):
    B, N, D = x.shape
    H = params["w1a"].shape[1]
    if block_b is None:
        block_b = _default_block_b(B)
    assert B % block_b == 0, "batch must be divisible by the batch tile"
    assert block_b % 8 == 0 or block_b == B, "batch tile must be sublane-aligned"
    assert N % 8 == 0, "sequence length must be a multiple of 8 (sublane tile)"

    cdt = jnp.dtype(compute_dtype)
    out_dt = jnp.dtype(out_dtype)
    f32 = jnp.float32
    inv_sqrt_d = 1.0 / math.sqrt(D)

    # ---- fused / cast weights (plain-JAX prep; constants w.r.t. the kernel) ----
    wq = (params["wq"] * inv_sqrt_d).astype(cdt)                       # 1/sqrt(D) folded
    bq = (params["bq"] * inv_sqrt_d).astype(f32)
    wkv = jnp.concatenate([params["wk"], params["wv"]], axis=1).astype(cdt)   # (D, 2D)
    bkv = jnp.concatenate([params["bk"], params["bv"]], axis=1).astype(f32)   # (1, 2D)
    wa = jnp.concatenate([params["w1a"], params["w2a"]], axis=1).astype(cdt)  # (D, 2H)
    ba = jnp.concatenate([params["b1a"], params["b2a"]], axis=1).astype(f32)  # (1, 2H)
    # Block-diagonal second MLP layer: [[w1b, 0], [0, w2b]]  -> one GEMM for v1|v2.
    wb = jnp.zeros((2 * H, 2 * D), f32)
    wb = wb.at[:H, :D].set(params["w1b"]).at[H:, D:].set(params["w2b"])
    wb = wb.astype(cdt)                                                       # (2H, 2D)
    bb = jnp.concatenate([params["b1b"], params["b2b"]], axis=1).astype(f32)  # (1, 2D)

    # Lane-dense outer-product expansion matrix: [E_row | E_col], shape (D, 2*D*D).
    # Exact 0/1 values -> casting to bf16 is lossless.
    eye = jnp.eye(D, dtype=f32)
    e_row = jnp.repeat(eye, D, axis=1)          # E_row[k, i*D + j] = (k == i)
    e_col = jnp.tile(eye, (1, D))               # E_col[k, i*D + j] = (k == j)
    erc = jnp.concatenate([e_row, e_col], axis=1).astype(cdt)                 # (D, 2*D*D)

    weight_args = (wq, bq, wkv, bkv, wa, ba, wb, bb, erc)

    # ---- cost / VMEM bookkeeping ----
    flops = B * (4 * N * D * D        # fused K|V projection
                 + 2 * D * D          # Q projection
                 + 4 * D * H          # fused first MLP layer
                 + 8 * H * D          # block-diag second MLP layer
                 + 8 * D * D * D      # lane-dense outer-product expansion (both heads)
                 + 6 * N * D          # scores + softmax-weighted sum (VPU)
                 + 2 * D * D)         # final VPU multiplies
    weight_bytes = sum(a.size * a.dtype.itemsize for a in weight_args)
    bytes_accessed = (x.size * x.dtype.itemsize
                      + weight_bytes
                      + 2 * B * D * D * out_dt.itemsize)
    cost = pl.CostEstimate(flops=flops, transcendentals=B * N,
                           bytes_accessed=bytes_accessed)

    x_tile_bytes = block_b * N * D * x.dtype.itemsize
    out_tile_bytes = block_b * D * D * out_dt.itemsize
    live_bytes = block_b * (2 * N * D + 8 * D * D) * 4       # kv/e + rc + out compute (f32)
    wbuf = 1 if single_buffer_weights else 2
    vmem_need = 2 * x_tile_bytes + 2 * 2 * out_tile_bytes + wbuf * weight_bytes + live_bytes
    vmem_limit = int(min(64 << 20, max(4 * vmem_need, 32 << 20)))

    # ---- specs ----
    def const_spec(a, single_buf):
        nd = a.ndim
        index_map = lambda i, _nd=nd: (0,) * _nd
        if single_buf:
            # Resident weights don't need double buffers (constant index_map).
            return pl.BlockSpec(a.shape, index_map, pipeline_mode=pl.Buffered(1))
        return pl.BlockSpec(a.shape, index_map)

    def build(single_buf):
        in_specs = [pl.BlockSpec((block_b, N, D), lambda i: (i, 0, 0))]
        in_specs += [const_spec(a, single_buf) for a in weight_args]
        out_specs = [pl.BlockSpec((block_b, D * D), lambda i: (i, 0)),
                     pl.BlockSpec((block_b, D * D), lambda i: (i, 0))]
        grid_spec = pltpu.PrefetchScalarGridSpec(
            num_scalar_prefetch=0,
            grid=(B // block_b,),
            in_specs=in_specs,
            out_specs=out_specs,
        )
        return pl.pallas_call(
            mlp_basis_kernel,
            out_shape=(
                jax.ShapeDtypeStruct((B, D * D), out_dt),
                jax.ShapeDtypeStruct((B, D * D), out_dt),
            ),
            grid_spec=grid_spec,
            compiler_params=pltpu.CompilerParams(
                dimension_semantics=("parallel",),
                vmem_limit_bytes=vmem_limit),
            cost_estimate=cost,
        )

    if single_buffer_weights:
        try:
            m1_flat, m2_flat = build(True)(x, *weight_args)
        except Exception:
            # This jax version rejects pl.Buffered(1) on pallas_call BlockSpecs;
            # fall back to default double-buffered residents (correctness unchanged).
            m1_flat, m2_flat = build(False)(x, *weight_args)
    else:
        m1_flat, m2_flat = build(False)(x, *weight_args)

    return m1_flat.reshape(B, D, D), m2_flat.reshape(B, D, D)


def mlp_basis_reference(x, params):
    """Pure-JAX reference mirroring the PyTorch forward."""
    B, N, D = x.shape
    pooled = jnp.mean(x, axis=1)                                    # (B, D)
    Q = pooled @ params["wq"] + params["bq"][0]                     # (B, D)
    K = x @ params["wk"] + params["bk"][0]                          # (B, N, D)
    V = x @ params["wv"] + params["bv"][0]                          # (B, N, D)
    scores = jnp.einsum("bd,bnd->bn", Q, K) / math.sqrt(D)
    attw = jax.nn.softmax(scores, axis=-1)[..., None]               # (B, N, 1)
    w0 = jnp.mean(attw * V, axis=1)                                 # (B, D)

    def mlp(w, wa, ba, wb, bb):
        h = jnp.maximum(w @ wa + ba[0], 0.0)
        return jnp.maximum(h @ wb + bb[0], 0.0)

    v1 = mlp(w0, params["w1a"], params["b1a"], params["w1b"], params["b1b"])
    v2 = mlp(w0, params["w2a"], params["b2a"], params["w2b"], params["b2b"])
    m1 = v1[:, :, None] * v1[:, None, :]
    m2 = v2[:, :, None] * v2[:, None, :]
    return m1, m2


def make_params(key, D, H):
    ks = jax.random.split(key, 14)
    s = 0.2
    return {
        "wq": s * jax.random.normal(ks[0], (D, D), jnp.float32),
        "bq": s * jax.random.normal(ks[1], (1, D), jnp.float32),
        "wk": s * jax.random.normal(ks[2], (D, D), jnp.float32),
        "bk": s * jax.random.normal(ks[3], (1, D), jnp.float32),
        "wv": s * jax.random.normal(ks[4], (D, D), jnp.float32),
        "bv": s * jax.random.normal(ks[5], (1, D), jnp.float32),
        "w1a": s * jax.random.normal(ks[6], (D, H), jnp.float32),
        "b1a": s * jax.random.normal(ks[7], (1, H), jnp.float32),
        "w1b": s * jax.random.normal(ks[8], (H, D), jnp.float32),
        "b1b": s * jax.random.normal(ks[9], (1, D), jnp.float32),
        "w2a": s * jax.random.normal(ks[10], (D, H), jnp.float32),
        "b2a": s * jax.random.normal(ks[11], (1, H), jnp.float32),
        "w2b": s * jax.random.normal(ks[12], (H, D), jnp.float32),
        "b2b": s * jax.random.normal(ks[13], (1, D), jnp.float32),
    }


if __name__ == "__main__":
    B, N, D, H = 16, 8, 32, 32
    key = jax.random.PRNGKey(0)
    kx, kp = jax.random.split(key)
    x = jax.random.normal(kx, (B, N, D), jnp.float32)
    params = make_params(kp, D, H)

    # Default block_b -> 8 here, so grid=(2,): exercises the multi-step pipeline,
    # resident (single-buffered) weights, and gives both v7x TensorCores work.
    # compute_dtype=jnp.bfloat16 / out_dtype=jnp.bfloat16 are available for
    # production speed (looser tolerance); f32 defaults keep the 1e-4 parity check.
    m1, m2 = mlp_basis(x, params, compute_dtype=jnp.float32, out_dtype=jnp.float32)
    jax.block_until_ready((m1, m2))

    r1, r2 = mlp_basis_reference(x, params)
    assert m1.shape == (B, D, D) and m2.shape == (B, D, D)
    assert jnp.allclose(m1, r1, atol=1e-4, rtol=1e-4)
    assert jnp.allclose(m2, r2, atol=1e-4, rtol=1e-4)

    print("KERNEL_OK")
</pallas_src>

<mosaic_0001>
module attributes {stable_mosaic.version = 11 : i64} {
  func.func @mlp_basis_kernel(%arg0: i32, %arg1: memref<8x8x32xf32, #tpu.memory_space<vmem>>, %arg2: memref<32x32xf32, #tpu.memory_space<vmem>>, %arg3: memref<1x32xf32, #tpu.memory_space<vmem>>, %arg4: memref<32x64xf32, #tpu.memory_space<vmem>>, %arg5: memref<1x64xf32, #tpu.memory_space<vmem>>, %arg6: memref<32x64xf32, #tpu.memory_space<vmem>>, %arg7: memref<1x64xf32, #tpu.memory_space<vmem>>, %arg8: memref<64x64xf32, #tpu.memory_space<vmem>>, %arg9: memref<1x64xf32, #tpu.memory_space<vmem>>, %arg10: memref<32x2048xf32, #tpu.memory_space<vmem>>, %arg11: memref<8x1024xf32, #tpu.memory_space<vmem>>, %arg12: memref<8x1024xf32, #tpu.memory_space<vmem>>) attributes {dimension_semantics = [#tpu.dimension_semantics<parallel>], iteration_bounds = array<i64: 2>, scalar_prefetch = 0 : i64, scratch_operands = 0 : i64, tpu.core_type = #tpu.core_type<tc>, window_params = [{transform_indices = @transform_0, window_bounds = array<i64: 8, 8, 32>}, {pipeline_mode = #tpu.pipeline_mode<synchronous>, transform_indices = @transform_1, window_bounds = array<i64: 32, 32>}, {pipeline_mode = #tpu.pipeline_mode<synchronous>, transform_indices = @transform_2, window_bounds = array<i64: 1, 32>}, {pipeline_mode = #tpu.pipeline_mode<synchronous>, transform_indices = @transform_3, window_bounds = array<i64: 32, 64>}, {pipeline_mode = #tpu.pipeline_mode<synchronous>, transform_indices = @transform_4, window_bounds = array<i64: 1, 64>}, {pipeline_mode = #tpu.pipeline_mode<synchronous>, transform_indices = @transform_5, window_bounds = array<i64: 32, 64>}, {pipeline_mode = #tpu.pipeline_mode<synchronous>, transform_indices = @transform_6, window_bounds = array<i64: 1, 64>}, {pipeline_mode = #tpu.pipeline_mode<synchronous>, transform_indices = @transform_7, window_bounds = array<i64: 64, 64>}, {pipeline_mode = #tpu.pipeline_mode<synchronous>, transform_indices = @transform_8, window_bounds = array<i64: 1, 64>}, {pipeline_mode = #tpu.pipeline_mode<synchronous>, transform_indices = @transform_9, window_bounds = array<i64: 32, 2048>}, {transform_indices = @transform_10, window_bounds = array<i64: 8, 1024>}, {transform_indices = @transform_11, window_bounds = array<i64: 8, 1024>}]} {
    %c0 = arith.constant 0 : index
    %c0_0 = arith.constant 0 : index
    %c0_1 = arith.constant 0 : index
    %0 = vector.load %arg1[%c0, %c0_0, %c0_1] : memref<8x8x32xf32, #tpu.memory_space<vmem>>, vector<8x8x32xf32>
    %1 = vector.shape_cast %0 : vector<8x8x32xf32> to vector<64x32xf32>
    %cst = arith.constant dense<0.000000e+00> : vector<8x32xf32>
    %2 = vector.multi_reduction <add>, %0, %cst [1] : vector<8x8x32xf32> to vector<8x32xf32>
    %cst_2 = arith.constant 8.000000e+00 : f32
    %3 = vector.broadcast %cst_2 : f32 to vector<8x32xf32>
    %4 = arith.divf %2, %3 : vector<8x32xf32>
    %c0_3 = arith.constant 0 : index
    %c0_4 = arith.constant 0 : index
    %5 = vector.load %arg2[%c0_3, %c0_4] : memref<32x32xf32, #tpu.memory_space<vmem>>, vector<32x32xf32>
    %cst_5 = arith.constant dense<0.000000e+00> : vector<8x32xf32>
    %6 = tpu.matmul %4, %5, %cst_5 {dimension_numbers = #tpu.dot_dimension_numbers<[1], [0], [0], [1], [0, 0, 1, 1], [], []>} : vector<8x32xf32>, vector<32x32xf32>, vector<8x32xf32> -> vector<8x32xf32>
    %c0_6 = arith.constant 0 : index
    %c0_7 = arith.constant 0 : index
    %7 = vector.load %arg3[%c0_6, %c0_7] : memref<1x32xf32, #tpu.memory_space<vmem>>, vector<1x32xf32>
    %8 = vector.broadcast %7 : vector<1x32xf32> to vector<8x32xf32>
    %9 = arith.addf %6, %8 : vector<8x32xf32>
    %c0_8 = arith.constant 0 : index
    %c0_9 = arith.constant 0 : index
    %10 = vector.load %arg4[%c0_8, %c0_9] : memref<32x64xf32, #tpu.memory_space<vmem>>, vector<32x64xf32>
    %cst_10 = arith.constant dense<0.000000e+00> : vector<64x64xf32>
    %11 = tpu.matmul %1, %10, %cst_10 {dimension_numbers = #tpu.dot_dimension_numbers<[1], [0], [0], [1], [0, 0, 1, 1], [], []>} : vector<64x32xf32>, vector<32x64xf32>, vector<64x64xf32> -> vector<64x64xf32>
    %c0_11 = arith.constant 0 : index
    %c0_12 = arith.constant 0 : index
    %12 = vector.load %arg5[%c0_11, %c0_12] : memref<1x64xf32, #tpu.memory_space<vmem>>, vector<1x64xf32>
    %13 = vector.broadcast %12 : vector<1x64xf32> to vector<64x64xf32>
    %14 = arith.addf %11, %13 : vector<64x64xf32>
    %15 = vector.shape_cast %14 : vector<64x64xf32> to vector<8x8x64xf32>
    %16 = vector.extract_strided_slice %15 {offsets = [0, 0, 0], sizes = [8, 8, 32], strides = [1, 1, 1]} : vector<8x8x64xf32> to vector<8x8x32xf32>
    %17 = vector.extract_strided_slice %15 {offsets = [0, 0, 32], sizes = [8, 8, 32], strides = [1, 1, 1]} : vector<8x8x64xf32> to vector<8x8x32xf32>
    %18 = vector.shape_cast %9 : vector<8x32xf32> to vector<8x1x32xf32>
    %19 = vector.broadcast %18 : vector<8x1x32xf32> to vector<8x8x32xf32>
    %20 = arith.mulf %16, %19 : vector<8x8x32xf32>
    %cst_13 = arith.constant dense<0.000000e+00> : vector<8x8xf32>
    %21 = vector.multi_reduction <add>, %20, %cst_13 [2] : vector<8x8x32xf32> to vector<8x8xf32>
    %22 = vector.shape_cast %21 : vector<8x8xf32> to vector<8x8x1xf32>
    %cst_14 = arith.constant dense<0xFF800000> : vector<8x1xf32>
    %23 = vector.multi_reduction <maximumf>, %22, %cst_14 [1] : vector<8x8x1xf32> to vector<8x1xf32>
    %24 = vector.shape_cast %23 : vector<8x1xf32> to vector<8x1x1xf32>
    %25 = vector.broadcast %24 : vector<8x1x1xf32> to vector<8x8x1xf32>
    %26 = arith.subf %22, %25 : vector<8x8x1xf32>
    %27 = math.exp %26 : vector<8x8x1xf32>
    %cst_15 = arith.constant dense<0.000000e+00> : vector<8x1xf32>
    %28 = vector.multi_reduction <add>, %27, %cst_15 [1] : vector<8x8x1xf32> to vector<8x1xf32>
    %29 = vector.broadcast %27 : vector<8x8x1xf32> to vector<8x8x32xf32>
    %30 = arith.mulf %29, %17 : vector<8x8x32xf32>
    %cst_16 = arith.constant dense<0.000000e+00> : vector<8x32xf32>
    %31 = vector.multi_reduction <add>, %30, %cst_16 [1] : vector<8x8x32xf32> to vector<8x32xf32>
    %cst_17 = arith.constant 8.000000e+00 : f32
    %32 = vector.broadcast %cst_17 : f32 to vector<8x1xf32>
    %33 = arith.mulf %28, %32 : vector<8x1xf32>
    %cst_18 = arith.constant 1.000000e+00 : f32
    %34 = vector.broadcast %cst_18 : f32 to vector<8x1xf32>
    %35 = arith.divf %34, %33 : vector<8x1xf32>
    %36 = vector.broadcast %35 : vector<8x1xf32> to vector<8x32xf32>
    %37 = arith.mulf %31, %36 : vector<8x32xf32>
    %c0_19 = arith.constant 0 : index
    %c0_20 = arith.constant 0 : index
    %38 = vector.load %arg6[%c0_19, %c0_20] : memref<32x64xf32, #tpu.memory_space<vmem>>, vector<32x64xf32>
    %cst_21 = arith.constant dense<0.000000e+00> : vector<8x64xf32>
    %39 = tpu.matmul %37, %38, %cst_21 {dimension_numbers = #tpu.dot_dimension_numbers<[1], [0], [0], [1], [0, 0, 1, 1], [], []>} : vector<8x32xf32>, vector<32x64xf32>, vector<8x64xf32> -> vector<8x64xf32>
    %c0_22 = arith.constant 0 : index
    %c0_23 = arith.constant 0 : index
    %40 = vector.load %arg7[%c0_22, %c0_23] : memref<1x64xf32, #tpu.memory_space<vmem>>, vector<1x64xf32>
    %41 = vector.broadcast %40 : vector<1x64xf32> to vector<8x64xf32>
    %42 = arith.addf %39, %41 : vector<8x64xf32>
    %cst_24 = arith.constant 0.000000e+00 : f32
    %43 = vector.broadcast %cst_24 : f32 to vector<8x64xf32>
    %44 = arith.maximumf %42, %43 : vector<8x64xf32>
    %c0_25 = arith.constant 0 : index
    %c0_26 = arith.constant 0 : index
    %45 = vector.load %arg8[%c0_25, %c0_26] : memref<64x64xf32, #tpu.memory_space<vmem>>, vector<64x64xf32>
    %cst_27 = arith.constant dense<0.000000e+00> : vector<8x64xf32>
    %46 = tpu.matmul %44, %45, %cst_27 {dimension_numbers = #tpu.dot_dimension_numbers<[1], [0], [0], [1], [0, 0, 1, 1], [], []>} : vector<8x64xf32>, vector<64x64xf32>, vector<8x64xf32> -> vector<8x64xf32>
    %c0_28 = arith.constant 0 : index
    %c0_29 = arith.constant 0 : index
    %47 = vector.load %arg9[%c0_28, %c0_29] : memref<1x64xf32, #tpu.memory_space<vmem>>, vector<1x64xf32>
    %48 = vector.broadcast %47 : vector<1x64xf32> to vector<8x64xf32>
    %49 = arith.addf %46, %48 : vector<8x64xf32>
    %cst_30 = arith.constant 0.000000e+00 : f32
    %50 = vector.broadcast %cst_30 : f32 to vector<8x64xf32>
    %51 = arith.maximumf %49, %50 : vector<8x64xf32>
    %52 = vector.extract_strided_slice %51 {offsets = [0, 0], sizes = [8, 32], strides = [1, 1]} : vector<8x64xf32> to vector<8x32xf32>
    %53 = vector.extract_strided_slice %51 {offsets = [0, 32], sizes = [8, 32], strides = [1, 1]} : vector<8x64xf32> to vector<8x32xf32>
    %54 = tpu.concatenate %52, %53 in 0 : vector<8x32xf32>, vector<8x32xf32> -> vector<16x32xf32>
    %c0_31 = arith.constant 0 : index
    %c0_32 = arith.constant 0 : index
    %55 = vector.load %arg10[%c0_31, %c0_32] : memref<32x2048xf32, #tpu.memory_space<vmem>>, vector<32x2048xf32>
    %cst_33 = arith.constant dense<0.000000e+00> : vector<16x2048xf32>
    %56 = tpu.matmul %54, %55, %cst_33 {dimension_numbers = #tpu.dot_dimension_numbers<[1], [0], [0], [1], [0, 0, 1, 1], [], []>} : vector<16x32xf32>, vector<32x2048xf32>, vector<16x2048xf32> -> vector<16x2048xf32>
    %57 = vector.extract_strided_slice %56 {offsets = [0, 0], sizes = [8, 1024], strides = [1, 1]} : vector<16x2048xf32> to vector<8x1024xf32>
    %58 = vector.extract_strided_slice %56 {offsets = [0, 1024], sizes = [8, 1024], strides = [1, 1]} : vector<16x2048xf32> to vector<8x1024xf32>
    %59 = arith.mulf %57, %58 : vector<8x1024xf32>
    %c0_34 = arith.constant 0 : index
    %c0_35 = arith.constant 0 : index
    %60 = vector.load %arg11[%c0_34, %c0_35] : memref<8x1024xf32, #tpu.memory_space<vmem>>, vector<8x1024xf32>
    tpu.vector_store %arg11[%c0_34, %c0_35], %59 {strides = array<i32>} : memref<8x1024xf32, #tpu.memory_space<vmem>>, vector<8x1024xf32>,
    %61 = vector.extract_strided_slice %56 {offsets = [8, 0], sizes = [8, 1024], strides = [1, 1]} : vector<16x2048xf32> to vector<8x1024xf32>
    %62 = vector.extract_strided_slice %56 {offsets = [8, 1024], sizes = [8, 1024], strides = [1, 1]} : vector<16x2048xf32> to vector<8x1024xf32>
    %63 = arith.mulf %61, %62 : vector<8x1024xf32>
    %c0_36 = arith.constant 0 : index
    %c0_37 = arith.constant 0 : index
    %64 = vector.load %arg12[%c0_36, %c0_37] : memref<8x1024xf32, #tpu.memory_space<vmem>>, vector<8x1024xf32>
    tpu.vector_store %arg12[%c0_36, %c0_37], %63 {strides = array<i32>} : memref<8x1024xf32, #tpu.memory_space<vmem>>, vector<8x1024xf32>,
    return
  }
  func.func @transform_0(%arg0: i32) -> (i32, i32, i32) {
    %c0_i32 = arith.constant 0 : i32
    %c0_i32_0 = arith.constant 0 : i32
    %c0_i32_1 = arith.constant 0 : i32
    return %arg0, %c0_i32, %c0_i32_0 : i32, i32, i32
  }
  func.func @transform_1(%arg0: i32) -> (i32, i32) {
    %c0_i32 = arith.constant 0 : i32
    %c0_i32_0 = arith.constant 0 : i32
    %c0_i32_1 = arith.constant 0 : i32
    return %c0_i32, %c0_i32_0 : i32, i32
  }
  func.func @transform_2(%arg0: i32) -> (i32, i32) {
    %c0_i32 = arith.constant 0 : i32
    %c0_i32_0 = arith.constant 0 : i32
    %c0_i32_1 = arith.constant 0 : i32
    return %c0_i32, %c0_i32_0 : i32, i32
  }
  func.func @transform_3(%arg0: i32) -> (i32, i32) {
    %c0_i32 = arith.constant 0 : i32
    %c0_i32_0 = arith.constant 0 : i32
    %c0_i32_1 = arith.constant 0 : i32
    return %c0_i32, %c0_i32_0 : i32, i32
  }
  func.func @transform_4(%arg0: i32) -> (i32, i32) {
    %c0_i32 = arith.constant 0 : i32
    %c0_i32_0 = arith.constant 0 : i32
    %c0_i32_1 = arith.constant 0 : i32
    return %c0_i32, %c0_i32_0 : i32, i32
  }
  func.func @transform_5(%arg0: i32) -> (i32, i32) {
    %c0_i32 = arith.constant 0 : i32
    %c0_i32_0 = arith.constant 0 : i32
    %c0_i32_1 = arith.constant 0 : i32
    return %c0_i32, %c0_i32_0 : i32, i32
  }
  func.func @transform_6(%arg0: i32) -> (i32, i32) {
    %c0_i32 = arith.constant 0 : i32
    %c0_i32_0 = arith.constant 0 : i32
    %c0_i32_1 = arith.constant 0 : i32
    return %c0_i32, %c0_i32_0 : i32, i32
  }
  func.func @transform_7(%arg0: i32) -> (i32, i32) {
    %c0_i32 = arith.constant 0 : i32
    %c0_i32_0 = arith.constant 0 : i32
    %c0_i32_1 = arith.constant 0 : i32
    return %c0_i32, %c0_i32_0 : i32, i32
  }
  func.func @transform_8(%arg0: i32) -> (i32, i32) {
    %c0_i32 = arith.constant 0 : i32
    %c0_i32_0 = arith.constant 0 : i32
    %c0_i32_1 = arith.constant 0 : i32
    return %c0_i32, %c0_i32_0 : i32, i32
  }
  func.func @transform_9(%arg0: i32) -> (i32, i32) {
    %c0_i32 = arith.constant 0 : i32
    %c0_i32_0 = arith.constant 0 : i32
    %c0_i32_1 = arith.constant 0 : i32
    return %c0_i32, %c0_i32_0 : i32, i32
  }
  func.func @transform_10(%arg0: i32) -> (i32, i32) {
    %c0_i32 = arith.constant 0 : i32
    %c0_i32_0 = arith.constant 0 : i32
    return %arg0, %c0_i32 : i32, i32
  }
  func.func @transform_11(%arg0: i32) -> (i32, i32) {
    %c0_i32 = arith.constant 0 : i32
    %c0_i32_0 = arith.constant 0 : i32
    return %arg0, %c0_i32 : i32, i32
  }
}

module attributes {stable_mosaic.version = 11 : i64} {
  func.func @mlp_basis_kernel(%arg0: i32, %arg1: memref<8x8x32xf32, #tpu.memory_space<vmem>>, %arg2: memref<32x32xf32, #tpu.memory_space<vmem>>, %arg3: memref<1x32xf32, #tpu.memory_space<vmem>>, %arg4: memref<32x64xf32, #tpu.memory_space<vmem>>, %arg5: memref<1x64xf32, #tpu.memory_space<vmem>>, %arg6: memref<32x64xf32, #tpu.memory_space<vmem>>, %arg7: memref<1x64xf32, #tpu.memory_space<vmem>>, %arg8: memref<64x64xf32, #tpu.memory_space<vmem>>, %arg9: memref<1x64xf32, #tpu.memory_space<vmem>>, %arg10: memref<32x2048xf32, #tpu.memory_space<vmem>>, %arg11: memref<8x1024xf32, #tpu.memory_space<vmem>>, %arg12: memref<8x1024xf32, #tpu.memory_space<vmem>>) attributes {dimension_semantics = [#tpu.dimension_semantics<parallel>], iteration_bounds = array<i64: 2>, scalar_prefetch = 0 : i64, scratch_operands = 0 : i64, tpu.core_type = #tpu.core_type<tc>, window_params = [{transform_indices = @transform_0, window_bounds = array<i64: 8, 8, 32>}, {pipeline_mode = #tpu.pipeline_mode<synchronous>, transform_indices = @transform_1, window_bounds = array<i64: 32, 32>}, {pipeline_mode = #tpu.pipeline_mode<synchronous>, transform_indices = @transform_2, window_bounds = array<i64: 1, 32>}, {pipeline_mode = #tpu.pipeline_mode<synchronous>, transform_indices = @transform_3, window_bounds = array<i64: 32, 64>}, {pipeline_mode = #tpu.pipeline_mode<synchronous>, transform_indices = @transform_4, window_bounds = array<i64: 1, 64>}, {pipeline_mode = #tpu.pipeline_mode<synchronous>, transform_indices = @transform_5, window_bounds = array<i64: 32, 64>}, {pipeline_mode = #tpu.pipeline_mode<synchronous>, transform_indices = @transform_6, window_bounds = array<i64: 1, 64>}, {pipeline_mode = #tpu.pipeline_mode<synchronous>, transform_indices = @transform_7, window_bounds = array<i64: 64, 64>}, {pipeline_mode = #tpu.pipeline_mode<synchronous>, transform_indices = @transform_8, window_bounds = array<i64: 1, 64>}, {pipeline_mode = #tpu.pipeline_mode<synchronous>, transform_indices = @transform_9, window_bounds = array<i64: 32, 2048>}, {transform_indices = @transform_10, window_bounds = array<i64: 8, 1024>}, {transform_indices = @transform_11, window_bounds = array<i64: 8, 1024>}]} {
    %c0 = arith.constant 0 : index
    %c0_0 = arith.constant 0 : index
    %c0_1 = arith.constant 0 : index
    %0 = vector.load %arg1[%c0, %c0_0, %c0_1] : memref<8x8x32xf32, #tpu.memory_space<vmem>>, vector<8x8x32xf32>
    %1 = vector.shape_cast %0 : vector<8x8x32xf32> to vector<64x32xf32>
    %cst = arith.constant dense<0.000000e+00> : vector<8x32xf32>
    %2 = vector.multi_reduction <add>, %0, %cst [1] : vector<8x8x32xf32> to vector<8x32xf32>
    %cst_2 = arith.constant 8.000000e+00 : f32
    %3 = vector.broadcast %cst_2 : f32 to vector<8x32xf32>
    %4 = arith.divf %2, %3 : vector<8x32xf32>
    %c0_3 = arith.constant 0 : index
    %c0_4 = arith.constant 0 : index
    %5 = vector.load %arg2[%c0_3, %c0_4] : memref<32x32xf32, #tpu.memory_space<vmem>>, vector<32x32xf32>
    %cst_5 = arith.constant dense<0.000000e+00> : vector<8x32xf32>
    %6 = tpu.matmul %4, %5, %cst_5 {dimension_numbers = #tpu.dot_dimension_numbers<[1], [0], [0], [1], [0, 0, 1, 1], [], []>} : vector<8x32xf32>, vector<32x32xf32>, vector<8x32xf32> -> vector<8x32xf32>
    %c0_6 = arith.constant 0 : index
    %c0_7 = arith.constant 0 : index
    %7 = vector.load %arg3[%c0_6, %c0_7] : memref<1x32xf32, #tpu.memory_space<vmem>>, vector<1x32xf32>
    %8 = vector.broadcast %7 : vector<1x32xf32> to vector<8x32xf32>
    %9 = arith.addf %6, %8 : vector<8x32xf32>
    %c0_8 = arith.constant 0 : index
    %c0_9 = arith.constant 0 : index
    %10 = vector.load %arg4[%c0_8, %c0_9] : memref<32x64xf32, #tpu.memory_space<vmem>>, vector<32x64xf32>
    %cst_10 = arith.constant dense<0.000000e+00> : vector<64x64xf32>
    %11 = tpu.matmul %1, %10, %cst_10 {dimension_numbers = #tpu.dot_dimension_numbers<[1], [0], [0], [1], [0, 0, 1, 1], [], []>} : vector<64x32xf32>, vector<32x64xf32>, vector<64x64xf32> -> vector<64x64xf32>
    %c0_11 = arith.constant 0 : index
    %c0_12 = arith.constant 0 : index
    %12 = vector.load %arg5[%c0_11, %c0_12] : memref<1x64xf32, #tpu.memory_space<vmem>>, vector<1x64xf32>
    %13 = vector.broadcast %12 : vector<1x64xf32> to vector<64x64xf32>
    %14 = arith.addf %11, %13 : vector<64x64xf32>
    %15 = vector.shape_cast %14 : vector<64x64xf32> to vector<8x8x64xf32>
    %16 = vector.extract_strided_slice %15 {offsets = [0, 0, 0], sizes = [8, 8, 32], strides = [1, 1, 1]} : vector<8x8x64xf32> to vector<8x8x32xf32>
    %17 = vector.extract_strided_slice %15 {offsets = [0, 0, 32], sizes = [8, 8, 32], strides = [1, 1, 1]} : vector<8x8x64xf32> to vector<8x8x32xf32>
    %18 = vector.shape_cast %9 : vector<8x32xf32> to vector<8x1x32xf32>
    %19 = vector.broadcast %18 : vector<8x1x32xf32> to vector<8x8x32xf32>
    %20 = arith.mulf %16, %19 : vector<8x8x32xf32>
    %cst_13 = arith.constant dense<0.000000e+00> : vector<8x8xf32>
    %21 = vector.multi_reduction <add>, %20, %cst_13 [2] : vector<8x8x32xf32> to vector<8x8xf32>
    %22 = vector.shape_cast %21 : vector<8x8xf32> to vector<8x8x1xf32>
    %cst_14 = arith.constant dense<0xFF800000> : vector<8x1xf32>
    %23 = vector.multi_reduction <maximumf>, %22, %cst_14 [1] : vector<8x8x1xf32> to vector<8x1xf32>
    %24 = vector.shape_cast %23 : vector<8x1xf32> to vector<8x1x1xf32>
    %25 = vector.broadcast %24 : vector<8x1x1xf32> to vector<8x8x1xf32>
    %26 = arith.subf %22, %25 : vector<8x8x1xf32>
    %27 = math.exp %26 : vector<8x8x1xf32>
    %cst_15 = arith.constant dense<0.000000e+00> : vector<8x1xf32>
    %28 = vector.multi_reduction <add>, %27, %cst_15 [1] : vector<8x8x1xf32> to vector<8x1xf32>
    %29 = vector.broadcast %27 : vector<8x8x1xf32> to vector<8x8x32xf32>
    %30 = arith.mulf %29, %17 : vector<8x8x32xf32>
    %cst_16 = arith.constant dense<0.000000e+00> : vector<8x32xf32>
    %31 = vector.multi_reduction <add>, %30, %cst_16 [1] : vector<8x8x32xf32> to vector<8x32xf32>
    %cst_17 = arith.constant 8.000000e+00 : f32
    %32 = vector.broadcast %cst_17 : f32 to vector<8x1xf32>
    %33 = arith.mulf %28, %32 : vector<8x1xf32>
    %cst_18 = arith.constant 1.000000e+00 : f32
    %34 = vector.broadcast %cst_18 : f32 to vector<8x1xf32>
    %35 = arith.divf %34, %33 : vector<8x1xf32>
    %36 = vector.broadcast %35 : vector<8x1xf32> to vector<8x32xf32>
    %37 = arith.mulf %31, %36 : vector<8x32xf32>
    %c0_19 = arith.constant 0 : index
    %c0_20 = arith.constant 0 : index
    %38 = vector.load %arg6[%c0_19, %c0_20] : memref<32x64xf32, #tpu.memory_space<vmem>>, vector<32x64xf32>
    %cst_21 = arith.constant dense<0.000000e+00> : vector<8x64xf32>
    %39 = tpu.matmul %37, %38, %cst_21 {dimension_numbers = #tpu.dot_dimension_numbers<[1], [0], [0], [1], [0, 0, 1, 1], [], []>} : vector<8x32xf32>, vector<32x64xf32>, vector<8x64xf32> -> vector<8x64xf32>
    %c0_22 = arith.constant 0 : index
    %c0_23 = arith.constant 0 : index
    %40 = vector.load %arg7[%c0_22, %c0_23] : memref<1x64xf32, #tpu.memory_space<vmem>>, vector<1x64xf32>
    %41 = vector.broadcast %40 : vector<1x64xf32> to vector<8x64xf32>
    %42 = arith.addf %39, %41 : vector<8x64xf32>
    %cst_24 = arith.constant 0.000000e+00 : f32
    %43 = vector.broadcast %cst_24 : f32 to vector<8x64xf32>
    %44 = arith.maximumf %42, %43 : vector<8x64xf32>
    %c0_25 = arith.constant 0 : index
    %c0_26 = arith.constant 0 : index
    %45 = vector.load %arg8[%c0_25, %c0_26] : memref<64x64xf32, #tpu.memory_space<vmem>>, vector<64x64xf32>
    %cst_27 = arith.constant dense<0.000000e+00> : vector<8x64xf32>
    %46 = tpu.matmul %44, %45, %cst_27 {dimension_numbers = #tpu.dot_dimension_numbers<[1], [0], [0], [1], [0, 0, 1, 1], [], []>} : vector<8x64xf32>, vector<64x64xf32>, vector<8x64xf32> -> vector<8x64xf32>
    %c0_28 = arith.constant 0 : index
    %c0_29 = arith.constant 0 : index
    %47 = vector.load %arg9[%c0_28, %c0_29] : memref<1x64xf32, #tpu.memory_space<vmem>>, vector<1x64xf32>
    %48 = vector.broadcast %47 : vector<1x64xf32> to vector<8x64xf32>
    %49 = arith.addf %46, %48 : vector<8x64xf32>
    %cst_30 = arith.constant 0.000000e+00 : f32
    %50 = vector.broadcast %cst_30 : f32 to vector<8x64xf32>
    %51 = arith.maximumf %49, %50 : vector<8x64xf32>
    %52 = vector.extract_strided_slice %51 {offsets = [0, 0], sizes = [8, 32], strides = [1, 1]} : vector<8x64xf32> to vector<8x32xf32>
    %53 = vector.extract_strided_slice %51 {offsets = [0, 32], sizes = [8, 32], strides = [1, 1]} : vector<8x64xf32> to vector<8x32xf32>
    %54 = tpu.concatenate %52, %53 in 0 : vector<8x32xf32>, vector<8x32xf32> -> vector<16x32xf32>
    %c0_31 = arith.constant 0 : index
    %c0_32 = arith.constant 0 : index
    %55 = vector.load %arg10[%c0_31, %c0_32] : memref<32x2048xf32, #tpu.memory_space<vmem>>, vector<32x2048xf32>
    %cst_33 = arith.constant dense<0.000000e+00> : vector<16x2048xf32>
    %56 = tpu.matmul %54, %55, %cst_33 {dimension_numbers = #tpu.dot_dimension_numbers<[1], [0], [0], [1], [0, 0, 1, 1], [], []>} : vector<16x32xf32>, vector<32x2048xf32>, vector<16x2048xf32> -> vector<16x2048xf32>
    %57 = vector.extract_strided_slice %56 {offsets = [0, 0], sizes = [8, 1024], strides = [1, 1]} : vector<16x2048xf32> to vector<8x1024xf32>
    %58 = vector.extract_strided_slice %56 {offsets = [0, 1024], sizes = [8, 1024], strides = [1, 1]} : vector<16x2048xf32> to vector<8x1024xf32>
    %59 = arith.mulf %57, %58 : vector<8x1024xf32>
    %c0_34 = arith.constant 0 : index
    %c0_35 = arith.constant 0 : index
    %60 = vector.load %arg11[%c0_34, %c0_35] : memref<8x1024xf32, #tpu.memory_space<vmem>>, vector<8x1024xf32>
    tpu.vector_store %arg11[%c0_34, %c0_35], %59 {strides = array<i32>} : memref<8x1024xf32, #tpu.memory_space<vmem>>, vector<8x1024xf32>,
    %61 = vector.extract_strided_slice %56 {offsets = [8, 0], sizes = [8, 1024], strides = [1, 1]} : vector<16x2048xf32> to vector<8x1024xf32>
    %62 = vector.extract_strided_slice %56 {offsets = [8, 1024], sizes = [8, 1024], strides = [1, 1]} : vector<16x2048xf32> to vector<8x1024xf32>
    %63 = arith.mulf %61, %62 : vector<8x1024xf32>
    %c0_36 = arith.constant 0 : index
    %c0_37 = arith.constant 0 : index
    %64 = vector.load %arg12[%c0_36, %c0_37] : memref<8x1024xf32, #tpu.memory_space<vmem>>, vector<8x1024xf32>
    tpu.vector_store %arg12[%c0_36, %c0_37], %63 {strides = array<i32>} : memref<8x1024xf32, #tpu.memory_space<vmem>>, vector<8x1024xf32>,
    return
  }
  func.func @transform_0(%arg0: i32) -> (i32, i32, i32) {
    %c0_i32 = arith.constant 0 : i32
    %c0_i32_0 = arith.constant 0 : i32
    %c0_i32_1 = arith.constant 0 : i32
    return %arg0, %c0_i32, %c0_i32_0 : i32, i32, i32
  }
  func.func @transform_1(%arg0: i32) -> (i32, i32) {
    %c0_i32 = arith.constant 0 : i32
    %c0_i32_0 = arith.constant 0 : i32
    %c0_i32_1 = arith.constant 0 : i32
    return %c0_i32, %c0_i32_0 : i32, i32
  }
  func.func @transform_2(%arg0: i32) -> (i32, i32) {
    %c0_i32 = arith.constant 0 : i32
    %c0_i32_0 = arith.constant 0 : i32
    %c0_i32_1 = arith.constant 0 : i32
    return %c0_i32, %c0_i32_0 : i32, i32
  }
  func.func @transform_3(%arg0: i32) -> (i32, i32) {
    %c0_i32 = arith.constant 0 : i32
    %c0_i32_0 = arith.constant 0 : i32
    %c0_i32_1 = arith.constant 0 : i32
    return %c0_i32, %c0_i32_0 : i32, i32
  }
  func.func @transform_4(%arg0: i32) -> (i32, i32) {
    %c0_i32 = arith.constant 0 : i32
    %c0_i32_0 = arith.constant 0 : i32
    %c0_i32_1 = arith.constant 0 : i32
    return %c0_i32, %c0_i32_0 : i32, i32
  }
  func.func @transform_5(%arg0: i32) -> (i32, i32) {
    %c0_i32 = arith.constant 0 : i32
    %c0_i32_0 = arith.constant 0 : i32
    %c0_i32_1 = arith.constant 0 : i32
    return %c0_i32, %c0_i32_0 : i32, i32
  }
  func.func @transform_6(%arg0: i32) -> (i32, i32) {
    %c0_i32 = arith.constant 0 : i32
    %c0_i32_0 = arith.constant 0 : i32
    %c0_i32_1 = arith.constant 0 : i32
    return %c0_i32, %c0_i32_0 : i32, i32
  }
  func.func @transform_7(%arg0: i32) -> (i32, i32) {
    %c0_i32 = arith.constant 0 : i32
    %c0_i32_0 = arith.constant 0 : i32
    %c0_i32_1 = arith.constant 0 : i32
    return %c0_i32, %c0_i32_0 : i32, i32
  }
  func.func @transform_8(%arg0: i32) -> (i32, i32) {
    %c0_i32 = arith.constant 0 : i32
    %c0_i32_0 = arith.constant 0 : i32
    %c0_i32_1 = arith.constant 0 : i32
    return %c0_i32, %c0_i32_0 : i32, i32
  }
  func.func @transform_9(%arg0: i32) -> (i32, i32) {
    %c0_i32 = arith.constant 0 : i32
    %c0_i32_0 = arith.constant 0 : i32
    %c0_i32_1 = arith.constant 0 : i32
    return %c0_i32, %c0_i32_0 : i32, i32
  }
  func.func @transform_10(%arg0: i32) -> (i32, i32) {
    %c0_i32 = arith.constant 0 : i32
    %c0_i32_0 = arith.constant 0 : i32
    return %arg0, %c0_i32 : i32, i32
  }
  func.func @transform_11(%arg0: i32) -> (i32, i32) {
    %c0_i32 = arith.constant 0 : i32
    %c0_i32_0 = arith.constant 0 : i32
    return %arg0, %c0_i32 : i32, i32
  }
}

</mosaic_0001>

<bundles_post_ra>
// kernel: tpu_custom_call.1
= control target key start
LH: loop header
LB: loop body
LE: loop exit
PB: predicated region body
PF: predicated region fallthrough
CT: control target
= control target key end

     0   :  { %s3573_s0 = inlined_call_operand.hbm [shape: f32[16,8,32], index: 0, kind: input, shape index: {}]   ;;  %s3574_s1 = inlined_call_operand.hbm [shape: f32[32,32], index: 1, kind: input, shape index: {}]   ;;  %s3575_s2 = inlined_call_operand.vmem [shape: f32[1,32], index: 2, kind: input, shape index: {}]   ;;  %s3576_s3 = inlined_call_operand.hbm [shape: f32[32,64], index: 3, kind: input, shape index: {}]   ;;  %s3577_s4 = inlined_call_operand.vmem [shape: f32[1,64], index: 4, kind: input, shape index: {}]   ;;  %s3578_s5 = inlined_call_operand.hbm [shape: f32[32,64], index: 5, kind: input, shape index: {}]   ;;  %s3579_s6 = inlined_call_operand.vmem [shape: f32[1,64], index: 6, kind: input, shape index: {}]   ;;  %s3580_s7 = inlined_call_operand.hbm [shape: f32[64,64], index: 7, kind: input, shape index: {}]   ;;  %s3581_s8 = inlined_call_operand.vmem [shape: f32[1,64], index: 8, kind: input, shape index: {}]   ;;  %s3582_s9 = inlined_call_operand.hbm [shape: f32[32,2048], index: 9, kind: input, shape index: {}]   ;;  %s3583_s10 = inlined_call_operand.hbm [shape: f32[16,1024], index: 10, kind: output, shape index: {0}]   ;;  %s3584_s11 = inlined_call_operand.hbm [shape: f32[16,1024], index: 11, kind: output, shape index: {1}]  }
   0x1   :  { %3592 = sst [smem:[#allocation22_spill]] %s3574_s1 }
   0x2   :  { %3593 = sst [smem:[#allocation23_spill]] %s3581_s8 }
   0x3   :  { %3594 = sst [smem:[#allocation24_spill]] %s3583_s10 }
   0x4   :  { %3595 = sst [smem:[#allocation25_spill]] %s3584_s11 }
   0x5   :  { %17 = vsyncpa [#allocation3], 0 }
   0x6   :  { %19 = vsyncpa [#allocation3 + $0x1], 0 }
   0x7   :  { %20 = vsyncpa [#allocation6], 0 }
   0x8   :  { %21 = vsyncpa [#allocation9], 0 }
   0x9   :  { %22 = vsyncpa [#allocation12], 0 }
   0xa   :  { %23 = vsyncpa [#allocation4], 0 }
   0xb   :  { %25 = vsyncpa [#allocation4 + $0x1], 0 }
   0xc   :  { %26 = vsyncpa [#allocation15], 0 }
   0xd   :  { %28 = vsyncpa [#allocation15 + $0x1], 0  ;;  %s2996_s17 = smov 0   ;;  %s2998_s18 = smov 0  }
   0xe   :  { %s3000_s19 = smov 0   ;;  %s3002_s20 = smov 0  }
   0xf LB: > { %s2920_s21 = smov [#allocation5]   ;;  %s3017_s23 = sadd.s32 4294967295, %s2918_s20   ;;  %s2918_s20 = sphi %s3002_s20, %s3625_s20   ;;  %s2914_s19 = sphi %s3000_s19, %s3624_s19   ;;  %s2910_s18 = sphi %s2998_s18, %s3623_s18   ;;  %s2906_s17 = sphi %s2996_s17, %s3622_s17  }
  0x10   : > { %s318_s22 = sshll.u32 %s2920_s21, 4  ;;  %p2243_p0 = scmp.ge.s32.totalorder %s2918_s20, 1  ;;  %s3022_s22 = int_to_ptr.vmem [resolvable:$true] %s318_s22 }
  0x11   : > { %p3587_p1 = scmp.eq.s32.totalorder %s3017_s23, 0  ;;  %p306_p2 = scmp.lt.s32.totalorder %s2918_s20, 3 }
  0x12   : > { %s2921_s25 = smov [#allocation8]   ;;  %s2922_s28 = smov [#allocation7]  }
  0x13   : > { %p3024_p3 = pnand %p2243_p0, %p306_p2  ;;  %s350_s26 = sshll.u32 %s2921_s25, 4  ;;  %s3037_s26 = int_to_ptr.vmem [resolvable:$true] %s350_s26 }
  0x14   : > { %s334_s29 = sshll.u32 %s2922_s28, 4  ;;  %s3598_s1 = sld [smem:[#allocation22_spill]]  ;;  %s3039_s29 = int_to_ptr.vmem [resolvable:$true] %s334_s29 }
  0x15   : > { %s3596_s24 = scalar_select %p3024_p3, 1, 0 }
  0x16   : > { %p2522_p5 = pneg %p3024_p3 }
  0x18   : > { %p3033_p6 = pnand %p2522_p5, %p3587_p1 }
  0x1a   : > { %s2638_s13 = scalar_lea.hbm %s3598_s1, 512  ;;  %p3049_p8 = pneg %p3033_p6 }
  0x1b   : > { %p2639_p7 = scmp.ne.s32.totalorder %s3598_s1, %s2638_s13  ;;  %p2645_p11 = scmp.lt.u32.totalorder %s2638_s13, %s3598_s1 }
  0x1d   : > { %p2641_p9 = pnand %p3049_p8, %p2639_p7 }
  0x1f   : > { %p2642_p10 = pneg %p2641_p9 }
  0x21   : > { %p2647_p12 = pnand %p2645_p11, %p2642_p10 }
  0x23   : > { %2650 = shalt.err (!%p2647_p12)
}
  0x24   : > { %s2651_s28 = scalar_lea.vmem %s3022_s22, 512  ;;  %p2659_p5 = scmp.lt.s32.totalorder %s3022_s22, %s3022_s22 }
  0x25   : > { %p2652_p13 = scmp.ne.s32.totalorder %s3022_s22, %s2651_s28  ;;  %p2660_p4 = scmp.lt.s32.totalorder %s2651_s28, %s2651_s28 }
  0x27   : > { %p2654_p0 = pnand %p2652_p13, %p3049_p8  ;;  %p2661_p7 = por %p2660_p4, %p2659_p5 }
  0x29   : > { %p2655_p2 = pneg %p2654_p0 }
  0x2b   : > { %p2662_p9 = pnand %p2661_p7, %p2655_p2 }
  0x2d   : > { %2665 = shalt.err (!%p2662_p9)
}
  0x2e   : > { %s3589_s30 = smov 128   ;;  %s2924_s12 = smov 8  }
  0x2f   : > { %2525 = dma.hbm_to_vmem [thread:$0]  (!%p3033_p6), %s3598_s1, 512, %s3022_s22, [#allocation6], %s3589_s30, %s3589_s30, %s2924_s12  }
  0x30   : > { %s2666_s25 = scalar_lea.hbm %s3578_s5, 512 }
  0x31   : > { %p2667_p4 = scmp.ne.s32.totalorder %s3578_s5, %s2666_s25  ;;  %p2673_p12 = scmp.lt.u32.totalorder %s2666_s25, %s3578_s5 }
  0x33   : > { %p2669_p10 = pnand %p2667_p4, %p3049_p8 }
  0x35   : > { %p2670_p11 = pneg %p2669_p10 }
  0x37   : > { %p2675_p13 = pnand %p2673_p12, %p2670_p11 }
  0x39   : > { %2678 = shalt.err (!%p2675_p13)
}
  0x3a   : > { %s2679_s22 = scalar_lea.vmem %s3037_s26, 512  ;;  %p2687_p7 = scmp.lt.s32.totalorder %s3037_s26, %s3037_s26 }
  0x3b   : > { %p2680_p0 = scmp.ne.s32.totalorder %s3037_s26, %s2679_s22  ;;  %p2688_p9 = scmp.lt.s32.totalorder %s2679_s22, %s2679_s22 }
  0x3d   : > { %p2682_p2 = pnand %p2680_p0, %p3049_p8  ;;  %p2689_p4 = por %p2688_p9, %p2687_p7 }
  0x3f   : > { %p2683_p5 = pneg %p2682_p2 }
  0x41   : > { %p2690_p10 = pnand %p2689_p4, %p2683_p5 }
  0x43   : > { %2693 = shalt.err (!%p2690_p10)
}
  0x44   : > { %2531 = dma.hbm_to_vmem [thread:$0]  (!%p3033_p6), %s3578_s5, 512, %s3037_s26, [#allocation9], %s3589_s30, %s3589_s30, %s2924_s12  }
  0x45   : > { %s2694_s14 = scalar_lea.hbm %s3576_s3, 512 }
  0x46   : > { %p2695_p11 = scmp.ne.s32.totalorder %s3576_s3, %s2694_s14  ;;  %p2701_p0 = scmp.lt.u32.totalorder %s2694_s14, %s3576_s3 }
  0x48   : > { %p2697_p12 = pnand %p2695_p11, %p3049_p8 }
  0x4a   : > { %p2698_p13 = pneg %p2697_p12 }
  0x4c   : > { %p2703_p2 = pnand %p2701_p0, %p2698_p13 }
  0x4e   : > { %2706 = shalt.err (!%p2703_p2)
}
  0x4f   : > { %s2707_s26 = scalar_lea.vmem %s3039_s29, 512  ;;  %p2715_p4 = scmp.lt.s32.totalorder %s3039_s29, %s3039_s29 }
  0x50   : > { %p2708_p5 = scmp.ne.s32.totalorder %s3039_s29, %s2707_s26  ;;  %p2716_p10 = scmp.lt.s32.totalorder %s2707_s26, %s2707_s26 }
  0x52   : > { %p2710_p7 = pnand %p2708_p5, %p3049_p8  ;;  %p2717_p11 = por %p2716_p10, %p2715_p4 }
  0x54   : > { %p2711_p9 = pneg %p2710_p7 }
  0x56   : > { %p2718_p12 = pnand %p2717_p11, %p2711_p9 }
  0x58   : > { %2721 = shalt.err (!%p2718_p12)
}
  0x59   : > { %2528 = dma.hbm_to_vmem [thread:$0]  (!%p3033_p6), %s3576_s3, 512, %s3039_s29, [#allocation6], %s3589_s30, %s3589_s30, %s2924_s12  }
  0x5a   : > { %s2925_s10 = smov [#allocation10]   ;;  %s2926_s13 = smov [#allocation11]  }
  0x5b   : > { %s366_s11 = sshll.u32 %s2925_s10, 4  ;;  %s382_s14 = sshll.u32 %s2926_s13, 4  ;;  %s367_s11 = int_to_ptr.vmem [resolvable:$true] %s366_s11  ;;  %s383_s14 = int_to_ptr.vmem [resolvable:$true] %s382_s14 }
  0x5c   : > { %s2722_s25 = scalar_lea.hbm %s3580_s7, 1024 }
  0x5d   : > { %p2723_p13 = scmp.ne.s32.totalorder %s3580_s7, %s2722_s25  ;;  %p2729_p5 = scmp.lt.u32.totalorder %s2722_s25, %s3580_s7 }
  0x5f   : > { %p2725_p0 = pnand %p2723_p13, %p3049_p8 }
  0x61   : > { %p2726_p2 = pneg %p2725_p0 }
  0x63   : > { %p2731_p7 = pnand %p2729_p5, %p2726_p2 }
  0x65   : > { %2734 = shalt.err (!%p2731_p7)
}
  0x66   : > { %s2735_s29 = scalar_lea.vmem %s367_s11, 1024  ;;  %p2743_p11 = scmp.lt.s32.totalorder %s367_s11, %s367_s11 }
  0x67   : > { %p2736_p9 = scmp.ne.s32.totalorder %s367_s11, %s2735_s29  ;;  %p2744_p12 = scmp.lt.s32.totalorder %s2735_s29, %s2735_s29 }
  0x69   : > { %p2738_p4 = pnand %p2736_p9, %p3049_p8  ;;  %p2745_p1 = por %p2744_p12, %p2743_p11 }
  0x6b   : > { %p2739_p10 = pneg %p2738_p4 }
  0x6d   : > { %p2746_p3 = pnand %p2745_p1, %p2739_p10 }
  0x6f   : > { %2749 = shalt.err (!%p2746_p3)
}
  0x70   : > { %2534 = dma.hbm_to_vmem [thread:$0]  (!%p3033_p6), %s3580_s7, 1024, %s367_s11, [#allocation9], %s3589_s30, %s3589_s30, %s2924_s12  }
  0x71   : > { %s2750_s15 = scalar_lea.hbm %s3582_s9, 8192 }
  0x72   : > { %p2751_p1 = scmp.ne.s32.totalorder %s3582_s9, %s2750_s15  ;;  %p2757_p0 = scmp.lt.u32.totalorder %s2750_s15, %s3582_s9 }
  0x74   : > { %p2753_p3 = pnand %p2751_p1, %p3049_p8 }
  0x76   : > { %p2754_p13 = pneg %p2753_p3 }
  0x78   : > { %p2759_p2 = pnand %p2757_p0, %p2754_p13 }
  0x7a   : > { %2762 = shalt.err (!%p2759_p2)
}
  0x7b   : > { %s2763_s22 = scalar_lea.vmem %s383_s14, 8192  ;;  %p2771_p4 = scmp.lt.s32.totalorder %s383_s14, %s383_s14 }
  0x7c   : > { %p2764_p5 = scmp.ne.s32.totalorder %s383_s14, %s2763_s22  ;;  %p2772_p10 = scmp.lt.s32.totalorder %s2763_s22, %s2763_s22 }
  0x7e   : > { %p2766_p7 = pnand %p2764_p5, %p3049_p8  ;;  %p2773_p11 = por %p2772_p10, %p2771_p4 }
  0x80   : > { %p2767_p9 = pneg %p2766_p7 }
  0x82   : > { %p2774_p12 = pnand %p2773_p11, %p2767_p9 }
  0x84   : > { %2777 = shalt.err (!%p2774_p12)
}
  0x85   : > { %s2927_s11 = smov 2048   ;;  %s2242_s27 = sadd.s32 4294967294, %s2918_s20  }
  0x86   : > { %2537 = dma.hbm_to_vmem [thread:$0]  (!%p3033_p6), %s3582_s9, 8192, %s383_s14, [#allocation12], %s2927_s11, %s2927_s11, %s3589_s30  }
  0x87   : > { %s3167_s16 = sadd.s32 1, %s2918_s20   ;;  %s41_s10 = sadd.s32 1, %s2914_s19 }
  0x88   : > { %s38_s8 = ssub.s32 %s2918_s20, %s3167_s16  ;;  %p48_p1 = scmp.ne.s32.totalorder %s2914_s19, %s2910_s18 }
  0x89   : > { %p39_p8 = scmp.eq.s32.totalorder %s38_s8, 0  ;;  %p49_p3 = scmp.eq.s32.totalorder %s2918_s20, 0 }
  0x8a   : > { %p54_p13 = scmp.ne.s32.totalorder %s2910_s18, %s2906_s17  ;;  %p3601_p2 = scmp.eq.s32.totalorder %s3017_s23, 0 }
  0x8b   : > { %s3178_s13 = scalar_select %p39_p8, %s2914_s19, %s41_s10  }
  0x8c   : > { %p3180_p0 = por %p49_p3, %p48_p1  ;;  %p3186_p6 = por %p3601_p2, %p54_p13 }
  0x8d   : > { %p267_p5 = scmp.eq.s32.totalorder %s3017_s23, 1  ;;  %p273_p7 = scmp.eq.s32.totalorder %s2242_s27, 1 }
  0x8e   : > { %p2554_p9 = scmp.lt.s32.totalorder %s2918_s20, 2  ;;  %s396_s21 = sand.u32 1, %s2914_s19  }
  0x8f   : > { %p3193_p4 = por %p267_p5, %p48_p1  ;;  %p3197_p10 = por %p273_p7, %p54_p13 }
  0x90   : > { %s2250_s26 = sshll.u32 %s396_s21, 6  ;;  %s2301_s22 = sshll.u32 %s2918_s20, 10 }
  0x91   : > { %s3603_s25 = scalar_select %p3193_p4, 1, 0 }
  0x92   : > { %s3604_s28 = scalar_select %p3197_p10, 1, 0 }
  0x93   : > { %s3205_s1 = scalar_lea.hbm %s3573_s0, %s2301_s22  ;;  %s400_s27 = scalar_lea.vmem [#allocation2], %s2250_s26 }
  0x94   : > { %s407_s8 = sshll.u32 %s400_s27, 4  ;;  %p3211_p11 = pnand %p2554_p9, %p3180_p0  ;;  %s3207_s8 = int_to_ptr.vmem [resolvable:$true] %s407_s8 }
  0x95   : > { %s3215_s30 = scalar_lea.sflag [#allocation3], %s396_s21  ;;  %s2778_s11 = scalar_lea.hbm %s3205_s1, 1024 }
  0x96   : > { %p2779_p12 = scmp.ne.s32.totalorder %s3205_s1, %s2778_s11  ;;  %p2780_p8 = pneg %p3211_p11 }
  0x97   : > { %s2783_s15 = scalar_lea.hbm %s3573_s0, 2048  ;;  %p2784_p13 = scmp.lt.u32.totalorder %s3205_s1, %s3573_s0 }
  0x98   : > { %p2781_p1 = pnand %p2780_p8, %p2779_p12  ;;  %p2785_p0 = scmp.lt.u32.totalorder %s2783_s15, %s2778_s11 }
  0x99   : > { %p2787_p5 = scmp.lt.u32.totalorder %s2778_s11, %s3205_s1 }
  0x9a   : > { %p2782_p3 = pneg %p2781_p1  ;;  %p2786_p2 = por %p2785_p0, %p2784_p13 }
  0x9c   : > { %p2788_p7 = por %p2787_p5, %p2786_p2 }
  0x9e   : > { %p2789_p9 = pnand %p2788_p7, %p2782_p3 }
  0xa0   : > { %2792 = shalt.err (!%p2789_p9)
}
  0xa1   : > { %s2793_s21 = scalar_lea.vmem %s3207_s8, 1024  ;;  %s2928_s26 = smov [#allocation2]  }
  0xa2   : > { %p2794_p12 = scmp.ne.s32.totalorder %s3207_s8, %s2793_s21  ;;  %s2798_s22 = sshll.u32 %s2928_s26, 4  ;;  %s2799_s22 = int_to_ptr.vmem [resolvable:$false] %s2798_s22 }
  0xa3   : > { %s2800_s29 = scalar_lea.vmem %s2799_s22, 2048  ;;  %p2801_p4 = scmp.lt.s32.totalorder %s3207_s8, %s2799_s22 }
  0xa4   : > { %p2796_p1 = pnand %p2794_p12, %p2780_p8  ;;  %p2802_p13 = scmp.lt.s32.totalorder %s2800_s29, %s2793_s21 }
  0xa6   : > { %p2797_p10 = pneg %p2796_p1  ;;  %p2803_p0 = por %p2802_p13, %p2801_p4 }
  0xa8   : > { %p2804_p2 = pnand %p2803_p0, %p2797_p10 }
  0xaa   : > { %2807 = shalt.err (!%p2804_p2)
}
  0xab   : > { %s3606_s11 = smov 128   ;;  %p3607_p8 = scmp.ne.s32.totalorder %s3596_s24, 0 }
  0xac   : > { %2541 = dma.hbm_to_vmem [thread:$0]  (!%p3211_p11), %s3205_s1, 1024, %s3207_s8, %s3215_s30, %s3606_s11, %s3606_s11, %s2924_s12  }
  0xad   : > { %419 = sbr.rel (%p3607_p8) target bundleno = 1595 (0x63b), region = 60  ;;  %s3249_s15 = sand.u32 (!%p3607_p8), 1, %s2910_s18  }
  0xae   : > { %s3252_s27 = sshll.u32 (!%p3607_p8), %s3249_s15, 6  ;;  %s422_s10 = scalar_lea.sflag (!%p3607_p8), [#allocation3], %s3249_s15 }
  0xaf   : > { %s3256_s21 = scalar_lea.vmem (!%p3607_p8), [#allocation2], %s3252_s27 }
  0xb4   : > { %2881 = dma.done.wait (%p3186_p6), %s422_s10, 1024  }
  0xb5   : > { %2883 = vsyncadd (%p3186_p6), %s422_s10, 4294966272  ;;  %p3608_p4 = scmp.eq.s32.totalorder %s3017_s23, 0 }
  0xb7   : > { %2885 = dma.done.wait (%p3608_p4), [#allocation6], 1024   ;;  %p3609_p10 = pmov %p3608_p4 }
  0xb8   : > { %p3610_p11 = pmov %p3608_p4 }
  0xb9   : > { %2887 = vsyncadd (%p3609_p10), [#allocation6], 4294966272 }
  0xba   : > { %2889 = dma.done.wait (%p3610_p11), [#allocation9], 1536   ;;  %p3611_p3 = pmov %p3608_p4 }
  0xbc   : > { %2891 = vsyncadd (%p3611_p3), [#allocation9], 4294965760  ;;  %p3612_p5 = pmov %p3611_p3 }
  0xbd   : > { %p3613_p7 = pmov %p3611_p3 }
  0xbe   : > { %2893 = dma.done.wait (%p3612_p5), [#allocation12], 8192  }
  0xbf   : > { %2895 = vsyncadd (%p3613_p7), [#allocation12], 4294959104  ;;  %v2929_v0 = vmov 0.0|0.0   ;;  %vm2930_vm0 = vmmov 0   ;;  %v2931_v1 = vmov 0.0   ;;  %v669_v2 = vld [vmem:[#allocation7] sm:$0xff] }
  0xc0   : > { %2396 = vmatprep.subr.bf16.mxu0 %v2929_v0  ;;  %2343 = vmatprep.mubr.msk.f32.mxu0 %vm2930_vm0, %v2931_v1  ;;  %v670_v3 = vld [vmem:[#allocation7 + $0x8] sm:$0xff]  ;;  %v564_v4 = vld [vmem:[#allocation5] sm:$0xff]  ;;  %vm498_vm1 = vcmask 261120   ;;  %v671_v7 = vld [vmem:[#allocation7 + $0x10] sm:$0xff]  ;;  %vm583_vm2 = vcmask 1041409   ;;  %vm585_vm3 = vcmask 1042434  }
  0xc1   : > { %v2402_v5 = vpack.c.bf16 %v670_v3, %v669_v2  ;;  %v565_v6 = vld [vmem:[#allocation5 + $0x8] sm:$0xff]  ;;  %v672_v8 = vld [vmem:[#allocation7 + $0x18] sm:$0xff]  ;;  %v490_v11 = vld [vmem:[%s3256_s21] sm:$0xff]  ;;  %vm587_vm4 = vcmask 1043459   ;;  %vm589_vm5 = vcmask 1044484   ;;  %vm591_vm6 = vcmask 1045509  }
  0xc2   : > { %v2397_v9 = vpack.c.bf16 %v565_v6, %v564_v4  ;;  %v2406_v10 = vpack.c.bf16 %v672_v8, %v671_v7  ;;  %v566_v12 = vld [vmem:[#allocation5 + $0x10] sm:$0xff]  ;;  %v567_v13 = vld [vmem:[#allocation5 + $0x18] sm:$0xff]  ;;  %v499_v14 = vsel %vm498_vm1, %v490_v11, 0.0  ;;  %2354 = vmatprep.mubr.msk.f32.mxu1 %vm498_vm1, %v490_v11  ;;  %v491_v15 = vld [vmem:[%s3256_s21 + $0x8] sm:$0xff]  ;;  %vm593_vm7 = vcmask 1046534   ;;  %s2933_s1 = smov 96  }
  0xc3   : > { %2403 = vmatprep.subr.bf16.mxu1 %v2402_v5  ;;  %v492_v16 = vld [vmem:[%s3256_s21 + $0x10] sm:$0xff]  ;;  %v3283_v17 = vld [vmem:[%s3256_s21 + $0x18] sm:$0xff]  ;;  %v500_v18 = vrot.slane %v499_v14, 4  ;;  %v2400_v19 = vpack.c.bf16 %v567_v13, %v566_v12  ;;  %v506_v20 = vsel %vm498_vm1, %v491_v15, 0.0  ;;  %v3287_v21 = vld [vmem:[%s3256_s21 + $0x20] sm:$0xff]  ;;  %vm595_vm8 = vcmask 1047559  }
  0xc4   : > { %2405 = vmatpush3.bf16.msra.mxu1 %v2402_v5  ;;  %2398 = vmatpush3.bf16.msra.mxu0 %v2397_v9  ;;  %v3290_v22 = vld [vmem:[%s3256_s21 + $0x28] sm:$0xff]  ;;  %v3293_v23 = vld [vmem:[%s3256_s21 + $0x30] sm:$0xff]  ;;  %v513_v24 = vsel %vm498_vm1, %v492_v16, 0.0  ;;  %v507_v25 = vrot.slane %v506_v20, 4  ;;  %v520_v27 = vsel %vm498_vm1, %v3283_v17, 0.0  ;;  %v527_v28 = vsel %vm498_vm1, %v3287_v21, 0.0 }
  0xc5   : > { %2407 = vmatprep.subr.bf16.mxu1 %v2406_v10  ;;  %2399 = vmatprep.subr.bf16.mxu0 %v2929_v0  ;;  %v514_v26 = vrot.slane %v513_v24, 4  ;;  %v501_v29 = vadd.f32 %v500_v18, %v499_v14  ;;  %v3302_v30 = vld [vmem:[%s3256_s21 + $0x38] sm:$0xff]  ;;  %v521_v31 = vrot.slane %v520_v27, 4  ;;  %v528_v32 = vrot.slane %v527_v28, 4  ;;  %s3614_s11 = sld [smem:[#allocation23_spill]]  ;;  %s3464_s10 = scalar_lea.vmem [#allocation13], %s3252_s27 }
  0xc6   : > { %v534_v33 = vsel %vm498_vm1, %v3290_v22, 0.0  ;;  %v508_v34 = vadd.f32 %v507_v25, %v506_v20  ;;  %v541_v37 = vsel %vm498_vm1, %v3293_v23, 0.0  ;;  %v548_v45 = vsel %vm498_vm1, %v3302_v30, 0.0  ;;  %s3469_s21 = scalar_lea.vmem [#allocation14], %s3252_s27  ;;  %s3591_s27 = sshll.u32 %s3017_s23, 10 }
  0xc7   : > { %v515_v35 = vadd.f32 %v514_v26, %v513_v24  ;;  %v535_v36 = vrot.slane %v534_v33, 4  ;;  %v502_v38 = vrot.slane %v501_v29, 2  ;;  %v522_v39 = vadd.f32 %v521_v31, %v520_v27  ;;  %s2092_s24 = sshll.u32 %s3469_s21, 4  ;;  %s3615_s14 = sld [smem:[#allocation25_spill]]  ;;  %s3492_s24 = int_to_ptr.vmem [resolvable:$true] %s2092_s24 }
  0xc8   : > { %2409 = vmatpush3.bf16.msra.mxu1 %v2406_v10  ;;  %2401 = vmatpush3.bf16.msra.mxu0 %v2400_v19  ;;  %v529_v40 = vadd.f32 %v528_v32, %v527_v28  ;;  %v542_v41 = vrot.slane %v541_v37, 4  ;;  %v509_v42 = vrot.slane %v508_v34, 2  ;;  %v549_v53 = vrot.slane %v548_v45, 4  ;;  %s2064_s26 = scalar_lea.sflag [#allocation15], %s3249_s15  ;;  %s2808_s22 = scalar_lea.vmem %s3492_s24, 1024 }
  0xc9   : > { %v516_v43 = vrot.slane %v515_v35, 2  ;;  %v536_v44 = vadd.f32 %v535_v36, %v534_v33  ;;  %2410 = vmatprep.subr.bf16.mxu0 %v2929_v0  ;;  %2416 = vmatprep.subr.bf16.mxu1 %v2929_v0  ;;  %v503_v46 = vadd.f32 %v502_v38, %v501_v29  ;;  %v523_v47 = vrot.slane %v522_v39, 2  ;;  %p2809_p6 = scmp.ne.s32.totalorder %s3492_s24, %s2808_s22  ;;  %p3616_p9 = scmp.ne.s32.totalorder %s3603_s25, 0 }
  0xca   : > { %v530_v48 = vrot.slane %v529_v40, 2  ;;  %v543_v49 = vadd.f32 %v542_v41, %v541_v37  ;;  %v510_v50 = vadd.f32 %v509_v42, %v508_v34  ;;  %v550_v61 = vadd.f32 %v549_v53, %v548_v45  ;;  %s2934_s29 = smov [#allocation14]  }
  0xcb   : > { %2355 = vmatmul.mubr.msk.f32.vlgmr.msra.gmra.mrb[0].mxu1 %vm498_vm1, %v491_v15  ;;  %v517_v51 = vadd.f32 %v516_v43, %v515_v35  ;;  %v537_v52 = vrot.slane %v536_v44, 2  ;;  %v504_v54 = vrot.slane %v503_v46, 1  ;;  %v524_v55 = vadd.f32 %v523_v47, %v522_v39  ;;  %v2262_v43 = vld [vmem:[%s3575_s2] ss:$0 sm:$0xff]  ;;  %p2810_p12 = pnand %p2809_p6, %p3616_p9 }
  0xcc   : > { %v531_v56 = vadd.f32 %v530_v48, %v529_v40  ;;  %v544_v57 = vrot.slane %v543_v49, 2  ;;  %2357 = vmatprep.mubr.msk.f32.mxu1 %vm498_vm1, %v492_v16  ;;  %v511_v58 = vrot.slane %v510_v50, 1  ;;  %v551_v7 = vrot.slane %v550_v61, 2 }
  0xcd   : > { %v518_v59 = vrot.slane %v517_v51, 1  ;;  %v538_v60 = vadd.f32 %v537_v52, %v536_v44  ;;  %v505_v62 = vadd.f32 %v504_v54, %v503_v46  ;;  %v525_v63 = vrot.slane %v524_v55, 1  ;;  %v2264_v52 = vld [vmem:[%s3577_s4] ss:$0 sm:$0xff]  ;;  %p2811_p1 = pneg %p2810_p12 }
  0xce   : > { %v532_v2 = vrot.slane %v531_v56, 1  ;;  %v545_v3 = vadd.f32 %v544_v57, %v543_v49  ;;  %v512_v4 = vadd.f32 %v511_v58, %v510_v50  ;;  %v552_v14 = vadd.f32 %v551_v7, %v550_v61 }
  0xcf   : > { %v519_v5 = vadd.f32 %v518_v59, %v517_v51  ;;  %v539_v6 = vrot.slane %v538_v60, 1  ;;  %2358 = vmatmul.mubr.msk.f32.gmra.mrb[2].mxu1 %vm498_vm1, %v3283_v17  ;;  %v556_v8 = vmul.f32 0.125, %v505_v62  ;;  %v526_v9 = vadd.f32 %v525_v63, %v524_v55 }
  0xd0   : > { %v533_v10 = vadd.f32 %v532_v2, %v531_v56  ;;  %v546_v11 = vrot.slane %v545_v3, 1  ;;  %2360 = vmatprep.mubr.msk.f32.mxu1 %vm498_vm1, %v3287_v21  ;;  %v557_v12 = vmul.f32 0.125, %v512_v4  ;;  %v553_v24 = vrot.slane %v552_v14, 1 }
  0xd1   : > { %v540_v13 = vadd.f32 %v539_v6, %v538_v60  ;;  %v558_v15 = vmul.f32 0.125, %v519_v5  ;;  %v559_v18 = vmul.f32 0.125, %v526_v9  ;;  %v2932_v36 = vmov 1966171168  }
  0xd2   : > { %v547_v16 = vadd.f32 %v546_v11, %v545_v3  ;;  %v560_v19 = vmul.f32 0.125, %v533_v10  ;;  %v584_v20 = vsel %vm583_vm2, %v557_v12, %v556_v8  ;;  %v554_v21 = vadd.f32 %v553_v24, %v552_v14 }
  0xd3   : > { %v561_v25 = vmul.f32 0.125, %v540_v13  ;;  %2361 = vmatmul.mubr.msk.f32.gmra.mrb[4].mxu1 %vm498_vm1, %v3290_v22  ;;  %v586_v26 = vsel %vm585_vm3, %v558_v15, %v584_v20  ;;  %v812_v37 = vunpack.c.l.s4 %v2932_v36  ;;  %v814_v38 = vlaneseq  ;;  %v1149_v36 = vld [vmem:[#allocation8 + $0x8] sm:$0xff] }
  0xd4   : > { %v562_v17 = vmul.f32 0.125, %v547_v16  ;;  %2363 = vmatprep.mubr.msk.f32.mxu1 %vm498_vm1, %v3293_v23  ;;  %v588_v27 = vsel %vm587_vm4, %v559_v18, %v586_v26  ;;  %v563_v29 = vmul.f32 0.125, %v554_v21  ;;  %vm1059_vm9 = vcmask 523520  }
  0xd5   : > { %v590_v28 = vsel %vm589_vm5, %v560_v19, %v588_v27  ;;  %v813_v40 = vunpack.c.0.s8 %v812_v37  ;;  %v815_v41 = vshrl.u32 %v814_v38, 7  ;;  %v1150_v37 = vld [vmem:[#allocation8 + $0x10] sm:$0xff]  ;;  %vm1264_vm10 = vcmask 523264  }
  0xd6   : > { %v592_v31 = vsel %vm591_vm6, %v561_v25, %v590_v28 }
  0xd7   : > { %2364 = vmatmul.mubr.msk.f32.gmra.mrb[6].mxu1 %vm498_vm1, %v3302_v30  ;;  %v594_v22 = vsel %vm593_vm7, %v562_v17, %v592_v31  ;;  %v816_v45 = vsub.s32 %v813_v40, %v815_v41  ;;  %v861_v51 = vsub.s32 0, %v815_v41 }
  0xd8   : > { %2393 = vmatprep.mubr.msk.f32.mxu1 %vm2930_vm0, %v2931_v1  ;;  %v596_v23 = vsel %vm595_vm8, %v563_v29, %v594_v22 }
  0xd9   : > { %2344 = vmatmul.mubr.msk.f32.vlgmr.msra.gmra.mrb[0].mxu0 %vm498_vm1, %v596_v23 }
  0xda   : > { %2374 = vmatprep.mubr.msk.f32.mxu0 %vm2930_vm0, %v2931_v1 }
 0x19e   : > { %v2356_v32 = vpop.f32.mrb[0].mxu1 }
 0x19f   : > { %v770_v33 = vpop.f32.mrb[1].mxu1  ;;  %v3346_v62 = vadd.f32 %v2356_v32, %v2264_v52 }
 0x1a0   : > { %v3342_v56 = vadd.f32 %v2264_v52, %v770_v33 }
 0x1a2   : > { %v2359_v34 = vpop.f32.mrb[2].mxu1 }
 0x1a3   : > { %v780_v35 = vpop.f32.mrb[3].mxu1  ;;  %v3348_v63 = vadd.f32 %v2359_v34, %v2264_v52 }
 0x1a4   : > { %v3344_v57 = vadd.f32 %v2264_v52, %v780_v35  ;;  %v1148_v35 = vld [vmem:[#allocation8] sm:$0xff] }
 0x1a5   : > { %v2411_v38 = vpack.c.bf16 %v1149_v36, %v1148_v35 }
 0x1a6   : > { %v2362_v30 = vpop.f32.mrb[4].mxu1 }
 0x1a7   : > { %v790_v39 = vpop.f32.mrb[5].mxu1  ;;  %v3356_v15 = vadd.f32 %v2362_v30, %v2264_v52  ;;  %v1151_v30 = vld [vmem:[#allocation8 + $0x18] sm:$0xff]  ;;  %2412 = vmatpush3.bf16.msra.mxu0 %v2411_v38 }
 0x1a8   : > { %v3351_v7 = vadd.f32 %v2264_v52, %v790_v39  ;;  %v2414_v39 = vpack.c.bf16 %v1151_v30, %v1150_v37  ;;  %2413 = vmatprep.subr.bf16.mxu0 %v2929_v0 }
 0x1aa   : > { %v2365_v42 = vpop.f32.mrb[6].mxu1 }
 0x1ab   : > { %v800_v44 = vpop.f32.mrb[7].mxu1  ;;  %v3364_v21 = vadd.f32 %v2365_v42, %v2264_v52  ;;  %2415 = vmatpush3.bf16.msra.mxu0 %v2414_v39 }
 0x1ac   : > { %v665_v46 = vpop.f32.mrb[0].mxu0  ;;  %v3360_v24 = vadd.f32 %v2264_v52, %v800_v44 }
 0x1ad   : > { %v666_v47 = vadd.f32 %v2262_v43, %v665_v46  ;;  %v2345_v48 = vpop.f32.mrb[1].mxu0 }
 0x1af   : > { %v810_v49 = vcombine.high %v666_v47, %v666_v47  ;;  %v817_v50 = vrot.slane %v666_v47, %v816_v45 }
 0x1b1   : > { %v824_v53 = vrot.slane %v810_v49, %v816_v45  ;;  %v825_v54 = vcombine.high %v817_v50, %v817_v50  ;;  %v833_v55 = vrot.slane %v817_v50, %v816_v45 }
 0x1b3   : > { %v826_v58 = vcombine.high %v824_v53, %v824_v53  ;;  %v862_v59 = vrot.slane %v833_v55, %v861_v51  ;;  %v855_v60 = vcombine.high %v833_v55, %v833_v55  ;;  %v847_v61 = vrot.slane %v825_v54, %v816_v45 }
 0x1b4   : > { %v840_v2 = vrot.slane %v824_v53, %v816_v45 }
 0x1b5   : > { %v899_v3 = vmul.f32 %v862_v59, %v3342_v56  ;;  %v870_v4 = vrot.slane %v855_v60, %v861_v51  ;;  %v866_v5 = vrot.slane %v847_v61, %v861_v51  ;;  %v857_v6 = vcombine.high %v847_v61, %v847_v61 }
 0x1b6   : > { %v878_v8 = vrot.slane %v840_v2, %v861_v51  ;;  %v854_v9 = vrot.slane %v826_v58, %v816_v45  ;;  %v856_v10 = vcombine.high %v840_v2, %v840_v2 }
 0x1b7   : > { %v907_v11 = vsel %vm498_vm1, %v899_v3, 0.0  ;;  %v901_v12 = vmul.f32 %v870_v4, %v3344_v57  ;;  %v900_v13 = vmul.f32 %v866_v5, %v3346_v62  ;;  %v874_v14 = vrot.slane %v857_v6, %v861_v51 }
 0x1b8   : > { %908 = vadd.xlane.f32.xlu0 %v907_v11  ;;  %v882_v19 = vrot.slane %v854_v9, %v861_v51  ;;  %v858_v20 = vcombine.high %v854_v9, %v854_v9  ;;  %v903_v17 = vmul.f32 %v878_v8, %v3351_v7  ;;  %v886_v26 = vrot.slane %v856_v10, %v861_v51 }
 0x1b9   : > { %v913_v16 = vsel %vm498_vm1, %v901_v12, 0.0  ;;  %v902_v18 = vmul.f32 %v874_v14, %v3348_v63  ;;  %v910_v25 = vsel %vm498_vm1, %v900_v13, 0.0 }
 0x1ba   : > { %914 = vadd.xlane.f32.xlu1 %v913_v16  ;;  %v904_v28 = vmul.f32 %v882_v19, %v3356_v15  ;;  %v890_v29 = vrot.slane %v858_v20, %v861_v51  ;;  %v919_v31 = vsel %vm498_vm1, %v903_v17, 0.0  ;;  %v905_v22 = vmul.f32 %v886_v26, %v3360_v24 }
 0x1bb   : > { %v916_v27 = vsel %vm498_vm1, %v902_v18, 0.0 }
 0x1bc   : > { %911 = vadd.xlane.f32.xlu0 %v910_v25  ;;  %v922_v23 = vsel %vm498_vm1, %v904_v28, 0.0  ;;  %v906_v32 = vmul.f32 %v890_v29, %v3364_v21  ;;  %v925_v33 = vsel %vm498_vm1, %v905_v22, 0.0 }
 0x1be   : > { %917 = vadd.xlane.f32.xlu1 %v916_v27  ;;  %v928_v34 = vsel %vm498_vm1, %v906_v32, 0.0 }
 0x1c0   : > { %920 = vadd.xlane.f32.xlu0 %v919_v31 }
 0x1c2   : > { %923 = vadd.xlane.f32.xlu1 %v922_v23 }
 0x1c4   : > { %926 = vadd.xlane.f32.xlu0 %v925_v33 }
 0x1c6   : > { %929 = vadd.xlane.f32.xlu1 %v928_v34 }
 0x245   : > { %v909_v40 = vpop.xlane.xlu0 %908 }
 0x246   : > { %v931_v41 = vrot.slane %v909_v40, 4 }
 0x247   : > { %v915_v42 = vpop.xlane.xlu1 %914 }
 0x248   : > { %v932_v43 = vmax.f32 %v909_v40, %v931_v41  ;;  %v943_v44 = vrot.slane %v915_v42, 4 }
 0x249   : > { %v912_v45 = vpop.xlane.xlu0 %911 }
 0x24a   : > { %v933_v46 = vrot.slane %v932_v43, 2  ;;  %v944_v47 = vmax.f32 %v915_v42, %v943_v44  ;;  %v937_v48 = vrot.slane %v912_v45, 4 }
 0x24b   : > { %v918_v49 = vpop.xlane.xlu1 %917 }
 0x24c   : > { %v934_v50 = vmax.f32 %v932_v43, %v933_v46  ;;  %v945_v51 = vrot.slane %v944_v47, 2  ;;  %v938_v52 = vmax.f32 %v912_v45, %v937_v48  ;;  %v949_v53 = vrot.slane %v918_v49, 4 }
 0x24d   : > { %v921_v54 = vpop.xlane.xlu0 %920 }
 0x24e   : > { %v935_v55 = vrot.slane %v934_v50, 1  ;;  %v946_v58 = vmax.f32 %v944_v47, %v945_v51  ;;  %v939_v59 = vrot.slane %v938_v52, 2  ;;  %v950_v60 = vmax.f32 %v918_v49, %v949_v53 }
 0x24f   : > { %v955_v61 = vrot.slane %v921_v54, 4  ;;  %v924_v2 = vpop.xlane.xlu1 %923 }
 0x250   : > { %v936_v3 = vmax.f32 %v934_v50, %v935_v55  ;;  %v947_v4 = vrot.slane %v946_v58, 1  ;;  %v940_v5 = vmax.f32 %v938_v52, %v939_v59  ;;  %v951_v6 = vrot.slane %v950_v60, 2 }
 0x251   : > { %v956_v8 = vmax.f32 %v921_v54, %v955_v61  ;;  %v961_v9 = vrot.slane %v924_v2, 4  ;;  %v927_v10 = vpop.xlane.xlu0 %926 }
 0x252   : > { %v979_v11 = vsub.f32 %v909_v40, %v936_v3  ;;  %v948_v12 = vmax.f32 %v946_v58, %v947_v4  ;;  %v941_v13 = vrot.slane %v940_v5, 1  ;;  %v952_v14 = vmax.f32 %v950_v60, %v951_v6 }
 0x253   : > { %v957_v16 = vrot.slane %v956_v8, 2  ;;  %v962_v18 = vmax.f32 %v924_v2, %v961_v9  ;;  %v967_v19 = vrot.slane %v927_v10, 4  ;;  %v930_v20 = vpop.xlane.xlu1 %929 }
 0x254   : > { %v987_v25 = vmul.f32 1.442695, %v979_v11  ;;  %v981_v17 = vsub.f32 %v915_v42, %v948_v12  ;;  %v942_v26 = vmax.f32 %v940_v5, %v941_v13  ;;  %v953_v27 = vrot.slane %v952_v14, 1 }
 0x255   : > { %v958_v28 = vmax.f32 %v956_v8, %v957_v16  ;;  %v963_v29 = vrot.slane %v962_v18, 2  ;;  %v968_v31 = vmax.f32 %v927_v10, %v967_v19  ;;  %v973_v22 = vrot.slane %v930_v20, 4 }
 0x256   : > { %2606 = vpow2.f32 %v987_v25  ;;  %v991_v23 = vmul.f32 1.442695, %v981_v17  ;;  %v980_v32 = vsub.f32 %v912_v45, %v942_v26  ;;  %v954_v33 = vmax.f32 %v952_v14, %v953_v27 }
 0x257   : > { %v959_v34 = vrot.slane %v958_v28, 1  ;;  %v964_v35 = vmax.f32 %v962_v18, %v963_v29  ;;  %v969_v36 = vrot.slane %v968_v31, 2  ;;  %v974_v37 = vmax.f32 %v930_v20, %v973_v22 }
 0x258   : > { %2608 = vpow2.f32 %v991_v23  ;;  %v989_v38 = vmul.f32 1.442695, %v980_v32  ;;  %v982_v30 = vsub.f32 %v918_v49, %v954_v33 }
 0x259   : > { %v960_v39 = vmax.f32 %v958_v28, %v959_v34  ;;  %v965_v40 = vrot.slane %v964_v35, 1  ;;  %v970_v41 = vmax.f32 %v968_v31, %v969_v36  ;;  %v975_v42 = vrot.slane %v974_v37, 2 }
 0x25a   : > { %2610 = vpow2.f32 %v989_v38  ;;  %v993_v43 = vmul.f32 1.442695, %v982_v30 }
 0x25b   : > { %v983_v44 = vsub.f32 %v921_v54, %v960_v39  ;;  %v966_v46 = vmax.f32 %v964_v35, %v965_v40  ;;  %v971_v47 = vrot.slane %v970_v41, 1  ;;  %v976_v48 = vmax.f32 %v974_v37, %v975_v42 }
 0x25c   : > { %2612 = vpow2.f32 %v993_v43 }
 0x25d   : > { %v995_v45 = vmul.f32 1.442695, %v983_v44  ;;  %v984_v50 = vsub.f32 %v924_v2, %v966_v46  ;;  %v972_v51 = vmax.f32 %v970_v41, %v971_v47  ;;  %v977_v52 = vrot.slane %v976_v48, 1 }
 0x25f   : > { %2614 = vpow2.f32 %v995_v45  ;;  %v997_v53 = vmul.f32 1.442695, %v984_v50  ;;  %v985_v55 = vsub.f32 %v927_v10, %v972_v51  ;;  %v978_v58 = vmax.f32 %v976_v48, %v977_v52 }
 0x260   : > { %v2607_v49 = vpop.eup %2606 }
 0x261   : > { %2616 = vpow2.f32 %v997_v53  ;;  %v999_v59 = vmul.f32 1.442695, %v985_v55  ;;  %v986_v60 = vsub.f32 %v930_v20, %v978_v58  ;;  %v1003_v4 = vrot.slane %v2607_v49, 4 }
 0x262   : > { %v2609_v61 = vpop.eup %2608  ;;  %v1051_v11 = vmul.f32 %v2607_v49, %v3342_v56 }
 0x263   : > { %2618 = vpow2.f32 %v999_v59  ;;  %v1001_v3 = vmul.f32 1.442695, %v986_v60  ;;  %v1015_v8 = vrot.slane %v2609_v61, 4  ;;  %v1004_v9 = vadd.f32 %v2607_v49, %v1003_v4 }
 0x264   : > { %v2611_v54 = vpop.eup %2610  ;;  %v1060_v17 = vsel %vm1059_vm9, %v1051_v11, 0.0  ;;  %v1053_v28 = vmul.f32 %v2609_v61, %v3344_v57 }
 0x265   : > { %v1009_v5 = vrot.slane %v2611_v54, 4  ;;  %2620 = vpow2.f32 %v1001_v3  ;;  %v1016_v13 = vadd.f32 %v2609_v61, %v1015_v8  ;;  %v1005_v19 = vrot.slane %v1004_v9, 2 }
 0x266   : > { %v2613_v6 = vpop.eup %2612  ;;  %v1052_v32 = vmul.f32 %v2611_v54, %v3346_v62  ;;  %v1061_v33 = vrot.slane %v1060_v17, 4  ;;  %v1074_v40 = vsel %vm1059_vm9, %v1053_v28, 0.0 }
 0x267   : > { %v1021_v2 = vrot.slane %v2613_v6, 4  ;;  %v1010_v10 = vadd.f32 %v2611_v54, %v1009_v5  ;;  %v1017_v29 = vrot.slane %v1016_v13, 2  ;;  %v1006_v34 = vadd.f32 %v1005_v19, %v1004_v9 }
 0x268   : > { %v1054_v39 = vmul.f32 %v2613_v6, %v3348_v63  ;;  %v1062_v62 = vadd.f32 %v1061_v33, %v1060_v17  ;;  %v1067_v47 = vsel %vm1059_vm9, %v1052_v32, 0.0  ;;  %v1075_v61 = vrot.slane %v1074_v40, 4 }
 0x269   : > { %v2615_v12 = vpop.eup %2614  ;;  %v1022_v18 = vadd.f32 %v2613_v6, %v1021_v2  ;;  %v1011_v27 = vrot.slane %v1010_v10, 2  ;;  %v1018_v41 = vadd.f32 %v1017_v29, %v1016_v13  ;;  %v1007_v48 = vrot.slane %v1006_v34, 1 }
 0x26a   : > { %v1027_v14 = vrot.slane %v2615_v12, 4  ;;  %v1055_v43 = vmul.f32 %v2615_v12, %v3351_v7  ;;  %v1081_v55 = vsel %vm1059_vm9, %v1054_v39, 0.0  ;;  %v1068_v7 = vrot.slane %v1067_v47, 4 }
 0x26b   : > { %v2617_v16 = vpop.eup %2616  ;;  %v1023_v23 = vrot.slane %v1022_v18, 2  ;;  %v1012_v38 = vadd.f32 %v1011_v27, %v1010_v10  ;;  %v1019_v58 = vrot.slane %v1018_v41, 1  ;;  %v1008_v54 = vadd.f32 %v1007_v48, %v1006_v34 }
 0x26c   : > { %v1028_v20 = vadd.f32 %v2615_v12, %v1027_v14  ;;  %v1033_v25 = vrot.slane %v2617_v16, 4  ;;  %v1056_v46 = vmul.f32 %v2617_v16, %v3356_v15  ;;  %v1088_v59 = vsel %vm1059_vm9, %v1055_v43, 0.0 }
 0x26d   : > { %v2619_v26 = vpop.eup %2618  ;;  %v1024_v44 = vadd.f32 %v1023_v23, %v1022_v18  ;;  %v1013_v52 = vrot.slane %v1012_v38, 1  ;;  %v1082_v5 = vrot.slane %v1081_v55, 4  ;;  %v1020_v9 = vadd.f32 %v1019_v58, %v1018_v41  ;;  %v1249_v58 = vld [vmem:[#allocation10] sm:$0xff] }
 0x26e   : > { %v1034_v31 = vadd.f32 %v2617_v16, %v1033_v25  ;;  %v1039_v22 = vrot.slane %v2619_v26, 4  ;;  %v1029_v35 = vrot.slane %v1028_v20, 2  ;;  %v1057_v51 = vmul.f32 %v2619_v26, %v3360_v24 }
 0x26f   : > { %v2621_v56 = vpop.eup %2620  ;;  %v1025_v15 = vrot.slane %v1024_v44, 1  ;;  %v1095_v3 = vsel %vm1059_vm9, %v1056_v46, 0.0  ;;  %v1014_v6 = vadd.f32 %v1013_v52, %v1012_v38  ;;  %v1069_v12 = vadd.f32 %v1068_v7, %v1067_v47  ;;  %v1251_v7 = vld [vmem:[#allocation10 + $0x10] sm:$0xff] }
 0x270   : > { %v1040_v36 = vadd.f32 %v2619_v26, %v1039_v22  ;;  %v1045_v37 = vrot.slane %v2621_v56, 4  ;;  %v1035_v30 = vrot.slane %v1034_v31, 2  ;;  %v1030_v45 = vadd.f32 %v1029_v35, %v1028_v20 }
 0x271   : > { %v1058_v53 = vmul.f32 %v2621_v56, %v3364_v21  ;;  %v1102_v24 = vsel %vm1059_vm9, %v1057_v51, 0.0  ;;  %v1089_v21 = vrot.slane %v1088_v59, 4  ;;  %v1096_v10 = vrot.slane %v1095_v3, 4 }
 0x272   : > { %v1041_v57 = vrot.slane %v1040_v36, 2  ;;  %v1046_v42 = vadd.f32 %v2621_v56, %v1045_v37  ;;  %v1036_v63 = vadd.f32 %v1035_v30, %v1034_v31  ;;  %v1031_v4 = vrot.slane %v1030_v45, 1 }
 0x273   : > { %v1109_v2 = vsel %vm1059_vm9, %v1058_v53, 0.0  ;;  %v1026_v13 = vadd.f32 %v1025_v15, %v1024_v44  ;;  %v1076_v16 = vadd.f32 %v1075_v61, %v1074_v40  ;;  %v1103_v18 = vrot.slane %v1102_v24, 4 }
 0x274   : > { %v1047_v50 = vrot.slane %v1046_v42, 2  ;;  %v1042_v49 = vadd.f32 %v1041_v57, %v1040_v36  ;;  %v1037_v8 = vrot.slane %v1036_v63, 1  ;;  %v1032_v19 = vadd.f32 %v1031_v4, %v1030_v45 }
 0x275   : > { %v1083_v20 = vadd.f32 %v1082_v5, %v1081_v55  ;;  %v1110_v25 = vrot.slane %v1109_v2, 4  ;;  %v1116_v17 = vmul.f32 8.0, %v1008_v54  ;;  %v1063_v27 = vrot.slane %v1062_v62, 2 }
 0x276   : > { %v1048_v60 = vadd.f32 %v1047_v50, %v1046_v42  ;;  %v1043_v11 = vrot.slane %v1042_v49, 1  ;;  %v1038_v26 = vadd.f32 %v1037_v8, %v1036_v63  ;;  %v1090_v28 = vadd.f32 %v1089_v21, %v1088_v59 }
 0x277   : > { %v1117_v29 = vmul.f32 8.0, %v1014_v6  ;;  %v1070_v22 = vrot.slane %v1069_v12, 2  ;;  %v1097_v56 = vadd.f32 %v1096_v10, %v1095_v3  ;;  %v1118_v23 = vmul.f32 8.0, %v1020_v9  ;;  %v1253_v10 = vld [vmem:[#allocation10 + $0x20] sm:$0xff] }
 0x278   : > { %v1049_v14 = vrot.slane %v1048_v60, 1  ;;  %v1044_v31 = vadd.f32 %v1043_v11, %v1042_v49  ;;  %v1077_v33 = vrot.slane %v1076_v16, 2  ;;  %v1104_v34 = vadd.f32 %v1103_v18, %v1102_v24  ;;  %v1250_v49 = vld [vmem:[#allocation10 + $0x8] sm:$0xff] }
 0x279   : > { %v1119_v35 = vmul.f32 8.0, %v1026_v13  ;;  %v1084_v36 = vrot.slane %v1083_v20, 2  ;;  %v1111_v37 = vadd.f32 %v1110_v25, %v1109_v2  ;;  %v1120_v38 = vmul.f32 8.0, %v1032_v19  ;;  %v1254_v13 = vld [vmem:[#allocation10 + $0x28] sm:$0xff] }
 0x27a   : > { %v1050_v32 = vadd.f32 %v1049_v14, %v1048_v60  ;;  %2622 = vrcp.f32 %v1116_v17  ;;  %v1064_v30 = vadd.f32 %v1063_v27, %v1062_v62  ;;  %v1091_v39 = vrot.slane %v1090_v28, 2  ;;  %v1252_v60 = vld [vmem:[#allocation10 + $0x18] sm:$0xff] }
 0x27b   : > { %v1121_v40 = vmul.f32 8.0, %v1038_v26  ;;  %2624 = vrcp.f32 %v1117_v29  ;;  %v1071_v41 = vadd.f32 %v1070_v22, %v1069_v12  ;;  %v1098_v57 = vrot.slane %v1097_v56, 2 }
 0x27c   : > { %v1122_v42 = vmul.f32 8.0, %v1044_v31  ;;  %2626 = vrcp.f32 %v1118_v23  ;;  %v1078_v43 = vadd.f32 %v1077_v33, %v1076_v16  ;;  %v1105_v44 = vrot.slane %v1104_v34, 2 }
 0x27d   : > { %v1123_v46 = vmul.f32 8.0, %v1050_v32  ;;  %2628 = vrcp.f32 %v1119_v35  ;;  %v1085_v47 = vadd.f32 %v1084_v36, %v1083_v20  ;;  %v1112_v48 = vrot.slane %v1111_v37, 2 }
 0x27e   : > { %2630 = vrcp.f32 %v1120_v38  ;;  %v1092_v45 = vadd.f32 %v1091_v39, %v1090_v28  ;;  %v1065_v50 = vrot.slane %v1064_v30, 1  ;;  %v1072_v51 = vrot.slane %v1071_v41, 1 }
 0x27f   : > { %2632 = vrcp.f32 %v1121_v40  ;;  %v1099_v52 = vadd.f32 %v1098_v57, %v1097_v56  ;;  %v1079_v62 = vrot.slane %v1078_v43, 1  ;;  %v1106_v63 = vadd.f32 %v1105_v44, %v1104_v34  ;;  %v1255_v40 = vld [vmem:[#allocation10 + $0x30] sm:$0xff]  ;;  %v1347_v44 = vld [vmem:[#allocation11 + $0x28] sm:$0xff] }
 0x280   : > { %2634 = vrcp.f32 %v1122_v42  ;;  %v1086_v53 = vrot.slane %v1085_v47, 1  ;;  %v1113_v55 = vadd.f32 %v1112_v48, %v1111_v37  ;;  %v1093_v59 = vrot.slane %v1092_v45, 1  ;;  %v1343_v42 = vld [vmem:[#allocation11 + $0x8] sm:$0xff]  ;;  %v1342_v48 = vld [vmem:[#allocation11] sm:$0xff] }
 0x281   : > { %2636 = vrcp.f32 %v1123_v46  ;;  %v2417_v15 = vpack.c.bf16 %v1250_v49, %v1249_v58  ;;  %v1066_v3 = vadd.f32 %v1065_v50, %v1064_v30  ;;  %v1073_v54 = vadd.f32 %v1072_v51, %v1071_v41  ;;  %v1256_v41 = vld [vmem:[#allocation10 + $0x38] sm:$0xff]  ;;  %v2273_v51 = vld [vmem:[%s3579_s6] ss:$0 sm:$0xff] }
 0x282   : > { %v1100_v4 = vrot.slane %v1099_v52, 1  ;;  %v1080_v24 = vadd.f32 %v1079_v62, %v1078_v43  ;;  %v1107_v6 = vrot.slane %v1106_v63, 1  ;;  %v2420_v8 = vpack.c.bf16 %v1252_v60, %v1251_v7  ;;  %v1359_v43 = vld [vmem:[#allocation11 + $0x88] sm:$0xff]  ;;  %v1362_v62 = vld [vmem:[#allocation11 + $0xa0] sm:$0xff] }
 0x283   : > { %2418 = vmatpush3.bf16.msra.mxu1 %v2417_v15  ;;  %v1087_v2 = vadd.f32 %v1086_v53, %v1085_v47  ;;  %v1114_v9 = vrot.slane %v1113_v55, 1  ;;  %v1094_v16 = vadd.f32 %v1093_v59, %v1092_v45  ;;  %v2423_v31 = vpack.c.bf16 %v1254_v13, %v1253_v10  ;;  %v1363_v47 = vld [vmem:[#allocation11 + $0xa8] sm:$0xff]  ;;  %v1358_v45 = vld [vmem:[#allocation11 + $0x80] sm:$0xff] }
 0x284   : > { %v2623_v61 = vpop.eup %2622  ;;  %2419 = vmatprep.subr.bf16.mxu1 %v2929_v0  ;;  %v1101_v20 = vadd.f32 %v1100_v4, %v1099_v52  ;;  %v1108_v27 = vadd.f32 %v1107_v6, %v1106_v63  ;;  %v2426_v57 = vpack.c.bf16 %v1256_v41, %v1255_v40  ;;  %v2428_v46 = vpack.c.bf16 %v1359_v43, %v1343_v42  ;;  %v1346_v52 = vld [vmem:[#allocation11 + $0x20] sm:$0xff]  ;;  %v1375_v7 = vld [vmem:[#allocation11 + $0x108] sm:$0xff]  ;;  %v1348_v43 = vld [vmem:[#allocation11 + $0x30] sm:$0xff] }
 0x285   : > { %v2625_v5 = vpop.eup %2624  ;;  %v1140_v11 = vmul.f32 %v2623_v61, %v1066_v3  ;;  %v1115_v56 = vadd.f32 %v1114_v9, %v1113_v55  ;;  %v2430_v50 = vpack.c.bf16 %v1358_v45, %v1342_v48  ;;  %v2446_v58 = vpack.c.bf16 %v1362_v62, %v1346_v52  ;;  %v1391_v59 = vld [vmem:[#allocation11 + $0x188] sm:$0xff]  ;;  %v1374_v3 = vld [vmem:[#allocation11 + $0x100] sm:$0xff]  ;;  %v1381_v45 = vld [vmem:[#allocation11 + $0x138] sm:$0xff] }
 0x286   : > { %v2627_v21 = vpop.eup %2626  ;;  %v1141_v12 = vmul.f32 %v2625_v5, %v1073_v54  ;;  %2429 = vmatprep.subr.bf16.mxu0 %v2428_v46  ;;  %v1379_v15 = vld [vmem:[#allocation11 + $0x128] sm:$0xff]  ;;  %v2432_v60 = vpack.c.bf16 %v1391_v59, %v1375_v7  ;;  %v1390_v54 = vld [vmem:[#allocation11 + $0x180] sm:$0xff]  ;;  %v1353_v59 = vld [vmem:[#allocation11 + $0x58] sm:$0xff] }
 0x287   : > { %v2629_v14 = vpop.eup %2628  ;;  %v1142_v18 = vmul.f32 %v2627_v21, %v1080_v24  ;;  %2421 = vmatpush3.bf16.msra.mxu1 %v2420_v8  ;;  %v1395_v61 = vld [vmem:[#allocation11 + $0x1a8] sm:$0xff]  ;;  %v2434_v5 = vpack.c.bf16 %v1390_v54, %v1374_v3  ;;  %v1378_v24 = vld [vmem:[#allocation11 + $0x120] sm:$0xff]  ;;  %v1345_v21 = vld [vmem:[#allocation11 + $0x18] sm:$0xff] }
 0x288   : > { %v2631_v19 = vpop.eup %2630  ;;  %v1143_v25 = vmul.f32 %v2629_v14, %v1087_v2  ;;  %v1167_v17 = vsel %vm583_vm2, %v1141_v12, %v1140_v11  ;;  %2422 = vmatprep.subr.bf16.mxu1 %v2929_v0  ;;  %v2448_v4 = vpack.c.bf16 %v1395_v61, %v1379_v15  ;;  %v1394_v6 = vld [vmem:[#allocation11 + $0x1a0] sm:$0xff]  ;;  %v1361_v2 = vld [vmem:[#allocation11 + $0x98] sm:$0xff]  ;;  %v1351_v11 = vld [vmem:[#allocation11 + $0x48] sm:$0xff] }
 0x289   : > { %v2633_v26 = vpop.eup %2632  ;;  %v1144_v28 = vmul.f32 %v2631_v19, %v1094_v16  ;;  %v1168_v29 = vsel %vm585_vm3, %v1142_v18, %v1167_v17  ;;  %v2450_v8 = vpack.c.bf16 %v1394_v6, %v1378_v24  ;;  %v2436_v9 = vpack.c.bf16 %v1361_v2, %v1345_v21  ;;  %v1367_v12 = vld [vmem:[#allocation11 + $0xc8] sm:$0xff]  ;;  %v2275_v13 = vld [vmem:[%s3614_s11] ss:$0 sm:$0xff]  ;;  %v1344_v14 = vld [vmem:[#allocation11 + $0x10] sm:$0xff]  ;;  %s2812_s11 = sshll.u32 %s2934_s29, 4  ;;  %s2813_s11 = int_to_ptr.vmem [resolvable:$false] %s2812_s11 }
 0x28a   : > { %v2635_v22 = vpop.eup %2634  ;;  %v1145_v23 = vmul.f32 %v2633_v26, %v1101_v20  ;;  %v1169_v32 = vsel %vm587_vm4, %v1143_v25, %v1168_v29  ;;  %v2460_v10 = vpack.c.bf16 %v1367_v12, %v1351_v11  ;;  %v1360_v16 = vld [vmem:[#allocation11 + $0x90] sm:$0xff]  ;;  %v1350_v19 = vld [vmem:[#allocation11 + $0x40] sm:$0xff]  ;;  %v1377_v26 = vld [vmem:[#allocation11 + $0x118] sm:$0xff]  ;;  %s2814_s30 = scalar_lea.vmem %s2813_s11, 2048  ;;  %p2815_p13 = scmp.lt.s32.totalorder %s3492_s24, %s2813_s11 }
 0x28b   : > { %v2637_v33 = vpop.eup %2636  ;;  %v1146_v34 = vmul.f32 %v2635_v22, %v1108_v27  ;;  %v1170_v35 = vsel %vm589_vm5, %v1144_v28, %v1169_v32  ;;  %2424 = vmatpush3.bf16.msra.mxu1 %v2423_v31  ;;  %v1366_v20 = vld [vmem:[#allocation11 + $0xc0] sm:$0xff]  ;;  %v1393_v27 = vld [vmem:[#allocation11 + $0x198] sm:$0xff]  ;;  %v2438_v28 = vpack.c.bf16 %v1360_v16, %v1344_v14  ;;  %v1383_v29 = vld [vmem:[#allocation11 + $0x148] sm:$0xff]  ;;  %p2816_p0 = scmp.lt.s32.totalorder %s2814_s30, %s2808_s22 }
 0x28c   : > { %v1147_v36 = vmul.f32 %v2637_v33, %v1115_v56  ;;  %v1171_v37 = vsel %vm591_vm6, %v1145_v23, %v1170_v35  ;;  %2425 = vmatprep.subr.bf16.mxu1 %v2929_v0  ;;  %v2444_v0 = vpack.c.bf16 %v1363_v47, %v1347_v44  ;;  %v1399_v31 = vld [vmem:[#allocation11 + $0x1c8] sm:$0xff]  ;;  %v2462_v56 = vpack.c.bf16 %v1366_v20, %v1350_v19  ;;  %v1376_v23 = vld [vmem:[#allocation11 + $0x110] sm:$0xff]  ;;  %v1382_v33 = vld [vmem:[#allocation11 + $0x140] sm:$0xff] }
 0x28d   : > { %v1172_v38 = vsel %vm593_vm7, %v1146_v34, %v1171_v37  ;;  %v1392_v32 = vld [vmem:[#allocation11 + $0x190] sm:$0xff]  ;;  %v2440_v34 = vpack.c.bf16 %v1393_v27, %v1377_v26  ;;  %v1398_v35 = vld [vmem:[#allocation11 + $0x1c0] sm:$0xff]  ;;  %v1365_v37 = vld [vmem:[#allocation11 + $0xb8] sm:$0xff]  ;;  %p2817_p2 = por %p2816_p0, %p2815_p13 }
 0x28e   : > { %v1173_v30 = vsel %vm595_vm8, %v1147_v36, %v1172_v38  ;;  %v1349_v36 = vld [vmem:[#allocation11 + $0x38] sm:$0xff]  ;;  %v2464_v38 = vpack.c.bf16 %v1399_v31, %v1383_v29  ;;  %v2442_v40 = vpack.c.bf16 %v1392_v32, %v1376_v23  ;;  %v2466_v41 = vpack.c.bf16 %v1398_v35, %v1382_v33  ;;  %v1364_v44 = vld [vmem:[#allocation11 + $0xb0] sm:$0xff]  ;;  %v1354_v46 = vld [vmem:[#allocation11 + $0x60] sm:$0xff] }
 0x28f   : > { %1174 = vrot.lane.b32.xlu0 %v1173_v30, %s2933_s1  ;;  %2427 = vmatpush3.bf16.msra.mxu1 %v2426_v57  ;;  %v1355_v30 = vld [vmem:[#allocation11 + $0x68] sm:$0xff]  ;;  %v2452_v57 = vpack.c.bf16 %v1365_v37, %v1349_v36  ;;  %v1370_v47 = vld [vmem:[#allocation11 + $0xe0] sm:$0xff]  ;;  %v2454_v52 = vpack.c.bf16 %v1364_v44, %v1348_v43  ;;  %v1369_v15 = vld [vmem:[#allocation11 + $0xd8] sm:$0xff]  ;;  %p2818_p8 = pnand %p2817_p2, %p2811_p1 }
 0x290   : > { %2445 = vmatprep.subr.bf16.mxu1 %v2444_v0  ;;  %v1397_v0 = vld [vmem:[#allocation11 + $0x1b8] sm:$0xff]  ;;  %v2478_v62 = vpack.c.bf16 %v1370_v47, %v1354_v46  ;;  %v1368_v24 = vld [vmem:[#allocation11 + $0xd0] sm:$0xff] }
 0x291   : > { %v1373_v61 = vld [vmem:[#allocation11 + $0xf8] sm:$0xff]  ;;  %v1356_v6 = vld [vmem:[#allocation11 + $0x70] sm:$0xff] }
 0x292   : > { %v1385_v2 = vld [vmem:[#allocation11 + $0x158] sm:$0xff]  ;;  %v1384_v14 = vld [vmem:[#allocation11 + $0x150] sm:$0xff] }
 0x293   : > { %v1389_v11 = vld [vmem:[#allocation11 + $0x178] sm:$0xff]  ;;  %v1388_v19 = vld [vmem:[#allocation11 + $0x170] sm:$0xff] }
 0x294   : > { %v1405_v12 = vld [vmem:[#allocation11 + $0x1f8] sm:$0xff]  ;;  %v1404_v20 = vld [vmem:[#allocation11 + $0x1f0] sm:$0xff] }
 0x295   : > { %v2490_v26 = vpack.c.bf16 %v1404_v20, %v1388_v19 }
 0x301   : > { %v1175_v39 = vpop.permute.xlu0 %1174 }
 0x302   : > { %2375 = vmatmul.mubr.msk.f32.vlgmr.msra.gmra.mrb[2].mxu0 %vm498_vm1, %v1175_v39  ;;  %v1371_v39 = vld [vmem:[#allocation11 + $0xe8] sm:$0xff] }
 0x303   : > { %1474 = vmatprep.mubr.f32.mxu0 %v2931_v1  ;;  %2431 = vmatpush1.bf16.msra.mxu0 %v2430_v50  ;;  %v2476_v42 = vpack.c.bf16 %v1371_v39, %v1355_v30  ;;  %v1387_v50 = vld [vmem:[#allocation11 + $0x168] sm:$0xff] }
 0x304   : > { %2433 = vmatprep.subr.bf16.mxu0 %v2432_v60  ;;  %v1357_v60 = vld [vmem:[#allocation11 + $0x78] sm:$0xff] }
 0x305   : > { %v2484_v21 = vpack.c.bf16 %v1373_v61, %v1357_v60 }
 0x307   : > { %2435 = vmatpush1.bf16.msra.mxu0 %v2434_v5  ;;  %v2468_v5 = vpack.c.bf16 %v1369_v15, %v1353_v59 }
 0x308   : > { %2437 = vmatprep.subr.bf16.mxu0 %v2436_v9  ;;  %v1401_v9 = vld [vmem:[#allocation11 + $0x1d8] sm:$0xff] }
 0x309   : > { %v2472_v16 = vpack.c.bf16 %v1401_v9, %v1385_v2 }
 0x3d5   : > { %v1244_v63 = vpop.f32.mrb[2].mxu0 }
 0x3d6   : > { %v1245_v53 = vadd.f32 %v2273_v51, %v1244_v63  ;;  %v2376_v55 = vpop.f32.mrb[3].mxu0  ;;  %v1403_v51 = vld [vmem:[#allocation11 + $0x1e8] sm:$0xff]  ;;  %v1380_v63 = vld [vmem:[#allocation11 + $0x130] sm:$0xff] }
 0x3d7   : > { %v1396_v55 = vld [vmem:[#allocation11 + $0x1b0] sm:$0xff]  ;;  %v2480_v7 = vpack.c.bf16 %v1403_v51, %v1387_v50 }
 0x3d8   : > { %v1248_v49 = vmax.f32 %v1245_v53, 0.0  ;;  %v2456_v53 = vpack.c.bf16 %v1397_v0, %v1381_v45  ;;  %v2458_v3 = vpack.c.bf16 %v1396_v55, %v1380_v63 }
 0x3da   : > { %2394 = vmatmul.mubr.msk.f32.vlgmr.msra.gmra.mrb[8].mxu1 %vm1264_vm10, %v1248_v49  ;;  %v1402_v49 = vld [vmem:[#allocation11 + $0x1e0] sm:$0xff] }
 0x3db   : > { %2447 = vmatpush1.bf16.msra.mxu1 %v2446_v58  ;;  %1628 = vmatprep.mubr.f32.mxu1 %v2931_v1  ;;  %v1386_v58 = vld [vmem:[#allocation11 + $0x160] sm:$0xff] }
 0x3dc   : > { %2449 = vmatprep.subr.bf16.mxu1 %v2448_v4  ;;  %v2482_v54 = vpack.c.bf16 %v1402_v49, %v1386_v58  ;;  %v1352_v4 = vld [vmem:[#allocation11 + $0x50] sm:$0xff] }
 0x3df   : > { %2451 = vmatpush1.bf16.msra.mxu1 %v2450_v8  ;;  %v1372_v8 = vld [vmem:[#allocation11 + $0xf0] sm:$0xff] }
 0x3e0   : > { %2461 = vmatprep.subr.bf16.mxu1 %v2460_v10  ;;  %v2470_v10 = vpack.c.bf16 %v1368_v24, %v1352_v4 }
 0x4ad   : > { %v1334_v18 = vpop.f32.mrb[8].mxu1 }
 0x4ae   : > { %v1335_v25 = vadd.f32 %v2275_v13, %v1334_v18  ;;  %v2395_v17 = vpop.f32.mrb[9].mxu1  ;;  %v2486_v13 = vpack.c.bf16 %v1372_v8, %v1356_v6  ;;  %v1400_v18 = vld [vmem:[#allocation11 + $0x1d0] sm:$0xff] }
 0x4af   : > { %v2474_v17 = vpack.c.bf16 %v1400_v18, %v1384_v14 }
 0x4b0   : > { %v3411_v22 = vmax.f32 %v1335_v25, 0.0  ;;  %v2488_v25 = vpack.c.bf16 %v1405_v12, %v1389_v11 }
 0x4b2   : > { %1340 = vrot.lane.b32.xlu1 %v3411_v22, %s2933_s1  ;;  %2277 = vmatmul.mubr.msk.f32.vlgmr.msra.gmra.mrb[4].mxu0 %vm498_vm1, %v3411_v22  ;;  %s3490_s1 = scalar_lea.hbm %s3615_s14, %s3591_s27 }
 0x4b3   : > { %2281 = vmatmul.mubr.msk.f32.vlgmr.msra.gmra.mrb[10].mxu1 %vm498_vm1, %v3411_v22  ;;  %2439 = vmatpush1.bf16.msra.mxu0 %v2438_v28 }
 0x4b4   : > { %2463 = vmatpush1.bf16.msra.mxu1 %v2462_v56  ;;  %1480 = vmatprep.mubr.f32.mxu0 %v2931_v1 }
 0x4b5   : > { %2441 = vmatprep.subr.bf16.mxu0 %v2440_v34  ;;  %1634 = vmatprep.mubr.f32.mxu1 %v2931_v1 }
 0x4b6   : > { %2465 = vmatprep.subr.bf16.mxu1 %v2464_v38 }
 0x4b7   : > { %2443 = vmatpush1.bf16.msra.mxu0 %v2442_v40 }
 0x4b8   : > { %2467 = vmatpush1.bf16.msra.mxu1 %v2466_v41  ;;  %2453 = vmatprep.subr.bf16.mxu0 %v2452_v57 }
 0x4b9   : > { %2477 = vmatprep.subr.bf16.mxu1 %v2476_v42 }
 0x524   : > { %v3421_v48 = vpop.permute.xlu1 %1340 }
 0x525   : > { %2278 = vmatmul.mubr.msk.f32.gmra.mrb[6].mxu0 %vm498_vm1, %v3421_v48  ;;  %2282 = vmatmul.mubr.msk.f32.gmra.mrb[12].mxu1 %vm498_vm1, %v3421_v48 }
 0x526   : > { %1551 = vmatprep.mubr.f32.mxu0 %v2931_v1  ;;  %1782 = vmatprep.mubr.f32.mxu1 %v2931_v1 }
 0x529   : > { %2279 = vmatmul.mubr.msk.f32.vlgmr.msra.gmra.mrb[8].mxu0 %vm498_vm1, %v3411_v22  ;;  %2285 = vmatmul.mubr.msk.f32.vlgmr.msra.gmra.mrb[14].mxu1 %vm498_vm1, %v3411_v22 }
 0x52a   : > { %2455 = vmatpush1.bf16.msra.mxu0 %v2454_v52  ;;  %2479 = vmatpush1.bf16.msra.mxu1 %v2478_v62 }
 0x52b   : > { %1557 = vmatprep.mubr.f32.mxu0 %v2931_v1  ;;  %2457 = vmatprep.subr.bf16.mxu0 %v2456_v53 }
 0x52c   : > { %1788 = vmatprep.mubr.f32.mxu1 %v2931_v1  ;;  %2481 = vmatprep.subr.bf16.mxu1 %v2480_v7 }
 0x52d   : > { %2280 = vmatmul.mubr.msk.f32.gmra.mrb[10].mxu0 %vm498_vm1, %v3421_v48  ;;  %2286 = vmatmul.mubr.msk.f32.gmra.mrb[16].mxu1 %vm498_vm1, %v3421_v48 }
 0x52e   : > { %2459 = vmatpush1.bf16.msra.mxu0 %v2458_v3  ;;  %2483 = vmatpush1.bf16.msra.mxu1 %v2482_v54 }
 0x52f   : > { %1705 = vmatprep.mubr.f32.mxu0 %v2931_v1  ;;  %2469 = vmatprep.subr.bf16.mxu0 %v2468_v5 }
 0x530   : > { %1936 = vmatprep.mubr.f32.mxu1 %v2931_v1  ;;  %2492 = vmatprep.subr.bf16.mxu1 %v2484_v21 }
 0x531   : > { %2283 = vmatmul.mubr.msk.f32.vlgmr.msra.gmra.mrb[12].mxu0 %vm498_vm1, %v3411_v22  ;;  %2289 = vmatmul.mubr.msk.f32.vlgmr.msra.gmra.mrb[18].mxu1 %vm498_vm1, %v3411_v22 }
 0x532   : > { %2471 = vmatpush1.bf16.msra.mxu0 %v2470_v10  ;;  %2494 = vmatpush1.bf16.msra.mxu1 %v2486_v13 }
 0x533   : > { %1711 = vmatprep.mubr.f32.mxu0 %v2931_v1  ;;  %2473 = vmatprep.subr.bf16.mxu0 %v2472_v16 }
 0x534   : > { %1942 = vmatprep.mubr.f32.mxu1 %v2931_v1  ;;  %2493 = vmatprep.subr.bf16.mxu1 %v2488_v25 }
 0x535   : > { %2284 = vmatmul.mubr.msk.f32.gmra.mrb[14].mxu0 %vm498_vm1, %v3421_v48  ;;  %2290 = vmatmul.mubr.msk.f32.gmra.mrb[20].mxu1 %vm498_vm1, %v3421_v48 }
 0x536   : > { %2475 = vmatpush1.bf16.msra.mxu0 %v2474_v17  ;;  %2495 = vmatpush1.bf16.msra.mxu1 %v2490_v26 }
 0x537   : > { %1859 = vmatprep.mubr.f32.mxu0 %v2931_v1  ;;  %2485 = vmatprep.subr.bf16.mxu0 %v2484_v21 }
 0x538   : > { %2019 = vmatprep.mubr.f32.mxu1 %v2931_v1 }
 0x539   : > { %2287 = vmatmul.mubr.msk.f32.vlgmr.msra.gmra.mrb[16].mxu0 %vm498_vm1, %v3411_v22  ;;  %2292 = vmatmul.mubr.msk.f32.vlgmr.msra.gmra.mrb[22].mxu1 %vm498_vm1, %v3421_v48 }
 0x53a   : > { %2487 = vmatpush1.bf16.msra.mxu0 %v2486_v13  ;;  %1865 = vmatprep.mubr.f32.mxu0 %v2931_v1 }
 0x53b   : > { %2489 = vmatprep.subr.bf16.mxu0 %v2488_v25 }
 0x53d   : > { %2288 = vmatmul.mubr.msk.f32.gmra.mrb[18].mxu0 %vm498_vm1, %v3421_v48 }
 0x53e   : > { %2491 = vmatpush1.bf16.msra.mxu0 %v2490_v26  ;;  %2013 = vmatprep.mubr.f32.mxu0 %v2931_v1 }
 0x541   : > { %2291 = vmatmul.mubr.msk.f32.vlgmr.msra.gmra.mrb[20].mxu0 %vm498_vm1, %v3411_v22 }
 0x585   : > { %v1476_v27 = vpop.f32.mrb[4].mxu0 }
 0x586   : > { %v1630_v28 = vpop.f32.mrb[10].mxu1  ;;  %v1478_v29 = vpop.f32.mrb[5].mxu0 }
 0x587   : > { %v1632_v31 = vpop.f32.mrb[11].mxu1 }
 0x5f8   : > { %v1482_v56 = vpop.f32.mrb[6].mxu0  ;;  %v1636_v23 = vpop.f32.mrb[12].mxu1 }
 0x5f9   : > { %v1484_v32 = vpop.f32.mrb[7].mxu0  ;;  %v1638_v33 = vpop.f32.mrb[13].mxu1 }
 0x5fc   : > { %v1553_v34 = vpop.f32.mrb[8].mxu0  ;;  %v1784_v35 = vpop.f32.mrb[14].mxu1 }
 0x5fd   : > { %v2026_v36 = vmul.f32 %v1784_v35, %v1476_v27  ;;  %v1555_v37 = vpop.f32.mrb[9].mxu0  ;;  %v1786_v38 = vpop.f32.mrb[15].mxu1 }
 0x5fe   : > { %v2027_v30 = vmul.f32 %v1786_v38, %v1478_v29 }
 0x5ff   : > { %2034 = vst [vmem:[%s3464_s10] sm:$0xff] %v2026_v36 }
 0x600   : > { %2035 = vst [vmem:[%s3464_s10 + $0x8] sm:$0xff] %v2027_v30  ;;  %v1559_v1 = vpop.f32.mrb[10].mxu0  ;;  %v1790_v22 = vpop.f32.mrb[16].mxu1 }
 0x601   : > { %v2042_v39 = vmul.f32 %v1790_v22, %v1482_v56  ;;  %v1561_v40 = vpop.f32.mrb[11].mxu0  ;;  %v1792_v41 = vpop.f32.mrb[17].mxu1 }
 0x602   : > { %v2043_v57 = vmul.f32 %v1792_v41, %v1484_v32 }
 0x603   : > { %2050 = vst [vmem:[%s3469_s21] sm:$0xff] %v2042_v39 }
 0x604   : > { %2051 = vst [vmem:[%s3469_s21 + $0x8] sm:$0xff] %v2043_v57  ;;  %v1707_v42 = vpop.f32.mrb[12].mxu0  ;;  %v1938_v43 = vpop.f32.mrb[18].mxu1 }
 0x605   : > { %v2030_v44 = vmul.f32 %v1938_v43, %v1630_v28  ;;  %v3473_v46 = vpop.f32.mrb[13].mxu0  ;;  %v1940_v47 = vpop.f32.mrb[19].mxu1 }
 0x606   : > { %v2031_v48 = vmul.f32 %v1940_v47, %v1632_v31 }
 0x607   : > { %2038 = vst [vmem:[%s3464_s10 + $0x20] sm:$0xff] %v2030_v44 }
 0x608   : > { %2039 = vst [vmem:[%s3464_s10 + $0x28] sm:$0xff] %v2031_v48  ;;  %v1713_v45 = vpop.f32.mrb[14].mxu0  ;;  %v1944_v0 = vpop.f32.mrb[20].mxu1 }
 0x609   : > { %v2046_v50 = vmul.f32 %v1944_v0, %v1636_v23  ;;  %v1715_v51 = vpop.f32.mrb[15].mxu0  ;;  %v1946_v52 = vpop.f32.mrb[21].mxu1 }
 0x60a   : > { %v2047_v62 = vmul.f32 %v1946_v52, %v1638_v33 }
 0x60b   : > { %2054 = vst [vmem:[%s3469_s21 + $0x20] sm:$0xff] %v2046_v50 }
 0x60c   : > { %2055 = vst [vmem:[%s3469_s21 + $0x28] sm:$0xff] %v2047_v62  ;;  %v1861_v63 = vpop.f32.mrb[16].mxu0  ;;  %v2021_v53 = vpop.f32.mrb[22].mxu1 }
 0x60d   : > { %v2028_v55 = vmul.f32 %v1861_v63, %v1553_v34  ;;  %v2048_v58 = vmul.f32 %v2021_v53, %v1713_v45  ;;  %v1863_v49 = vpop.f32.mrb[17].mxu0  ;;  %v2023_v7 = vpop.f32.mrb[23].mxu1 }
 0x60e   : > { %v2029_v59 = vmul.f32 %v1863_v49, %v1555_v37  ;;  %v2049_v15 = vmul.f32 %v2023_v7, %v1715_v51 }
 0x60f   : > { %2036 = vst [vmem:[%s3464_s10 + $0x10] sm:$0xff] %v2028_v55  ;;  %2056 = vst [vmem:[%s3469_s21 + $0x30] sm:$0xff] %v2048_v58 }
 0x610   : > { %2037 = vst [vmem:[%s3464_s10 + $0x18] sm:$0xff] %v2029_v59  ;;  %2057 = vst [vmem:[%s3469_s21 + $0x38] sm:$0xff] %v2049_v15  ;;  %v1867_v60 = vpop.f32.mrb[18].mxu0 }
 0x611   : > { %v2044_v61 = vmul.f32 %v1867_v60, %v1559_v1  ;;  %v1869_v3 = vpop.f32.mrb[19].mxu0 }
 0x612   : > { %v2045_v54 = vmul.f32 %v1869_v3, %v1561_v40 }
 0x613   : > { %2052 = vst [vmem:[%s3469_s21 + $0x10] sm:$0xff] %v2044_v61 }
 0x614   : > { %2053 = vst [vmem:[%s3469_s21 + $0x18] sm:$0xff] %v2045_v54  ;;  %v2015_v4 = vpop.f32.mrb[20].mxu0 }
 0x615   : > { %v2032_v5 = vmul.f32 %v2015_v4, %v1707_v42  ;;  %v2017_v24 = vpop.f32.mrb[21].mxu0 }
 0x616   : > { %2821 = shalt.err (!%p2818_p8)
}
 0x617   : > { %s2822_s21 = scalar_lea.hbm %s3490_s1, 1024  ;;  %s2826_s29 = scalar_lea.hbm %s3615_s14, 2048 }
 0x618   : > { %p2823_p4 = scmp.ne.s32.totalorder %s3490_s1, %s2822_s21  ;;  %p2827_p3 = scmp.lt.u32.totalorder %s3490_s1, %s3615_s14 }
 0x619   : > { %p2828_p5 = scmp.lt.u32.totalorder %s2826_s29, %s2822_s21  ;;  %p2830_p6 = scmp.lt.u32.totalorder %s2822_s21, %s3490_s1 }
 0x61a   : > { %p2824_p10 = pnand %p2823_p4, %p3616_p9 }
 0x61b   : > { %p2829_p7 = por %p2828_p5, %p2827_p3 }
 0x61c   : > { %p2825_p11 = pneg %p2824_p10 }
 0x61d   : > { %p2831_p12 = por %p2830_p6, %p2829_p7 }
 0x61f   : > { %p2832_p1 = pnand %p2831_p12, %p2825_p11 }
 0x621   : > { %2835 = shalt.err (!%p2832_p1)
}
 0x622   : > { %2519 = dma.vmem_to_hbm [thread:$0]  (%p3616_p9), %s3492_s24, 1024, %s3490_s1, %s2064_s26   ;;  %v2033_v6 = vmul.f32 %v2017_v24, %v3473_v46  ;;  %2040 = vst [vmem:[%s3464_s10 + $0x30] sm:$0xff] %v2032_v5 }
 0x623   : > { %s3617_s27 = sshll.u32 %s3017_s23, 10  ;;  %s3618_s30 = sld [smem:[#allocation24_spill]] }
 0x624   : > { %s3619_s12 = sshll.u32 %s3464_s10, 4  ;;  %2041 = vst [vmem:[%s3464_s10 + $0x38] sm:$0xff] %v2033_v6  ;;  %s2059_s29 = scalar_lea.sflag [#allocation4], %s3249_s15  ;;  %s3529_s12 = int_to_ptr.vmem [resolvable:$true] %s3619_s12 }
 0x625   : > { %s2836_s11 = scalar_lea.vmem %s3529_s12, 1024  ;;  %s2935_s23 = smov [#allocation13]  }
 0x626   : > { %p2837_p13 = scmp.ne.s32.totalorder %s3529_s12, %s2836_s11  ;;  %s2840_s24 = sshll.u32 %s2935_s23, 4  ;;  %s2841_s24 = int_to_ptr.vmem [resolvable:$false] %s2840_s24 }
 0x627   : > { %s2842_s1 = scalar_lea.vmem %s2841_s24, 2048  ;;  %p2843_p8 = scmp.lt.s32.totalorder %s3529_s12, %s2841_s24 }
 0x628   : > { %p2838_p0 = pnand %p2837_p13, %p3616_p9  ;;  %p2844_p4 = scmp.lt.s32.totalorder %s2842_s1, %s2836_s11 }
 0x629   : > { %s3525_s21 = scalar_lea.hbm %s3618_s30, %s3617_s27 }
 0x62a   : > { %p2839_p2 = pneg %p2838_p0  ;;  %p2845_p10 = por %p2844_p4, %p2843_p8 }
 0x62c   : > { %p2846_p11 = pnand %p2845_p10, %p2839_p2 }
 0x62e   : > { %2849 = shalt.err (!%p2846_p11)
}
 0x62f   : > { %s2850_s15 = scalar_lea.hbm %s3525_s21, 1024  ;;  %s2854_s27 = scalar_lea.hbm %s3618_s30, 2048 }
 0x630   : > { %p2851_p3 = scmp.ne.s32.totalorder %s3525_s21, %s2850_s15  ;;  %p2855_p6 = scmp.lt.u32.totalorder %s3525_s21, %s3618_s30 }
 0x631   : > { %p2856_p12 = scmp.lt.u32.totalorder %s2854_s27, %s2850_s15  ;;  %p2858_p13 = scmp.lt.u32.totalorder %s2850_s15, %s3525_s21 }
 0x632   : > { %p2852_p5 = pnand %p2851_p3, %p3616_p9 }
 0x633   : > { %p2857_p1 = por %p2856_p12, %p2855_p6 }
 0x634   : > { %p2853_p7 = pneg %p2852_p5 }
 0x635   : > { %p2859_p0 = por %p2858_p13, %p2857_p1 }
 0x637   : > { %p2860_p2 = pnand %p2859_p0, %p2853_p7 }
 0x639   : > { %2863 = shalt.err (!%p2860_p2)
}
 0x63a   : > { %2518 = dma.vmem_to_hbm [thread:$0]  (%p3616_p9), %s3529_s12, 1024, %s3525_s21, %s2059_s29  }
 0x63b PF: > { %s2104_s11 = sand.u32 1, %s2906_s17   ;;  %p3620_p8 = scmp.ne.s32.totalorder %s3604_s28, 0 }
 0x63c   : > { %p3621_p4 = scmp.ge.s32.totalorder %s2918_s20, 2  ;;  %s2105_s23 = scalar_lea.sflag [#allocation4], %s2104_s11 }
 0x63e   : > { %p2543_p10 = pnand %p3621_p4, %p3620_p8 }
 0x640   : > { %2897 = dma.done.wait (!%p2543_p10), %s2105_s23, 1024  }
 0x641   : > { %2899 = vsyncadd (!%p2543_p10), %s2105_s23, 4294966272  ;;  %s2114_s24 = scalar_lea.sflag [#allocation15], %s2104_s11 }
 0x642   : > { %2901 = dma.done.wait (!%p2543_p10), %s2114_s24, 1024  }
 0x643   : > { %2903 = vsyncadd (!%p2543_p10), %s2114_s24, 4294966272  ;;  %p31_p9 = scmp.ge.s32.totalorder %s3167_s16, 4   ;;  %s3622_s17 = smov %s2910_s18 }
 0x644   : > { %s3623_s18 = smov %s2914_s19  ;;  %s3624_s19 = smov %s3178_s13 }
 0x645   : > { %s3625_s20 = smov %s3167_s16  ;;  %33 = sbr.rel (!%p31_p9) target bundleno = 15 (0xf), region = 142 }
 0x64c   :  { %2119 = vsyncpa [#allocation3], 1 }
 0x64d   :  { %2121 = vsyncpa [#allocation3 + $0x1], 1 }
 0x64e   :  { %2122 = vsyncpa [#allocation6], 1 }
 0x64f   :  { %2123 = vsyncpa [#allocation9], 1 }
 0x650   :  { %2124 = vsyncpa [#allocation12], 1 }
 0x651   :  { %2125 = vsyncpa [#allocation4], 1 }
 0x652   :  { %2127 = vsyncpa [#allocation4 + $0x1], 1 }
 0x653   :  { %2128 = vsyncpa [#allocation15], 1 }
 0x654   :  { %2130 = vsyncpa [#allocation15 + $0x1], 1 }

// kernel: tpu_custom_call.1
= control target key start
LH: loop header
LB: loop body
LE: loop exit
PB: predicated region body
PF: predicated region fallthrough
CT: control target
= control target key end

     0   :  { %s3573_s0 = inlined_call_operand.hbm [shape: f32[16,8,32], index: 0, kind: input, shape index: {}]   ;;  %s3574_s1 = inlined_call_operand.hbm [shape: f32[32,32], index: 1, kind: input, shape index: {}]   ;;  %s3575_s2 = inlined_call_operand.vmem [shape: f32[1,32], index: 2, kind: input, shape index: {}]   ;;  %s3576_s3 = inlined_call_operand.hbm [shape: f32[32,64], index: 3, kind: input, shape index: {}]   ;;  %s3577_s4 = inlined_call_operand.vmem [shape: f32[1,64], index: 4, kind: input, shape index: {}]   ;;  %s3578_s5 = inlined_call_operand.hbm [shape: f32[32,64], index: 5, kind: input, shape index: {}]   ;;  %s3579_s6 = inlined_call_operand.vmem [shape: f32[1,64], index: 6, kind: input, shape index: {}]   ;;  %s3580_s7 = inlined_call_operand.hbm [shape: f32[64,64], index: 7, kind: input, shape index: {}]   ;;  %s3581_s8 = inlined_call_operand.vmem [shape: f32[1,64], index: 8, kind: input, shape index: {}]   ;;  %s3582_s9 = inlined_call_operand.hbm [shape: f32[32,2048], index: 9, kind: input, shape index: {}]   ;;  %s3583_s10 = inlined_call_operand.hbm [shape: f32[16,1024], index: 10, kind: output, shape index: {0}]   ;;  %s3584_s11 = inlined_call_operand.hbm [shape: f32[16,1024], index: 11, kind: output, shape index: {1}]  }
   0x1   :  { %3592 = sst [smem:[#allocation22_spill]] %s3574_s1 }
   0x2   :  { %3593 = sst [smem:[#allocation23_spill]] %s3581_s8 }
   0x3   :  { %3594 = sst [smem:[#allocation24_spill]] %s3583_s10 }
   0x4   :  { %3595 = sst [smem:[#allocation25_spill]] %s3584_s11 }
   0x5   :  { %17 = vsyncpa [#allocation3], 0 }
   0x6   :  { %19 = vsyncpa [#allocation3 + $0x1], 0 }
   0x7   :  { %20 = vsyncpa [#allocation6], 0 }
   0x8   :  { %21 = vsyncpa [#allocation9], 0 }
   0x9   :  { %22 = vsyncpa [#allocation12], 0 }
   0xa   :  { %23 = vsyncpa [#allocation4], 0 }
   0xb   :  { %25 = vsyncpa [#allocation4 + $0x1], 0 }
   0xc   :  { %26 = vsyncpa [#allocation15], 0 }
   0xd   :  { %28 = vsyncpa [#allocation15 + $0x1], 0  ;;  %s2996_s17 = smov 0   ;;  %s2998_s18 = smov 0  }
   0xe   :  { %s3000_s19 = smov 0   ;;  %s3002_s20 = smov 0  }
   0xf LB: > { %s2920_s21 = smov [#allocation5]   ;;  %s3017_s23 = sadd.s32 4294967295, %s2918_s20   ;;  %s2918_s20 = sphi %s3002_s20, %s3625_s20   ;;  %s2914_s19 = sphi %s3000_s19, %s3624_s19   ;;  %s2910_s18 = sphi %s2998_s18, %s3623_s18   ;;  %s2906_s17 = sphi %s2996_s17, %s3622_s17  }
  0x10   : > { %s318_s22 = sshll.u32 %s2920_s21, 4  ;;  %p2243_p0 = scmp.ge.s32.totalorder %s2918_s20, 1  ;;  %s3022_s22 = int_to_ptr.vmem [resolvable:$true] %s318_s22 }
  0x11   : > { %p3587_p1 = scmp.eq.s32.totalorder %s3017_s23, 0  ;;  %p306_p2 = scmp.lt.s32.totalorder %s2918_s20, 3 }
  0x12   : > { %s2921_s25 = smov [#allocation8]   ;;  %s2922_s28 = smov [#allocation7]  }
  0x13   : > { %p3024_p3 = pnand %p2243_p0, %p306_p2  ;;  %s350_s26 = sshll.u32 %s2921_s25, 4  ;;  %s3037_s26 = int_to_ptr.vmem [resolvable:$true] %s350_s26 }
  0x14   : > { %s334_s29 = sshll.u32 %s2922_s28, 4  ;;  %s3598_s1 = sld [smem:[#allocation22_spill]]  ;;  %s3039_s29 = int_to_ptr.vmem [resolvable:$true] %s334_s29 }
  0x15   : > { %s3596_s24 = scalar_select %p3024_p3, 1, 0 }
  0x16   : > { %p2522_p5 = pneg %p3024_p3 }
  0x18   : > { %p3033_p6 = pnand %p2522_p5, %p3587_p1 }
  0x1a   : > { %s2638_s13 = scalar_lea.hbm %s3598_s1, 512  ;;  %p3049_p8 = pneg %p3033_p6 }
  0x1b   : > { %p2639_p7 = scmp.ne.s32.totalorder %s3598_s1, %s2638_s13  ;;  %p2645_p11 = scmp.lt.u32.totalorder %s2638_s13, %s3598_s1 }
  0x1d   : > { %p2641_p9 = pnand %p3049_p8, %p2639_p7 }
  0x1f   : > { %p2642_p10 = pneg %p2641_p9 }
  0x21   : > { %p2647_p12 = pnand %p2645_p11, %p2642_p10 }
  0x23   : > { %2650 = shalt.err (!%p2647_p12)
}
  0x24   : > { %s2651_s28 = scalar_lea.vmem %s3022_s22, 512  ;;  %p2659_p5 = scmp.lt.s32.totalorder %s3022_s22, %s3022_s22 }
  0x25   : > { %p2652_p13 = scmp.ne.s32.totalorder %s3022_s22, %s2651_s28  ;;  %p2660_p4 = scmp.lt.s32.totalorder %s2651_s28, %s2651_s28 }
  0x27   : > { %p2654_p0 = pnand %p2652_p13, %p3049_p8  ;;  %p2661_p7 = por %p2660_p4, %p2659_p5 }
  0x29   : > { %p2655_p2 = pneg %p2654_p0 }
  0x2b   : > { %p2662_p9 = pnand %p2661_p7, %p2655_p2 }
  0x2d   : > { %2665 = shalt.err (!%p2662_p9)
}
  0x2e   : > { %s3589_s30 = smov 128   ;;  %s2924_s12 = smov 8  }
  0x2f   : > { %2525 = dma.hbm_to_vmem [thread:$0]  (!%p3033_p6), %s3598_s1, 512, %s3022_s22, [#allocation6], %s3589_s30, %s3589_s30, %s2924_s12  }
  0x30   : > { %s2666_s25 = scalar_lea.hbm %s3578_s5, 512 }
  0x31   : > { %p2667_p4 = scmp.ne.s32.totalorder %s3578_s5, %s2666_s25  ;;  %p2673_p12 = scmp.lt.u32.totalorder %s2666_s25, %s3578_s5 }
  0x33   : > { %p2669_p10 = pnand %p2667_p4, %p3049_p8 }
  0x35   : > { %p2670_p11 = pneg %p2669_p10 }
  0x37   : > { %p2675_p13 = pnand %p2673_p12, %p2670_p11 }
  0x39   : > { %2678 = shalt.err (!%p2675_p13)
}
  0x3a   : > { %s2679_s22 = scalar_lea.vmem %s3037_s26, 512  ;;  %p2687_p7 = scmp.lt.s32.totalorder %s3037_s26, %s3037_s26 }
  0x3b   : > { %p2680_p0 = scmp.ne.s32.totalorder %s3037_s26, %s2679_s22  ;;  %p2688_p9 = scmp.lt.s32.totalorder %s2679_s22, %s2679_s22 }
  0x3d   : > { %p2682_p2 = pnand %p2680_p0, %p3049_p8  ;;  %p2689_p4 = por %p2688_p9, %p2687_p7 }
  0x3f   : > { %p2683_p5 = pneg %p2682_p2 }
  0x41   : > { %p2690_p10 = pnand %p2689_p4, %p2683_p5 }
  0x43   : > { %2693 = shalt.err (!%p2690_p10)
}
  0x44   : > { %2531 = dma.hbm_to_vmem [thread:$0]  (!%p3033_p6), %s3578_s5, 512, %s3037_s26, [#allocation9], %s3589_s30, %s3589_s30, %s2924_s12  }
  0x45   : > { %s2694_s14 = scalar_lea.hbm %s3576_s3, 512 }
  0x46   : > { %p2695_p11 = scmp.ne.s32.totalorder %s3576_s3, %s2694_s14  ;;  %p2701_p0 = scmp.lt.u32.totalorder %s2694_s14, %s3576_s3 }
  0x48   : > { %p2697_p12 = pnand %p2695_p11, %p3049_p8 }
  0x4a   : > { %p2698_p13 = pneg %p2697_p12 }
  0x4c   : > { %p2703_p2 = pnand %p2701_p0, %p2698_p13 }
  0x4e   : > { %2706 = shalt.err (!%p2703_p2)
}
  0x4f   : > { %s2707_s26 = scalar_lea.vmem %s3039_s29, 512  ;;  %p2715_p4 = scmp.lt.s32.totalorder %s3039_s29, %s3039_s29 }
  0x50   : > { %p2708_p5 = scmp.ne.s32.totalorder %s3039_s29, %s2707_s26  ;;  %p2716_p10 = scmp.lt.s32.totalorder %s2707_s26, %s2707_s26 }
  0x52   : > { %p2710_p7 = pnand %p2708_p5, %p3049_p8  ;;  %p2717_p11 = por %p2716_p10, %p2715_p4 }
  0x54   : > { %p2711_p9 = pneg %p2710_p7 }
  0x56   : > { %p2718_p12 = pnand %p2717_p11, %p2711_p9 }
  0x58   : > { %2721 = shalt.err (!%p2718_p12)
}
  0x59   : > { %2528 = dma.hbm_to_vmem [thread:$0]  (!%p3033_p6), %s3576_s3, 512, %s3039_s29, [#allocation6], %s3589_s30, %s3589_s30, %s2924_s12  }
  0x5a   : > { %s2925_s10 = smov [#allocation10]   ;;  %s2926_s13 = smov [#allocation11]  }
  0x5b   : > { %s366_s11 = sshll.u32 %s2925_s10, 4  ;;  %s382_s14 = sshll.u32 %s2926_s13, 4  ;;  %s367_s11 = int_to_ptr.vmem [resolvable:$true] %s366_s11  ;;  %s383_s14 = int_to_ptr.vmem [resolvable:$true] %s382_s14 }
  0x5c   : > { %s2722_s25 = scalar_lea.hbm %s3580_s7, 1024 }
  0x5d   : > { %p2723_p13 = scmp.ne.s32.totalorder %s3580_s7, %s2722_s25  ;;  %p2729_p5 = scmp.lt.u32.totalorder %s2722_s25, %s3580_s7 }
  0x5f   : > { %p2725_p0 = pnand %p2723_p13, %p3049_p8 }
  0x61   : > { %p2726_p2 = pneg %p2725_p0 }
  0x63   : > { %p2731_p7 = pnand %p2729_p5, %p2726_p2 }
  0x65   : > { %2734 = shalt.err (!%p2731_p7)
}
  0x66   : > { %s2735_s29 = scalar_lea.vmem %s367_s11, 1024  ;;  %p2743_p11 = scmp.lt.s32.totalorder %s367_s11, %s367_s11 }
  0x67   : > { %p2736_p9 = scmp.ne.s32.totalorder %s367_s11, %s2735_s29  ;;  %p2744_p12 = scmp.lt.s32.totalorder %s2735_s29, %s2735_s29 }
  0x69   : > { %p2738_p4 = pnand %p2736_p9, %p3049_p8  ;;  %p2745_p1 = por %p2744_p12, %p2743_p11 }
  0x6b   : > { %p2739_p10 = pneg %p2738_p4 }
  0x6d   : > { %p2746_p3 = pnand %p2745_p1, %p2739_p10 }
  0x6f   : > { %2749 = shalt.err (!%p2746_p3)
}
  0x70   : > { %2534 = dma.hbm_to_vmem [thread:$0]  (!%p3033_p6), %s3580_s7, 1024, %s367_s11, [#allocation9], %s3589_s30, %s3589_s30, %s2924_s12  }
  0x71   : > { %s2750_s15 = scalar_lea.hbm %s3582_s9, 8192 }
  0x72   : > { %p2751_p1 = scmp.ne.s32.totalorder %s3582_s9, %s2750_s15  ;;  %p2757_p0 = scmp.lt.u32.totalorder %s2750_s15, %s3582_s9 }
  0x74   : > { %p2753_p3 = pnand %p2751_p1, %p3049_p8 }
  0x76   : > { %p2754_p13 = pneg %p2753_p3 }
  0x78   : > { %p2759_p2 = pnand %p2757_p0, %p2754_p13 }
  0x7a   : > { %2762 = shalt.err (!%p2759_p2)
}
  0x7b   : > { %s2763_s22 = scalar_lea.vmem %s383_s14, 8192  ;;  %p2771_p4 = scmp.lt.s32.totalorder %s383_s14, %s383_s14 }
  0x7c   : > { %p2764_p5 = scmp.ne.s32.totalorder %s383_s14, %s2763_s22  ;;  %p2772_p10 = scmp.lt.s32.totalorder %s2763_s22, %s2763_s22 }
  0x7e   : > { %p2766_p7 = pnand %p2764_p5, %p3049_p8  ;;  %p2773_p11 = por %p2772_p10, %p2771_p4 }
  0x80   : > { %p2767_p9 = pneg %p2766_p7 }
  0x82   : > { %p2774_p12 = pnand %p2773_p11, %p2767_p9 }
  0x84   : > { %2777 = shalt.err (!%p2774_p12)
}
  0x85   : > { %s2927_s11 = smov 2048   ;;  %s2242_s27 = sadd.s32 4294967294, %s2918_s20  }
  0x86   : > { %2537 = dma.hbm_to_vmem [thread:$0]  (!%p3033_p6), %s3582_s9, 8192, %s383_s14, [#allocation12], %s2927_s11, %s2927_s11, %s3589_s30  }
  0x87   : > { %s3167_s16 = sadd.s32 1, %s2918_s20   ;;  %s41_s10 = sadd.s32 1, %s2914_s19 }
  0x88   : > { %s38_s8 = ssub.s32 %s2918_s20, %s3167_s16  ;;  %p48_p1 = scmp.ne.s32.totalorder %s2914_s19, %s2910_s18 }
  0x89   : > { %p39_p8 = scmp.eq.s32.totalorder %s38_s8, 0  ;;  %p49_p3 = scmp.eq.s32.totalorder %s2918_s20, 0 }
  0x8a   : > { %p54_p13 = scmp.ne.s32.totalorder %s2910_s18, %s2906_s17  ;;  %p3601_p2 = scmp.eq.s32.totalorder %s3017_s23, 0 }
  0x8b   : > { %s3178_s13 = scalar_select %p39_p8, %s2914_s19, %s41_s10  }
  0x8c   : > { %p3180_p0 = por %p49_p3, %p48_p1  ;;  %p3186_p6 = por %p3601_p2, %p54_p13 }
  0x8d   : > { %p267_p5 = scmp.eq.s32.totalorder %s3017_s23, 1  ;;  %p273_p7 = scmp.eq.s32.totalorder %s2242_s27, 1 }
  0x8e   : > { %p2554_p9 = scmp.lt.s32.totalorder %s2918_s20, 2  ;;  %s396_s21 = sand.u32 1, %s2914_s19  }
  0x8f   : > { %p3193_p4 = por %p267_p5, %p48_p1  ;;  %p3197_p10 = por %p273_p7, %p54_p13 }
  0x90   : > { %s2250_s26 = sshll.u32 %s396_s21, 6  ;;  %s2301_s22 = sshll.u32 %s2918_s20, 10 }
  0x91   : > { %s3603_s25 = scalar_select %p3193_p4, 1, 0 }
  0x92   : > { %s3604_s28 = scalar_select %p3197_p10, 1, 0 }
  0x93   : > { %s3205_s1 = scalar_lea.hbm %s3573_s0, %s2301_s22  ;;  %s400_s27 = scalar_lea.vmem [#allocation2], %s2250_s26 }
  0x94   : > { %s407_s8 = sshll.u32 %s400_s27, 4  ;;  %p3211_p11 = pnand %p2554_p9, %p3180_p0  ;;  %s3207_s8 = int_to_ptr.vmem [resolvable:$true] %s407_s8 }
  0x95   : > { %s3215_s30 = scalar_lea.sflag [#allocation3], %s396_s21  ;;  %s2778_s11 = scalar_lea.hbm %s3205_s1, 1024 }
  0x96   : > { %p2779_p12 = scmp.ne.s32.totalorder %s3205_s1, %s2778_s11  ;;  %p2780_p8 = pneg %p3211_p11 }
  0x97   : > { %s2783_s15 = scalar_lea.hbm %s3573_s0, 2048  ;;  %p2784_p13 = scmp.lt.u32.totalorder %s3205_s1, %s3573_s0 }
  0x98   : > { %p2781_p1 = pnand %p2780_p8, %p2779_p12  ;;  %p2785_p0 = scmp.lt.u32.totalorder %s2783_s15, %s2778_s11 }
  0x99   : > { %p2787_p5 = scmp.lt.u32.totalorder %s2778_s11, %s3205_s1 }
  0x9a   : > { %p2782_p3 = pneg %p2781_p1  ;;  %p2786_p2 = por %p2785_p0, %p2784_p13 }
  0x9c   : > { %p2788_p7 = por %p2787_p5, %p2786_p2 }
  0x9e   : > { %p2789_p9 = pnand %p2788_p7, %p2782_p3 }
  0xa0   : > { %2792 = shalt.err (!%p2789_p9)
}
  0xa1   : > { %s2793_s21 = scalar_lea.vmem %s3207_s8, 1024  ;;  %s2928_s26 = smov [#allocation2]  }
  0xa2   : > { %p2794_p12 = scmp.ne.s32.totalorder %s3207_s8, %s2793_s21  ;;  %s2798_s22 = sshll.u32 %s2928_s26, 4  ;;  %s2799_s22 = int_to_ptr.vmem [resolvable:$false] %s2798_s22 }
  0xa3   : > { %s2800_s29 = scalar_lea.vmem %s2799_s22, 2048  ;;  %p2801_p4 = scmp.lt.s32.totalorder %s3207_s8, %s2799_s22 }
  0xa4   : > { %p2796_p1 = pnand %p2794_p12, %p2780_p8  ;;  %p2802_p13 = scmp.lt.s32.totalorder %s2800_s29, %s2793_s21 }
  0xa6   : > { %p2797_p10 = pneg %p2796_p1  ;;  %p2803_p0 = por %p2802_p13, %p2801_p4 }
  0xa8   : > { %p2804_p2 = pnand %p2803_p0, %p2797_p10 }
  0xaa   : > { %2807 = shalt.err (!%p2804_p2)
}
  0xab   : > { %s3606_s11 = smov 128   ;;  %p3607_p8 = scmp.ne.s32.totalorder %s3596_s24, 0 }
  0xac   : > { %2541 = dma.hbm_to_vmem [thread:$0]  (!%p3211_p11), %s3205_s1, 1024, %s3207_s8, %s3215_s30, %s3606_s11, %s3606_s11, %s2924_s12  }
  0xad   : > { %419 = sbr.rel (%p3607_p8) target bundleno = 1595 (0x63b), region = 60  ;;  %s3249_s15 = sand.u32 (!%p3607_p8), 1, %s2910_s18  }
  0xae   : > { %s3252_s27 = sshll.u32 (!%p3607_p8), %s3249_s15, 6  ;;  %s422_s10 = scalar_lea.sflag (!%p3607_p8), [#allocation3], %s3249_s15 }
  0xaf   : > { %s3256_s21 = scalar_lea.vmem (!%p3607_p8), [#allocation2], %s3252_s27 }
  0xb4   : > { %2881 = dma.done.wait (%p3186_p6), %s422_s10, 1024  }
  0xb5   : > { %2883 = vsyncadd (%p3186_p6), %s422_s10, 4294966272  ;;  %p3608_p4 = scmp.eq.s32.totalorder %s3017_s23, 0 }
  0xb7   : > { %2885 = dma.done.wait (%p3608_p4), [#allocation6], 1024   ;;  %p3609_p10 = pmov %p3608_p4 }
  0xb8   : > { %p3610_p11 = pmov %p3608_p4 }
  0xb9   : > { %2887 = vsyncadd (%p3609_p10), [#allocation6], 4294966272 }
  0xba   : > { %2889 = dma.done.wait (%p3610_p11), [#allocation9], 1536   ;;  %p3611_p3 = pmov %p3608_p4 }
  0xbc   : > { %2891 = vsyncadd (%p3611_p3), [#allocation9], 4294965760  ;;  %p3612_p5 = pmov %p3611_p3 }
  0xbd   : > { %p3613_p7 = pmov %p3611_p3 }
  0xbe   : > { %2893 = dma.done.wait (%p3612_p5), [#allocation12], 8192  }
  0xbf   : > { %2895 = vsyncadd (%p3613_p7), [#allocation12], 4294959104  ;;  %v2929_v0 = vmov 0.0|0.0   ;;  %vm2930_vm0 = vmmov 0   ;;  %v2931_v1 = vmov 0.0   ;;  %v669_v2 = vld [vmem:[#allocation7] sm:$0xff] }
  0xc0   : > { %2396 = vmatprep.subr.bf16.mxu0 %v2929_v0  ;;  %2343 = vmatprep.mubr.msk.f32.mxu0 %vm2930_vm0, %v2931_v1  ;;  %v670_v3 = vld [vmem:[#allocation7 + $0x8] sm:$0xff]  ;;  %v564_v4 = vld [vmem:[#allocation5] sm:$0xff]  ;;  %vm498_vm1 = vcmask 261120   ;;  %v671_v7 = vld [vmem:[#allocation7 + $0x10] sm:$0xff]  ;;  %vm583_vm2 = vcmask 1041409   ;;  %vm585_vm3 = vcmask 1042434  }
  0xc1   : > { %v2402_v5 = vpack.c.bf16 %v670_v3, %v669_v2  ;;  %v565_v6 = vld [vmem:[#allocation5 + $0x8] sm:$0xff]  ;;  %v672_v8 = vld [vmem:[#allocation7 + $0x18] sm:$0xff]  ;;  %v490_v11 = vld [vmem:[%s3256_s21] sm:$0xff]  ;;  %vm587_vm4 = vcmask 1043459   ;;  %vm589_vm5 = vcmask 1044484   ;;  %vm591_vm6 = vcmask 1045509  }
  0xc2   : > { %v2397_v9 = vpack.c.bf16 %v565_v6, %v564_v4  ;;  %v2406_v10 = vpack.c.bf16 %v672_v8, %v671_v7  ;;  %v566_v12 = vld [vmem:[#allocation5 + $0x10] sm:$0xff]  ;;  %v567_v13 = vld [vmem:[#allocation5 + $0x18] sm:$0xff]  ;;  %v499_v14 = vsel %vm498_vm1, %v490_v11, 0.0  ;;  %2354 = vmatprep.mubr.msk.f32.mxu1 %vm498_vm1, %v490_v11  ;;  %v491_v15 = vld [vmem:[%s3256_s21 + $0x8] sm:$0xff]  ;;  %vm593_vm7 = vcmask 1046534   ;;  %s2933_s1 = smov 96  }
  0xc3   : > { %2403 = vmatprep.subr.bf16.mxu1 %v2402_v5  ;;  %v492_v16 = vld [vmem:[%s3256_s21 + $0x10] sm:$0xff]  ;;  %v3283_v17 = vld [vmem:[%s3256_s21 + $0x18] sm:$0xff]  ;;  %v500_v18 = vrot.slane %v499_v14, 4  ;;  %v2400_v19 = vpack.c.bf16 %v567_v13, %v566_v12  ;;  %v506_v20 = vsel %vm498_vm1, %v491_v15, 0.0  ;;  %v3287_v21 = vld [vmem:[%s3256_s21 + $0x20] sm:$0xff]  ;;  %vm595_vm8 = vcmask 1047559  }
  0xc4   : > { %2405 = vmatpush3.bf16.msra.mxu1 %v2402_v5  ;;  %2398 = vmatpush3.bf16.msra.mxu0 %v2397_v9  ;;  %v3290_v22 = vld [vmem:[%s3256_s21 + $0x28] sm:$0xff]  ;;  %v3293_v23 = vld [vmem:[%s3256_s21 + $0x30] sm:$0xff]  ;;  %v513_v24 = vsel %vm498_vm1, %v492_v16, 0.0  ;;  %v507_v25 = vrot.slane %v506_v20, 4  ;;  %v520_v27 = vsel %vm498_vm1, %v3283_v17, 0.0  ;;  %v527_v28 = vsel %vm498_vm1, %v3287_v21, 0.0 }
  0xc5   : > { %2407 = vmatprep.subr.bf16.mxu1 %v2406_v10  ;;  %2399 = vmatprep.subr.bf16.mxu0 %v2929_v0  ;;  %v514_v26 = vrot.slane %v513_v24, 4  ;;  %v501_v29 = vadd.f32 %v500_v18, %v499_v14  ;;  %v3302_v30 = vld [vmem:[%s3256_s21 + $0x38] sm:$0xff]  ;;  %v521_v31 = vrot.slane %v520_v27, 4  ;;  %v528_v32 = vrot.slane %v527_v28, 4  ;;  %s3614_s11 = sld [smem:[#allocation23_spill]]  ;;  %s3464_s10 = scalar_lea.vmem [#allocation13], %s3252_s27 }
  0xc6   : > { %v534_v33 = vsel %vm498_vm1, %v3290_v22, 0.0  ;;  %v508_v34 = vadd.f32 %v507_v25, %v506_v20  ;;  %v541_v37 = vsel %vm498_vm1, %v3293_v23, 0.0  ;;  %v548_v45 = vsel %vm498_vm1, %v3302_v30, 0.0  ;;  %s3469_s21 = scalar_lea.vmem [#allocation14], %s3252_s27  ;;  %s3591_s27 = sshll.u32 %s3017_s23, 10 }
  0xc7   : > { %v515_v35 = vadd.f32 %v514_v26, %v513_v24  ;;  %v535_v36 = vrot.slane %v534_v33, 4  ;;  %v502_v38 = vrot.slane %v501_v29, 2  ;;  %v522_v39 = vadd.f32 %v521_v31, %v520_v27  ;;  %s2092_s24 = sshll.u32 %s3469_s21, 4  ;;  %s3615_s14 = sld [smem:[#allocation25_spill]]  ;;  %s3492_s24 = int_to_ptr.vmem [resolvable:$true] %s2092_s24 }
  0xc8   : > { %2409 = vmatpush3.bf16.msra.mxu1 %v2406_v10  ;;  %2401 = vmatpush3.bf16.msra.mxu0 %v2400_v19  ;;  %v529_v40 = vadd.f32 %v528_v32, %v527_v28  ;;  %v542_v41 = vrot.slane %v541_v37, 4  ;;  %v509_v42 = vrot.slane %v508_v34, 2  ;;  %v549_v53 = vrot.slane %v548_v45, 4  ;;  %s2064_s26 = scalar_lea.sflag [#allocation15], %s3249_s15  ;;  %s2808_s22 = scalar_lea.vmem %s3492_s24, 1024 }
  0xc9   : > { %v516_v43 = vrot.slane %v515_v35, 2  ;;  %v536_v44 = vadd.f32 %v535_v36, %v534_v33  ;;  %2410 = vmatprep.subr.bf16.mxu0 %v2929_v0  ;;  %2416 = vmatprep.subr.bf16.mxu1 %v2929_v0  ;;  %v503_v46 = vadd.f32 %v502_v38, %v501_v29  ;;  %v523_v47 = vrot.slane %v522_v39, 2  ;;  %p2809_p6 = scmp.ne.s32.totalorder %s3492_s24, %s2808_s22  ;;  %p3616_p9 = scmp.ne.s32.totalorder %s3603_s25, 0 }
  0xca   : > { %v530_v48 = vrot.slane %v529_v40, 2  ;;  %v543_v49 = vadd.f32 %v542_v41, %v541_v37  ;;  %v510_v50 = vadd.f32 %v509_v42, %v508_v34  ;;  %v550_v61 = vadd.f32 %v549_v53, %v548_v45  ;;  %s2934_s29 = smov [#allocation14]  }
  0xcb   : > { %2355 = vmatmul.mubr.msk.f32.vlgmr.msra.gmra.mrb[0].mxu1 %vm498_vm1, %v491_v15  ;;  %v517_v51 = vadd.f32 %v516_v43, %v515_v35  ;;  %v537_v52 = vrot.slane %v536_v44, 2  ;;  %v504_v54 = vrot.slane %v503_v46, 1  ;;  %v524_v55 = vadd.f32 %v523_v47, %v522_v39  ;;  %v2262_v43 = vld [vmem:[%s3575_s2] ss:$0 sm:$0xff]  ;;  %p2810_p12 = pnand %p2809_p6, %p3616_p9 }
  0xcc   : > { %v531_v56 = vadd.f32 %v530_v48, %v529_v40  ;;  %v544_v57 = vrot.slane %v543_v49, 2  ;;  %2357 = vmatprep.mubr.msk.f32.mxu1 %vm498_vm1, %v492_v16  ;;  %v511_v58 = vrot.slane %v510_v50, 1  ;;  %v551_v7 = vrot.slane %v550_v61, 2 }
  0xcd   : > { %v518_v59 = vrot.slane %v517_v51, 1  ;;  %v538_v60 = vadd.f32 %v537_v52, %v536_v44  ;;  %v505_v62 = vadd.f32 %v504_v54, %v503_v46  ;;  %v525_v63 = vrot.slane %v524_v55, 1  ;;  %v2264_v52 = vld [vmem:[%s3577_s4] ss:$0 sm:$0xff]  ;;  %p2811_p1 = pneg %p2810_p12 }
  0xce   : > { %v532_v2 = vrot.slane %v531_v56, 1  ;;  %v545_v3 = vadd.f32 %v544_v57, %v543_v49  ;;  %v512_v4 = vadd.f32 %v511_v58, %v510_v50  ;;  %v552_v14 = vadd.f32 %v551_v7, %v550_v61 }
  0xcf   : > { %v519_v5 = vadd.f32 %v518_v59, %v517_v51  ;;  %v539_v6 = vrot.slane %v538_v60, 1  ;;  %2358 = vmatmul.mubr.msk.f32.gmra.mrb[2].mxu1 %vm498_vm1, %v3283_v17  ;;  %v556_v8 = vmul.f32 0.125, %v505_v62  ;;  %v526_v9 = vadd.f32 %v525_v63, %v524_v55 }
  0xd0   : > { %v533_v10 = vadd.f32 %v532_v2, %v531_v56  ;;  %v546_v11 = vrot.slane %v545_v3, 1  ;;  %2360 = vmatprep.mubr.msk.f32.mxu1 %vm498_vm1, %v3287_v21  ;;  %v557_v12 = vmul.f32 0.125, %v512_v4  ;;  %v553_v24 = vrot.slane %v552_v14, 1 }
  0xd1   : > { %v540_v13 = vadd.f32 %v539_v6, %v538_v60  ;;  %v558_v15 = vmul.f32 0.125, %v519_v5  ;;  %v559_v18 = vmul.f32 0.125, %v526_v9  ;;  %v2932_v36 = vmov 1966171168  }
  0xd2   : > { %v547_v16 = vadd.f32 %v546_v11, %v545_v3  ;;  %v560_v19 = vmul.f32 0.125, %v533_v10  ;;  %v584_v20 = vsel %vm583_vm2, %v557_v12, %v556_v8  ;;  %v554_v21 = vadd.f32 %v553_v24, %v552_v14 }
  0xd3   : > { %v561_v25 = vmul.f32 0.125, %v540_v13  ;;  %2361 = vmatmul.mubr.msk.f32.gmra.mrb[4].mxu1 %vm498_vm1, %v3290_v22  ;;  %v586_v26 = vsel %vm585_vm3, %v558_v15, %v584_v20  ;;  %v812_v37 = vunpack.c.l.s4 %v2932_v36  ;;  %v814_v38 = vlaneseq  ;;  %v1149_v36 = vld [vmem:[#allocation8 + $0x8] sm:$0xff] }
  0xd4   : > { %v562_v17 = vmul.f32 0.125, %v547_v16  ;;  %2363 = vmatprep.mubr.msk.f32.mxu1 %vm498_vm1, %v3293_v23  ;;  %v588_v27 = vsel %vm587_vm4, %v559_v18, %v586_v26  ;;  %v563_v29 = vmul.f32 0.125, %v554_v21  ;;  %vm1059_vm9 = vcmask 523520  }
  0xd5   : > { %v590_v28 = vsel %vm589_vm5, %v560_v19, %v588_v27  ;;  %v813_v40 = vunpack.c.0.s8 %v812_v37  ;;  %v815_v41 = vshrl.u32 %v814_v38, 7  ;;  %v1150_v37 = vld [vmem:[#allocation8 + $0x10] sm:$0xff]  ;;  %vm1264_vm10 = vcmask 523264  }
  0xd6   : > { %v592_v31 = vsel %vm591_vm6, %v561_v25, %v590_v28 }
  0xd7   : > { %2364 = vmatmul.mubr.msk.f32.gmra.mrb[6].mxu1 %vm498_vm1, %v3302_v30  ;;  %v594_v22 = vsel %vm593_vm7, %v562_v17, %v592_v31  ;;  %v816_v45 = vsub.s32 %v813_v40, %v815_v41  ;;  %v861_v51 = vsub.s32 0, %v815_v41 }
  0xd8   : > { %2393 = vmatprep.mubr.msk.f32.mxu1 %vm2930_vm0, %v2931_v1  ;;  %v596_v23 = vsel %vm595_vm8, %v563_v29, %v594_v22 }
  0xd9   : > { %2344 = vmatmul.mubr.msk.f32.vlgmr.msra.gmra.mrb[0].mxu0 %vm498_vm1, %v596_v23 }
  0xda   : > { %2374 = vmatprep.mubr.msk.f32.mxu0 %vm2930_vm0, %v2931_v1 }
 0x19e   : > { %v2356_v32 = vpop.f32.mrb[0].mxu1 }
 0x19f   : > { %v770_v33 = vpop.f32.mrb[1].mxu1  ;;  %v3346_v62 = vadd.f32 %v2356_v32, %v2264_v52 }
 0x1a0   : > { %v3342_v56 = vadd.f32 %v2264_v52, %v770_v33 }
 0x1a2   : > { %v2359_v34 = vpop.f32.mrb[2].mxu1 }
 0x1a3   : > { %v780_v35 = vpop.f32.mrb[3].mxu1  ;;  %v3348_v63 = vadd.f32 %v2359_v34, %v2264_v52 }
 0x1a4   : > { %v3344_v57 = vadd.f32 %v2264_v52, %v780_v35  ;;  %v1148_v35 = vld [vmem:[#allocation8] sm:$0xff] }
 0x1a5   : > { %v2411_v38 = vpack.c.bf16 %v1149_v36, %v1148_v35 }
 0x1a6   : > { %v2362_v30 = vpop.f32.mrb[4].mxu1 }
 0x1a7   : > { %v790_v39 = vpop.f32.mrb[5].mxu1  ;;  %v3356_v15 = vadd.f32 %v2362_v30, %v2264_v52  ;;  %v1151_v30 = vld [vmem:[#allocation8 + $0x18] sm:$0xff]  ;;  %2412 = vmatpush3.bf16.msra.mxu0 %v2411_v38 }
 0x1a8   : > { %v3351_v7 = vadd.f32 %v2264_v52, %v790_v39  ;;  %v2414_v39 = vpack.c.bf16 %v1151_v30, %v1150_v37  ;;  %2413 = vmatprep.subr.bf16.mxu0 %v2929_v0 }
 0x1aa   : > { %v2365_v42 = vpop.f32.mrb[6].mxu1 }
 0x1ab   : > { %v800_v44 = vpop.f32.mrb[7].mxu1  ;;  %v3364_v21 = vadd.f32 %v2365_v42, %v2264_v52  ;;  %2415 = vmatpush3.bf16.msra.mxu0 %v2414_v39 }
 0x1ac   : > { %v665_v46 = vpop.f32.mrb[0].mxu0  ;;  %v3360_v24 = vadd.f32 %v2264_v52, %v800_v44 }
 0x1ad   : > { %v666_v47 = vadd.f32 %v2262_v43, %v665_v46  ;;  %v2345_v48 = vpop.f32.mrb[1].mxu0 }
 0x1af   : > { %v810_v49 = vcombine.high %v666_v47, %v666_v47  ;;  %v817_v50 = vrot.slane %v666_v47, %v816_v45 }
 0x1b1   : > { %v824_v53 = vrot.slane %v810_v49, %v816_v45  ;;  %v825_v54 = vcombine.high %v817_v50, %v817_v50  ;;  %v833_v55 = vrot.slane %v817_v50, %v816_v45 }
 0x1b3   : > { %v826_v58 = vcombine.high %v824_v53, %v824_v53  ;;  %v862_v59 = vrot.slane %v833_v55, %v861_v51  ;;  %v855_v60 = vcombine.high %v833_v55, %v833_v55  ;;  %v847_v61 = vrot.slane %v825_v54, %v816_v45 }
 0x1b4   : > { %v840_v2 = vrot.slane %v824_v53, %v816_v45 }
 0x1b5   : > { %v899_v3 = vmul.f32 %v862_v59, %v3342_v56  ;;  %v870_v4 = vrot.slane %v855_v60, %v861_v51  ;;  %v866_v5 = vrot.slane %v847_v61, %v861_v51  ;;  %v857_v6 = vcombine.high %v847_v61, %v847_v61 }
 0x1b6   : > { %v878_v8 = vrot.slane %v840_v2, %v861_v51  ;;  %v854_v9 = vrot.slane %v826_v58, %v816_v45  ;;  %v856_v10 = vcombine.high %v840_v2, %v840_v2 }
 0x1b7   : > { %v907_v11 = vsel %vm498_vm1, %v899_v3, 0.0  ;;  %v901_v12 = vmul.f32 %v870_v4, %v3344_v57  ;;  %v900_v13 = vmul.f32 %v866_v5, %v3346_v62  ;;  %v874_v14 = vrot.slane %v857_v6, %v861_v51 }
 0x1b8   : > { %908 = vadd.xlane.f32.xlu0 %v907_v11  ;;  %v882_v19 = vrot.slane %v854_v9, %v861_v51  ;;  %v858_v20 = vcombine.high %v854_v9, %v854_v9  ;;  %v903_v17 = vmul.f32 %v878_v8, %v3351_v7  ;;  %v886_v26 = vrot.slane %v856_v10, %v861_v51 }
 0x1b9   : > { %v913_v16 = vsel %vm498_vm1, %v901_v12, 0.0  ;;  %v902_v18 = vmul.f32 %v874_v14, %v3348_v63  ;;  %v910_v25 = vsel %vm498_vm1, %v900_v13, 0.0 }
 0x1ba   : > { %914 = vadd.xlane.f32.xlu1 %v913_v16  ;;  %v904_v28 = vmul.f32 %v882_v19, %v3356_v15  ;;  %v890_v29 = vrot.slane %v858_v20, %v861_v51  ;;  %v919_v31 = vsel %vm498_vm1, %v903_v17, 0.0  ;;  %v905_v22 = vmul.f32 %v886_v26, %v3360_v24 }
 0x1bb   : > { %v916_v27 = vsel %vm498_vm1, %v902_v18, 0.0 }
 0x1bc   : > { %911 = vadd.xlane.f32.xlu0 %v910_v25  ;;  %v922_v23 = vsel %vm498_vm1, %v904_v28, 0.0  ;;  %v906_v32 = vmul.f32 %v890_v29, %v3364_v21  ;;  %v925_v33 = vsel %vm498_vm1, %v905_v22, 0.0 }
 0x1be   : > { %917 = vadd.xlane.f32.xlu1 %v916_v27  ;;  %v928_v34 = vsel %vm498_vm1, %v906_v32, 0.0 }
 0x1c0   : > { %920 = vadd.xlane.f32.xlu0 %v919_v31 }
 0x1c2   : > { %923 = vadd.xlane.f32.xlu1 %v922_v23 }
 0x1c4   : > { %926 = vadd.xlane.f32.xlu0 %v925_v33 }
 0x1c6   : > { %929 = vadd.xlane.f32.xlu1 %v928_v34 }
 0x245   : > { %v909_v40 = vpop.xlane.xlu0 %908 }
 0x246   : > { %v931_v41 = vrot.slane %v909_v40, 4 }
 0x247   : > { %v915_v42 = vpop.xlane.xlu1 %914 }
 0x248   : > { %v932_v43 = vmax.f32 %v909_v40, %v931_v41  ;;  %v943_v44 = vrot.slane %v915_v42, 4 }
 0x249   : > { %v912_v45 = vpop.xlane.xlu0 %911 }
 0x24a   : > { %v933_v46 = vrot.slane %v932_v43, 2  ;;  %v944_v47 = vmax.f32 %v915_v42, %v943_v44  ;;  %v937_v48 = vrot.slane %v912_v45, 4 }
 0x24b   : > { %v918_v49 = vpop.xlane.xlu1 %917 }
 0x24c   : > { %v934_v50 = vmax.f32 %v932_v43, %v933_v46  ;;  %v945_v51 = vrot.slane %v944_v47, 2  ;;  %v938_v52 = vmax.f32 %v912_v45, %v937_v48  ;;  %v949_v53 = vrot.slane %v918_v49, 4 }
 0x24d   : > { %v921_v54 = vpop.xlane.xlu0 %920 }
 0x24e   : > { %v935_v55 = vrot.slane %v934_v50, 1  ;;  %v946_v58 = vmax.f32 %v944_v47, %v945_v51  ;;  %v939_v59 = vrot.slane %v938_v52, 2  ;;  %v950_v60 = vmax.f32 %v918_v49, %v949_v53 }
 0x24f   : > { %v955_v61 = vrot.slane %v921_v54, 4  ;;  %v924_v2 = vpop.xlane.xlu1 %923 }
 0x250   : > { %v936_v3 = vmax.f32 %v934_v50, %v935_v55  ;;  %v947_v4 = vrot.slane %v946_v58, 1  ;;  %v940_v5 = vmax.f32 %v938_v52, %v939_v59  ;;  %v951_v6 = vrot.slane %v950_v60, 2 }
 0x251   : > { %v956_v8 = vmax.f32 %v921_v54, %v955_v61  ;;  %v961_v9 = vrot.slane %v924_v2, 4  ;;  %v927_v10 = vpop.xlane.xlu0 %926 }
 0x252   : > { %v979_v11 = vsub.f32 %v909_v40, %v936_v3  ;;  %v948_v12 = vmax.f32 %v946_v58, %v947_v4  ;;  %v941_v13 = vrot.slane %v940_v5, 1  ;;  %v952_v14 = vmax.f32 %v950_v60, %v951_v6 }
 0x253   : > { %v957_v16 = vrot.slane %v956_v8, 2  ;;  %v962_v18 = vmax.f32 %v924_v2, %v961_v9  ;;  %v967_v19 = vrot.slane %v927_v10, 4  ;;  %v930_v20 = vpop.xlane.xlu1 %929 }
 0x254   : > { %v987_v25 = vmul.f32 1.442695, %v979_v11  ;;  %v981_v17 = vsub.f32 %v915_v42, %v948_v12  ;;  %v942_v26 = vmax.f32 %v940_v5, %v941_v13  ;;  %v953_v27 = vrot.slane %v952_v14, 1 }
 0x255   : > { %v958_v28 = vmax.f32 %v956_v8, %v957_v16  ;;  %v963_v29 = vrot.slane %v962_v18, 2  ;;  %v968_v31 = vmax.f32 %v927_v10, %v967_v19  ;;  %v973_v22 = vrot.slane %v930_v20, 4 }
 0x256   : > { %2606 = vpow2.f32 %v987_v25  ;;  %v991_v23 = vmul.f32 1.442695, %v981_v17  ;;  %v980_v32 = vsub.f32 %v912_v45, %v942_v26  ;;  %v954_v33 = vmax.f32 %v952_v14, %v953_v27 }
 0x257   : > { %v959_v34 = vrot.slane %v958_v28, 1  ;;  %v964_v35 = vmax.f32 %v962_v18, %v963_v29  ;;  %v969_v36 = vrot.slane %v968_v31, 2  ;;  %v974_v37 = vmax.f32 %v930_v20, %v973_v22 }
 0x258   : > { %2608 = vpow2.f32 %v991_v23  ;;  %v989_v38 = vmul.f32 1.442695, %v980_v32  ;;  %v982_v30 = vsub.f32 %v918_v49, %v954_v33 }
 0x259   : > { %v960_v39 = vmax.f32 %v958_v28, %v959_v34  ;;  %v965_v40 = vrot.slane %v964_v35, 1  ;;  %v970_v41 = vmax.f32 %v968_v31, %v969_v36  ;;  %v975_v42 = vrot.slane %v974_v37, 2 }
 0x25a   : > { %2610 = vpow2.f32 %v989_v38  ;;  %v993_v43 = vmul.f32 1.442695, %v982_v30 }
 0x25b   : > { %v983_v44 = vsub.f32 %v921_v54, %v960_v39  ;;  %v966_v46 = vmax.f32 %v964_v35, %v965_v40  ;;  %v971_v47 = vrot.slane %v970_v41, 1  ;;  %v976_v48 = vmax.f32 %v974_v37, %v975_v42 }
 0x25c   : > { %2612 = vpow2.f32 %v993_v43 }
 0x25d   : > { %v995_v45 = vmul.f32 1.442695, %v983_v44  ;;  %v984_v50 = vsub.f32 %v924_v2, %v966_v46  ;;  %v972_v51 = vmax.f32 %v970_v41, %v971_v47  ;;  %v977_v52 = vrot.slane %v976_v48, 1 }
 0x25f   : > { %2614 = vpow2.f32 %v995_v45  ;;  %v997_v53 = vmul.f32 1.442695, %v984_v50  ;;  %v985_v55 = vsub.f32 %v927_v10, %v972_v51  ;;  %v978_v58 = vmax.f32 %v976_v48, %v977_v52 }
 0x260   : > { %v2607_v49 = vpop.eup %2606 }
 0x261   : > { %2616 = vpow2.f32 %v997_v53  ;;  %v999_v59 = vmul.f32 1.442695, %v985_v55  ;;  %v986_v60 = vsub.f32 %v930_v20, %v978_v58  ;;  %v1003_v4 = vrot.slane %v2607_v49, 4 }
 0x262   : > { %v2609_v61 = vpop.eup %2608  ;;  %v1051_v11 = vmul.f32 %v2607_v49, %v3342_v56 }
 0x263   : > { %2618 = vpow2.f32 %v999_v59  ;;  %v1001_v3 = vmul.f32 1.442695, %v986_v60  ;;  %v1015_v8 = vrot.slane %v2609_v61, 4  ;;  %v1004_v9 = vadd.f32 %v2607_v49, %v1003_v4 }
 0x264   : > { %v2611_v54 = vpop.eup %2610  ;;  %v1060_v17 = vsel %vm1059_vm9, %v1051_v11, 0.0  ;;  %v1053_v28 = vmul.f32 %v2609_v61, %v3344_v57 }
 0x265   : > { %v1009_v5 = vrot.slane %v2611_v54, 4  ;;  %2620 = vpow2.f32 %v1001_v3  ;;  %v1016_v13 = vadd.f32 %v2609_v61, %v1015_v8  ;;  %v1005_v19 = vrot.slane %v1004_v9, 2 }
 0x266   : > { %v2613_v6 = vpop.eup %2612  ;;  %v1052_v32 = vmul.f32 %v2611_v54, %v3346_v62  ;;  %v1061_v33 = vrot.slane %v1060_v17, 4  ;;  %v1074_v40 = vsel %vm1059_vm9, %v1053_v28, 0.0 }
 0x267   : > { %v1021_v2 = vrot.slane %v2613_v6, 4  ;;  %v1010_v10 = vadd.f32 %v2611_v54, %v1009_v5  ;;  %v1017_v29 = vrot.slane %v1016_v13, 2  ;;  %v1006_v34 = vadd.f32 %v1005_v19, %v1004_v9 }
 0x268   : > { %v1054_v39 = vmul.f32 %v2613_v6, %v3348_v63  ;;  %v1062_v62 = vadd.f32 %v1061_v33, %v1060_v17  ;;  %v1067_v47 = vsel %vm1059_vm9, %v1052_v32, 0.0  ;;  %v1075_v61 = vrot.slane %v1074_v40, 4 }
 0x269   : > { %v2615_v12 = vpop.eup %2614  ;;  %v1022_v18 = vadd.f32 %v2613_v6, %v1021_v2  ;;  %v1011_v27 = vrot.slane %v1010_v10, 2  ;;  %v1018_v41 = vadd.f32 %v1017_v29, %v1016_v13  ;;  %v1007_v48 = vrot.slane %v1006_v34, 1 }
 0x26a   : > { %v1027_v14 = vrot.slane %v2615_v12, 4  ;;  %v1055_v43 = vmul.f32 %v2615_v12, %v3351_v7  ;;  %v1081_v55 = vsel %vm1059_vm9, %v1054_v39, 0.0  ;;  %v1068_v7 = vrot.slane %v1067_v47, 4 }
 0x26b   : > { %v2617_v16 = vpop.eup %2616  ;;  %v1023_v23 = vrot.slane %v1022_v18, 2  ;;  %v1012_v38 = vadd.f32 %v1011_v27, %v1010_v10  ;;  %v1019_v58 = vrot.slane %v1018_v41, 1  ;;  %v1008_v54 = vadd.f32 %v1007_v48, %v1006_v34 }
 0x26c   : > { %v1028_v20 = vadd.f32 %v2615_v12, %v1027_v14  ;;  %v1033_v25 = vrot.slane %v2617_v16, 4  ;;  %v1056_v46 = vmul.f32 %v2617_v16, %v3356_v15  ;;  %v1088_v59 = vsel %vm1059_vm9, %v1055_v43, 0.0 }
 0x26d   : > { %v2619_v26 = vpop.eup %2618  ;;  %v1024_v44 = vadd.f32 %v1023_v23, %v1022_v18  ;;  %v1013_v52 = vrot.slane %v1012_v38, 1  ;;  %v1082_v5 = vrot.slane %v1081_v55, 4  ;;  %v1020_v9 = vadd.f32 %v1019_v58, %v1018_v41  ;;  %v1249_v58 = vld [vmem:[#allocation10] sm:$0xff] }
 0x26e   : > { %v1034_v31 = vadd.f32 %v2617_v16, %v1033_v25  ;;  %v1039_v22 = vrot.slane %v2619_v26, 4  ;;  %v1029_v35 = vrot.slane %v1028_v20, 2  ;;  %v1057_v51 = vmul.f32 %v2619_v26, %v3360_v24 }
 0x26f   : > { %v2621_v56 = vpop.eup %2620  ;;  %v1025_v15 = vrot.slane %v1024_v44, 1  ;;  %v1095_v3 = vsel %vm1059_vm9, %v1056_v46, 0.0  ;;  %v1014_v6 = vadd.f32 %v1013_v52, %v1012_v38  ;;  %v1069_v12 = vadd.f32 %v1068_v7, %v1067_v47  ;;  %v1251_v7 = vld [vmem:[#allocation10 + $0x10] sm:$0xff] }
 0x270   : > { %v1040_v36 = vadd.f32 %v2619_v26, %v1039_v22  ;;  %v1045_v37 = vrot.slane %v2621_v56, 4  ;;  %v1035_v30 = vrot.slane %v1034_v31, 2  ;;  %v1030_v45 = vadd.f32 %v1029_v35, %v1028_v20 }
 0x271   : > { %v1058_v53 = vmul.f32 %v2621_v56, %v3364_v21  ;;  %v1102_v24 = vsel %vm1059_vm9, %v1057_v51, 0.0  ;;  %v1089_v21 = vrot.slane %v1088_v59, 4  ;;  %v1096_v10 = vrot.slane %v1095_v3, 4 }
 0x272   : > { %v1041_v57 = vrot.slane %v1040_v36, 2  ;;  %v1046_v42 = vadd.f32 %v2621_v56, %v1045_v37  ;;  %v1036_v63 = vadd.f32 %v1035_v30, %v1034_v31  ;;  %v1031_v4 = vrot.slane %v1030_v45, 1 }
 0x273   : > { %v1109_v2 = vsel %vm1059_vm9, %v1058_v53, 0.0  ;;  %v1026_v13 = vadd.f32 %v1025_v15, %v1024_v44  ;;  %v1076_v16 = vadd.f32 %v1075_v61, %v1074_v40  ;;  %v1103_v18 = vrot.slane %v1102_v24, 4 }
 0x274   : > { %v1047_v50 = vrot.slane %v1046_v42, 2  ;;  %v1042_v49 = vadd.f32 %v1041_v57, %v1040_v36  ;;  %v1037_v8 = vrot.slane %v1036_v63, 1  ;;  %v1032_v19 = vadd.f32 %v1031_v4, %v1030_v45 }
 0x275   : > { %v1083_v20 = vadd.f32 %v1082_v5, %v1081_v55  ;;  %v1110_v25 = vrot.slane %v1109_v2, 4  ;;  %v1116_v17 = vmul.f32 8.0, %v1008_v54  ;;  %v1063_v27 = vrot.slane %v1062_v62, 2 }
 0x276   : > { %v1048_v60 = vadd.f32 %v1047_v50, %v1046_v42  ;;  %v1043_v11 = vrot.slane %v1042_v49, 1  ;;  %v1038_v26 = vadd.f32 %v1037_v8, %v1036_v63  ;;  %v1090_v28 = vadd.f32 %v1089_v21, %v1088_v59 }
 0x277   : > { %v1117_v29 = vmul.f32 8.0, %v1014_v6  ;;  %v1070_v22 = vrot.slane %v1069_v12, 2  ;;  %v1097_v56 = vadd.f32 %v1096_v10, %v1095_v3  ;;  %v1118_v23 = vmul.f32 8.0, %v1020_v9  ;;  %v1253_v10 = vld [vmem:[#allocation10 + $0x20] sm:$0xff] }
 0x278   : > { %v1049_v14 = vrot.slane %v1048_v60, 1  ;;  %v1044_v31 = vadd.f32 %v1043_v11, %v1042_v49  ;;  %v1077_v33 = vrot.slane %v1076_v16, 2  ;;  %v1104_v34 = vadd.f32 %v1103_v18, %v1102_v24  ;;  %v1250_v49 = vld [vmem:[#allocation10 + $0x8] sm:$0xff] }
 0x279   : > { %v1119_v35 = vmul.f32 8.0, %v1026_v13  ;;  %v1084_v36 = vrot.slane %v1083_v20, 2  ;;  %v1111_v37 = vadd.f32 %v1110_v25, %v1109_v2  ;;  %v1120_v38 = vmul.f32 8.0, %v1032_v19  ;;  %v1254_v13 = vld [vmem:[#allocation10 + $0x28] sm:$0xff] }
 0x27a   : > { %v1050_v32 = vadd.f32 %v1049_v14, %v1048_v60  ;;  %2622 = vrcp.f32 %v1116_v17  ;;  %v1064_v30 = vadd.f32 %v1063_v27, %v1062_v62  ;;  %v1091_v39 = vrot.slane %v1090_v28, 2  ;;  %v1252_v60 = vld [vmem:[#allocation10 + $0x18] sm:$0xff] }
 0x27b   : > { %v1121_v40 = vmul.f32 8.0, %v1038_v26  ;;  %2624 = vrcp.f32 %v1117_v29  ;;  %v1071_v41 = vadd.f32 %v1070_v22, %v1069_v12  ;;  %v1098_v57 = vrot.slane %v1097_v56, 2 }
 0x27c   : > { %v1122_v42 = vmul.f32 8.0, %v1044_v31  ;;  %2626 = vrcp.f32 %v1118_v23  ;;  %v1078_v43 = vadd.f32 %v1077_v33, %v1076_v16  ;;  %v1105_v44 = vrot.slane %v1104_v34, 2 }
 0x27d   : > { %v1123_v46 = vmul.f32 8.0, %v1050_v32  ;;  %2628 = vrcp.f32 %v1119_v35  ;;  %v1085_v47 = vadd.f32 %v1084_v36, %v1083_v20  ;;  %v1112_v48 = vrot.slane %v1111_v37, 2 }
 0x27e   : > { %2630 = vrcp.f32 %v1120_v38  ;;  %v1092_v45 = vadd.f32 %v1091_v39, %v1090_v28  ;;  %v1065_v50 = vrot.slane %v1064_v30, 1  ;;  %v1072_v51 = vrot.slane %v1071_v41, 1 }
 0x27f   : > { %2632 = vrcp.f32 %v1121_v40  ;;  %v1099_v52 = vadd.f32 %v1098_v57, %v1097_v56  ;;  %v1079_v62 = vrot.slane %v1078_v43, 1  ;;  %v1106_v63 = vadd.f32 %v1105_v44, %v1104_v34  ;;  %v1255_v40 = vld [vmem:[#allocation10 + $0x30] sm:$0xff]  ;;  %v1347_v44 = vld [vmem:[#allocation11 + $0x28] sm:$0xff] }
 0x280   : > { %2634 = vrcp.f32 %v1122_v42  ;;  %v1086_v53 = vrot.slane %v1085_v47, 1  ;;  %v1113_v55 = vadd.f32 %v1112_v48, %v1111_v37  ;;  %v1093_v59 = vrot.slane %v1092_v45, 1  ;;  %v1343_v42 = vld [vmem:[#allocation11 + $0x8] sm:$0xff]  ;;  %v1342_v48 = vld [vmem:[#allocation11] sm:$0xff] }
 0x281   : > { %2636 = vrcp.f32 %v1123_v46  ;;  %v2417_v15 = vpack.c.bf16 %v1250_v49, %v1249_v58  ;;  %v1066_v3 = vadd.f32 %v1065_v50, %v1064_v30  ;;  %v1073_v54 = vadd.f32 %v1072_v51, %v1071_v41  ;;  %v1256_v41 = vld [vmem:[#allocation10 + $0x38] sm:$0xff]  ;;  %v2273_v51 = vld [vmem:[%s3579_s6] ss:$0 sm:$0xff] }
 0x282   : > { %v1100_v4 = vrot.slane %v1099_v52, 1  ;;  %v1080_v24 = vadd.f32 %v1079_v62, %v1078_v43  ;;  %v1107_v6 = vrot.slane %v1106_v63, 1  ;;  %v2420_v8 = vpack.c.bf16 %v1252_v60, %v1251_v7  ;;  %v1359_v43 = vld [vmem:[#allocation11 + $0x88] sm:$0xff]  ;;  %v1362_v62 = vld [vmem:[#allocation11 + $0xa0] sm:$0xff] }
 0x283   : > { %2418 = vmatpush3.bf16.msra.mxu1 %v2417_v15  ;;  %v1087_v2 = vadd.f32 %v1086_v53, %v1085_v47  ;;  %v1114_v9 = vrot.slane %v1113_v55, 1  ;;  %v1094_v16 = vadd.f32 %v1093_v59, %v1092_v45  ;;  %v2423_v31 = vpack.c.bf16 %v1254_v13, %v1253_v10  ;;  %v1363_v47 = vld [vmem:[#allocation11 + $0xa8] sm:$0xff]  ;;  %v1358_v45 = vld [vmem:[#allocation11 + $0x80] sm:$0xff] }
 0x284   : > { %v2623_v61 = vpop.eup %2622  ;;  %2419 = vmatprep.subr.bf16.mxu1 %v2929_v0  ;;  %v1101_v20 = vadd.f32 %v1100_v4, %v1099_v52  ;;  %v1108_v27 = vadd.f32 %v1107_v6, %v1106_v63  ;;  %v2426_v57 = vpack.c.bf16 %v1256_v41, %v1255_v40  ;;  %v2428_v46 = vpack.c.bf16 %v1359_v43, %v1343_v42  ;;  %v1346_v52 = vld [vmem:[#allocation11 + $0x20] sm:$0xff]  ;;  %v1375_v7 = vld [vmem:[#allocation11 + $0x108] sm:$0xff]  ;;  %v1348_v43 = vld [vmem:[#allocation11 + $0x30] sm:$0xff] }
 0x285   : > { %v2625_v5 = vpop.eup %2624  ;;  %v1140_v11 = vmul.f32 %v2623_v61, %v1066_v3  ;;  %v1115_v56 = vadd.f32 %v1114_v9, %v1113_v55  ;;  %v2430_v50 = vpack.c.bf16 %v1358_v45, %v1342_v48  ;;  %v2446_v58 = vpack.c.bf16 %v1362_v62, %v1346_v52  ;;  %v1391_v59 = vld [vmem:[#allocation11 + $0x188] sm:$0xff]  ;;  %v1374_v3 = vld [vmem:[#allocation11 + $0x100] sm:$0xff]  ;;  %v1381_v45 = vld [vmem:[#allocation11 + $0x138] sm:$0xff] }
 0x286   : > { %v2627_v21 = vpop.eup %2626  ;;  %v1141_v12 = vmul.f32 %v2625_v5, %v1073_v54  ;;  %2429 = vmatprep.subr.bf16.mxu0 %v2428_v46  ;;  %v1379_v15 = vld [vmem:[#allocation11 + $0x128] sm:$0xff]  ;;  %v2432_v60 = vpack.c.bf16 %v1391_v59, %v1375_v7  ;;  %v1390_v54 = vld [vmem:[#allocation11 + $0x180] sm:$0xff]  ;;  %v1353_v59 = vld [vmem:[#allocation11 + $0x58] sm:$0xff] }
 0x287   : > { %v2629_v14 = vpop.eup %2628  ;;  %v1142_v18 = vmul.f32 %v2627_v21, %v1080_v24  ;;  %2421 = vmatpush3.bf16.msra.mxu1 %v2420_v8  ;;  %v1395_v61 = vld [vmem:[#allocation11 + $0x1a8] sm:$0xff]  ;;  %v2434_v5 = vpack.c.bf16 %v1390_v54, %v1374_v3  ;;  %v1378_v24 = vld [vmem:[#allocation11 + $0x120] sm:$0xff]  ;;  %v1345_v21 = vld [vmem:[#allocation11 + $0x18] sm:$0xff] }
 0x288   : > { %v2631_v19 = vpop.eup %2630  ;;  %v1143_v25 = vmul.f32 %v2629_v14, %v1087_v2  ;;  %v1167_v17 = vsel %vm583_vm2, %v1141_v12, %v1140_v11  ;;  %2422 = vmatprep.subr.bf16.mxu1 %v2929_v0  ;;  %v2448_v4 = vpack.c.bf16 %v1395_v61, %v1379_v15  ;;  %v1394_v6 = vld [vmem:[#allocation11 + $0x1a0] sm:$0xff]  ;;  %v1361_v2 = vld [vmem:[#allocation11 + $0x98] sm:$0xff]  ;;  %v1351_v11 = vld [vmem:[#allocation11 + $0x48] sm:$0xff] }
 0x289   : > { %v2633_v26 = vpop.eup %2632  ;;  %v1144_v28 = vmul.f32 %v2631_v19, %v1094_v16  ;;  %v1168_v29 = vsel %vm585_vm3, %v1142_v18, %v1167_v17  ;;  %v2450_v8 = vpack.c.bf16 %v1394_v6, %v1378_v24  ;;  %v2436_v9 = vpack.c.bf16 %v1361_v2, %v1345_v21  ;;  %v1367_v12 = vld [vmem:[#allocation11 + $0xc8] sm:$0xff]  ;;  %v2275_v13 = vld [vmem:[%s3614_s11] ss:$0 sm:$0xff]  ;;  %v1344_v14 = vld [vmem:[#allocation11 + $0x10] sm:$0xff]  ;;  %s2812_s11 = sshll.u32 %s2934_s29, 4  ;;  %s2813_s11 = int_to_ptr.vmem [resolvable:$false] %s2812_s11 }
 0x28a   : > { %v2635_v22 = vpop.eup %2634  ;;  %v1145_v23 = vmul.f32 %v2633_v26, %v1101_v20  ;;  %v1169_v32 = vsel %vm587_vm4, %v1143_v25, %v1168_v29  ;;  %v2460_v10 = vpack.c.bf16 %v1367_v12, %v1351_v11  ;;  %v1360_v16 = vld [vmem:[#allocation11 + $0x90] sm:$0xff]  ;;  %v1350_v19 = vld [vmem:[#allocation11 + $0x40] sm:$0xff]  ;;  %v1377_v26 = vld [vmem:[#allocation11 + $0x118] sm:$0xff]  ;;  %s2814_s30 = scalar_lea.vmem %s2813_s11, 2048  ;;  %p2815_p13 = scmp.lt.s32.totalorder %s3492_s24, %s2813_s11 }
 0x28b   : > { %v2637_v33 = vpop.eup %2636  ;;  %v1146_v34 = vmul.f32 %v2635_v22, %v1108_v27  ;;  %v1170_v35 = vsel %vm589_vm5, %v1144_v28, %v1169_v32  ;;  %2424 = vmatpush3.bf16.msra.mxu1 %v2423_v31  ;;  %v1366_v20 = vld [vmem:[#allocation11 + $0xc0] sm:$0xff]  ;;  %v1393_v27 = vld [vmem:[#allocation11 + $0x198] sm:$0xff]  ;;  %v2438_v28 = vpack.c.bf16 %v1360_v16, %v1344_v14  ;;  %v1383_v29 = vld [vmem:[#allocation11 + $0x148] sm:$0xff]  ;;  %p2816_p0 = scmp.lt.s32.totalorder %s2814_s30, %s2808_s22 }
 0x28c   : > { %v1147_v36 = vmul.f32 %v2637_v33, %v1115_v56  ;;  %v1171_v37 = vsel %vm591_vm6, %v1145_v23, %v1170_v35  ;;  %2425 = vmatprep.subr.bf16.mxu1 %v2929_v0  ;;  %v2444_v0 = vpack.c.bf16 %v1363_v47, %v1347_v44  ;;  %v1399_v31 = vld [vmem:[#allocation11 + $0x1c8] sm:$0xff]  ;;  %v2462_v56 = vpack.c.bf16 %v1366_v20, %v1350_v19  ;;  %v1376_v23 = vld [vmem:[#allocation11 + $0x110] sm:$0xff]  ;;  %v1382_v33 = vld [vmem:[#allocation11 + $0x140] sm:$0xff] }
 0x28d   : > { %v1172_v38 = vsel %vm593_vm7, %v1146_v34, %v1171_v37  ;;  %v1392_v32 = vld [vmem:[#allocation11 + $0x190] sm:$0xff]  ;;  %v2440_v34 = vpack.c.bf16 %v1393_v27, %v1377_v26  ;;  %v1398_v35 = vld [vmem:[#allocation11 + $0x1c0] sm:$0xff]  ;;  %v1365_v37 = vld [vmem:[#allocation11 + $0xb8] sm:$0xff]  ;;  %p2817_p2 = por %p2816_p0, %p2815_p13 }
 0x28e   : > { %v1173_v30 = vsel %vm595_vm8, %v1147_v36, %v1172_v38  ;;  %v1349_v36 = vld [vmem:[#allocation11 + $0x38] sm:$0xff]  ;;  %v2464_v38 = vpack.c.bf16 %v1399_v31, %v1383_v29  ;;  %v2442_v40 = vpack.c.bf16 %v1392_v32, %v1376_v23  ;;  %v2466_v41 = vpack.c.bf16 %v1398_v35, %v1382_v33  ;;  %v1364_v44 = vld [vmem:[#allocation11 + $0xb0] sm:$0xff]  ;;  %v1354_v46 = vld [vmem:[#allocation11 + $0x60] sm:$0xff] }
 0x28f   : > { %1174 = vrot.lane.b32.xlu0 %v1173_v30, %s2933_s1  ;;  %2427 = vmatpush3.bf16.msra.mxu1 %v2426_v57  ;;  %v1355_v30 = vld [vmem:[#allocation11 + $0x68] sm:$0xff]  ;;  %v2452_v57 = vpack.c.bf16 %v1365_v37, %v1349_v36  ;;  %v1370_v47 = vld [vmem:[#allocation11 + $0xe0] sm:$0xff]  ;;  %v2454_v52 = vpack.c.bf16 %v1364_v44, %v1348_v43  ;;  %v1369_v15 = vld [vmem:[#allocation11 + $0xd8] sm:$0xff]  ;;  %p2818_p8 = pnand %p2817_p2, %p2811_p1 }
 0x290   : > { %2445 = vmatprep.subr.bf16.mxu1 %v2444_v0  ;;  %v1397_v0 = vld [vmem:[#allocation11 + $0x1b8] sm:$0xff]  ;;  %v2478_v62 = vpack.c.bf16 %v1370_v47, %v1354_v46  ;;  %v1368_v24 = vld [vmem:[#allocation11 + $0xd0] sm:$0xff] }
 0x291   : > { %v1373_v61 = vld [vmem:[#allocation11 + $0xf8] sm:$0xff]  ;;  %v1356_v6 = vld [vmem:[#allocation11 + $0x70] sm:$0xff] }
 0x292   : > { %v1385_v2 = vld [vmem:[#allocation11 + $0x158] sm:$0xff]  ;;  %v1384_v14 = vld [vmem:[#allocation11 + $0x150] sm:$0xff] }
 0x293   : > { %v1389_v11 = vld [vmem:[#allocation11 + $0x178] sm:$0xff]  ;;  %v1388_v19 = vld [vmem:[#allocation11 + $0x170] sm:$0xff] }
 0x294   : > { %v1405_v12 = vld [vmem:[#allocation11 + $0x1f8] sm:$0xff]  ;;  %v1404_v20 = vld [vmem:[#allocation11 + $0x1f0] sm:$0xff] }
 0x295   : > { %v2490_v26 = vpack.c.bf16 %v1404_v20, %v1388_v19 }
 0x301   : > { %v1175_v39 = vpop.permute.xlu0 %1174 }
 0x302   : > { %2375 = vmatmul.mubr.msk.f32.vlgmr.msra.gmra.mrb[2].mxu0 %vm498_vm1, %v1175_v39  ;;  %v1371_v39 = vld [vmem:[#allocation11 + $0xe8] sm:$0xff] }
 0x303   : > { %1474 = vmatprep.mubr.f32.mxu0 %v2931_v1  ;;  %2431 = vmatpush1.bf16.msra.mxu0 %v2430_v50  ;;  %v2476_v42 = vpack.c.bf16 %v1371_v39, %v1355_v30  ;;  %v1387_v50 = vld [vmem:[#allocation11 + $0x168] sm:$0xff] }
 0x304   : > { %2433 = vmatprep.subr.bf16.mxu0 %v2432_v60  ;;  %v1357_v60 = vld [vmem:[#allocation11 + $0x78] sm:$0xff] }
 0x305   : > { %v2484_v21 = vpack.c.bf16 %v1373_v61, %v1357_v60 }
 0x307   : > { %2435 = vmatpush1.bf16.msra.mxu0 %v2434_v5  ;;  %v2468_v5 = vpack.c.bf16 %v1369_v15, %v1353_v59 }
 0x308   : > { %2437 = vmatprep.subr.bf16.mxu0 %v2436_v9  ;;  %v1401_v9 = vld [vmem:[#allocation11 + $0x1d8] sm:$0xff] }
 0x309   : > { %v2472_v16 = vpack.c.bf16 %v1401_v9, %v1385_v2 }
 0x3d5   : > { %v1244_v63 = vpop.f32.mrb[2].mxu0 }
 0x3d6   : > { %v1245_v53 = vadd.f32 %v2273_v51, %v1244_v63  ;;  %v2376_v55 = vpop.f32.mrb[3].mxu0  ;;  %v1403_v51 = vld [vmem:[#allocation11 + $0x1e8] sm:$0xff]  ;;  %v1380_v63 = vld [vmem:[#allocation11 + $0x130] sm:$0xff] }
 0x3d7   : > { %v1396_v55 = vld [vmem:[#allocation11 + $0x1b0] sm:$0xff]  ;;  %v2480_v7 = vpack.c.bf16 %v1403_v51, %v1387_v50 }
 0x3d8   : > { %v1248_v49 = vmax.f32 %v1245_v53, 0.0  ;;  %v2456_v53 = vpack.c.bf16 %v1397_v0, %v1381_v45  ;;  %v2458_v3 = vpack.c.bf16 %v1396_v55, %v1380_v63 }
 0x3da   : > { %2394 = vmatmul.mubr.msk.f32.vlgmr.msra.gmra.mrb[8].mxu1 %vm1264_vm10, %v1248_v49  ;;  %v1402_v49 = vld [vmem:[#allocation11 + $0x1e0] sm:$0xff] }
 0x3db   : > { %2447 = vmatpush1.bf16.msra.mxu1 %v2446_v58  ;;  %1628 = vmatprep.mubr.f32.mxu1 %v2931_v1  ;;  %v1386_v58 = vld [vmem:[#allocation11 + $0x160] sm:$0xff] }
 0x3dc   : > { %2449 = vmatprep.subr.bf16.mxu1 %v2448_v4  ;;  %v2482_v54 = vpack.c.bf16 %v1402_v49, %v1386_v58  ;;  %v1352_v4 = vld [vmem:[#allocation11 + $0x50] sm:$0xff] }
 0x3df   : > { %2451 = vmatpush1.bf16.msra.mxu1 %v2450_v8  ;;  %v1372_v8 = vld [vmem:[#allocation11 + $0xf0] sm:$0xff] }
 0x3e0   : > { %2461 = vmatprep.subr.bf16.mxu1 %v2460_v10  ;;  %v2470_v10 = vpack.c.bf16 %v1368_v24, %v1352_v4 }
 0x4ad   : > { %v1334_v18 = vpop.f32.mrb[8].mxu1 }
 0x4ae   : > { %v1335_v25 = vadd.f32 %v2275_v13, %v1334_v18  ;;  %v2395_v17 = vpop.f32.mrb[9].mxu1  ;;  %v2486_v13 = vpack.c.bf16 %v1372_v8, %v1356_v6  ;;  %v1400_v18 = vld [vmem:[#allocation11 + $0x1d0] sm:$0xff] }
 0x4af   : > { %v2474_v17 = vpack.c.bf16 %v1400_v18, %v1384_v14 }
 0x4b0   : > { %v3411_v22 = vmax.f32 %v1335_v25, 0.0  ;;  %v2488_v25 = vpack.c.bf16 %v1405_v12, %v1389_v11 }
 0x4b2   : > { %1340 = vrot.lane.b32.xlu1 %v3411_v22, %s2933_s1  ;;  %2277 = vmatmul.mubr.msk.f32.vlgmr.msra.gmra.mrb[4].mxu0 %vm498_vm1, %v3411_v22  ;;  %s3490_s1 = scalar_lea.hbm %s3615_s14, %s3591_s27 }
 0x4b3   : > { %2281 = vmatmul.mubr.msk.f32.vlgmr.msra.gmra.mrb[10].mxu1 %vm498_vm1, %v3411_v22  ;;  %2439 = vmatpush1.bf16.msra.mxu0 %v2438_v28 }
 0x4b4   : > { %2463 = vmatpush1.bf16.msra.mxu1 %v2462_v56  ;;  %1480 = vmatprep.mubr.f32.mxu0 %v2931_v1 }
 0x4b5   : > { %2441 = vmatprep.subr.bf16.mxu0 %v2440_v34  ;;  %1634 = vmatprep.mubr.f32.mxu1 %v2931_v1 }
 0x4b6   : > { %2465 = vmatprep.subr.bf16.mxu1 %v2464_v38 }
 0x4b7   : > { %2443 = vmatpush1.bf16.msra.mxu0 %v2442_v40 }
 0x4b8   : > { %2467 = vmatpush1.bf16.msra.mxu1 %v2466_v41  ;;  %2453 = vmatprep.subr.bf16.mxu0 %v2452_v57 }
 0x4b9   : > { %2477 = vmatprep.subr.bf16.mxu1 %v2476_v42 }
 0x524   : > { %v3421_v48 = vpop.permute.xlu1 %1340 }
 0x525   : > { %2278 = vmatmul.mubr.msk.f32.gmra.mrb[6].mxu0 %vm498_vm1, %v3421_v48  ;;  %2282 = vmatmul.mubr.msk.f32.gmra.mrb[12].mxu1 %vm498_vm1, %v3421_v48 }
 0x526   : > { %1551 = vmatprep.mubr.f32.mxu0 %v2931_v1  ;;  %1782 = vmatprep.mubr.f32.mxu1 %v2931_v1 }
 0x529   : > { %2279 = vmatmul.mubr.msk.f32.vlgmr.msra.gmra.mrb[8].mxu0 %vm498_vm1, %v3411_v22  ;;  %2285 = vmatmul.mubr.msk.f32.vlgmr.msra.gmra.mrb[14].mxu1 %vm498_vm1, %v3411_v22 }
 0x52a   : > { %2455 = vmatpush1.bf16.msra.mxu0 %v2454_v52  ;;  %2479 = vmatpush1.bf16.msra.mxu1 %v2478_v62 }
 0x52b   : > { %1557 = vmatprep.mubr.f32.mxu0 %v2931_v1  ;;  %2457 = vmatprep.subr.bf16.mxu0 %v2456_v53 }
 0x52c   : > { %1788 = vmatprep.mubr.f32.mxu1 %v2931_v1  ;;  %2481 = vmatprep.subr.bf16.mxu1 %v2480_v7 }
 0x52d   : > { %2280 = vmatmul.mubr.msk.f32.gmra.mrb[10].mxu0 %vm498_vm1, %v3421_v48  ;;  %2286 = vmatmul.mubr.msk.f32.gmra.mrb[16].mxu1 %vm498_vm1, %v3421_v48 }
 0x52e   : > { %2459 = vmatpush1.bf16.msra.mxu0 %v2458_v3  ;;  %2483 = vmatpush1.bf16.msra.mxu1 %v2482_v54 }
 0x52f   : > { %1705 = vmatprep.mubr.f32.mxu0 %v2931_v1  ;;  %2469 = vmatprep.subr.bf16.mxu0 %v2468_v5 }
 0x530   : > { %1936 = vmatprep.mubr.f32.mxu1 %v2931_v1  ;;  %2492 = vmatprep.subr.bf16.mxu1 %v2484_v21 }
 0x531   : > { %2283 = vmatmul.mubr.msk.f32.vlgmr.msra.gmra.mrb[12].mxu0 %vm498_vm1, %v3411_v22  ;;  %2289 = vmatmul.mubr.msk.f32.vlgmr.msra.gmra.mrb[18].mxu1 %vm498_vm1, %v3411_v22 }
 0x532   : > { %2471 = vmatpush1.bf16.msra.mxu0 %v2470_v10  ;;  %2494 = vmatpush1.bf16.msra.mxu1 %v2486_v13 }
 0x533   : > { %1711 = vmatprep.mubr.f32.mxu0 %v2931_v1  ;;  %2473 = vmatprep.subr.bf16.mxu0 %v2472_v16 }
 0x534   : > { %1942 = vmatprep.mubr.f32.mxu1 %v2931_v1  ;;  %2493 = vmatprep.subr.bf16.mxu1 %v2488_v25 }
 0x535   : > { %2284 = vmatmul.mubr.msk.f32.gmra.mrb[14].mxu0 %vm498_vm1, %v3421_v48  ;;  %2290 = vmatmul.mubr.msk.f32.gmra.mrb[20].mxu1 %vm498_vm1, %v3421_v48 }
 0x536   : > { %2475 = vmatpush1.bf16.msra.mxu0 %v2474_v17  ;;  %2495 = vmatpush1.bf16.msra.mxu1 %v2490_v26 }
 0x537   : > { %1859 = vmatprep.mubr.f32.mxu0 %v2931_v1  ;;  %2485 = vmatprep.subr.bf16.mxu0 %v2484_v21 }
 0x538   : > { %2019 = vmatprep.mubr.f32.mxu1 %v2931_v1 }
 0x539   : > { %2287 = vmatmul.mubr.msk.f32.vlgmr.msra.gmra.mrb[16].mxu0 %vm498_vm1, %v3411_v22  ;;  %2292 = vmatmul.mubr.msk.f32.vlgmr.msra.gmra.mrb[22].mxu1 %vm498_vm1, %v3421_v48 }
 0x53a   : > { %2487 = vmatpush1.bf16.msra.mxu0 %v2486_v13  ;;  %1865 = vmatprep.mubr.f32.mxu0 %v2931_v1 }
 0x53b   : > { %2489 = vmatprep.subr.bf16.mxu0 %v2488_v25 }
 0x53d   : > { %2288 = vmatmul.mubr.msk.f32.gmra.mrb[18].mxu0 %vm498_vm1, %v3421_v48 }
 0x53e   : > { %2491 = vmatpush1.bf16.msra.mxu0 %v2490_v26  ;;  %2013 = vmatprep.mubr.f32.mxu0 %v2931_v1 }
 0x541   : > { %2291 = vmatmul.mubr.msk.f32.vlgmr.msra.gmra.mrb[20].mxu0 %vm498_vm1, %v3411_v22 }
 0x585   : > { %v1476_v27 = vpop.f32.mrb[4].mxu0 }
 0x586   : > { %v1630_v28 = vpop.f32.mrb[10].mxu1  ;;  %v1478_v29 = vpop.f32.mrb[5].mxu0 }
 0x587   : > { %v1632_v31 = vpop.f32.mrb[11].mxu1 }
 0x5f8   : > { %v1482_v56 = vpop.f32.mrb[6].mxu0  ;;  %v1636_v23 = vpop.f32.mrb[12].mxu1 }
 0x5f9   : > { %v1484_v32 = vpop.f32.mrb[7].mxu0  ;;  %v1638_v33 = vpop.f32.mrb[13].mxu1 }
 0x5fc   : > { %v1553_v34 = vpop.f32.mrb[8].mxu0  ;;  %v1784_v35 = vpop.f32.mrb[14].mxu1 }
 0x5fd   : > { %v2026_v36 = vmul.f32 %v1784_v35, %v1476_v27  ;;  %v1555_v37 = vpop.f32.mrb[9].mxu0  ;;  %v1786_v38 = vpop.f32.mrb[15].mxu1 }
 0x5fe   : > { %v2027_v30 = vmul.f32 %v1786_v38, %v1478_v29 }
 0x5ff   : > { %2034 = vst [vmem:[%s3464_s10] sm:$0xff] %v2026_v36 }
 0x600   : > { %2035 = vst [vmem:[%s3464_s10 + $0x8] sm:$0xff] %v2027_v30  ;;  %v1559_v1 = vpop.f32.mrb[10].mxu0  ;;  %v1790_v22 = vpop.f32.mrb[16].mxu1 }
 0x601   : > { %v2042_v39 = vmul.f32 %v1790_v22, %v1482_v56  ;;  %v1561_v40 = vpop.f32.mrb[11].mxu0  ;;  %v1792_v41 = vpop.f32.mrb[17].mxu1 }
 0x602   : > { %v2043_v57 = vmul.f32 %v1792_v41, %v1484_v32 }
 0x603   : > { %2050 = vst [vmem:[%s3469_s21] sm:$0xff] %v2042_v39 }
 0x604   : > { %2051 = vst [vmem:[%s3469_s21 + $0x8] sm:$0xff] %v2043_v57  ;;  %v1707_v42 = vpop.f32.mrb[12].mxu0  ;;  %v1938_v43 = vpop.f32.mrb[18].mxu1 }
 0x605   : > { %v2030_v44 = vmul.f32 %v1938_v43, %v1630_v28  ;;  %v3473_v46 = vpop.f32.mrb[13].mxu0  ;;  %v1940_v47 = vpop.f32.mrb[19].mxu1 }
 0x606   : > { %v2031_v48 = vmul.f32 %v1940_v47, %v1632_v31 }
 0x607   : > { %2038 = vst [vmem:[%s3464_s10 + $0x20] sm:$0xff] %v2030_v44 }
 0x608   : > { %2039 = vst [vmem:[%s3464_s10 + $0x28] sm:$0xff] %v2031_v48  ;;  %v1713_v45 = vpop.f32.mrb[14].mxu0  ;;  %v1944_v0 = vpop.f32.mrb[20].mxu1 }
 0x609   : > { %v2046_v50 = vmul.f32 %v1944_v0, %v1636_v23  ;;  %v1715_v51 = vpop.f32.mrb[15].mxu0  ;;  %v1946_v52 = vpop.f32.mrb[21].mxu1 }
 0x60a   : > { %v2047_v62 = vmul.f32 %v1946_v52, %v1638_v33 }
 0x60b   : > { %2054 = vst [vmem:[%s3469_s21 + $0x20] sm:$0xff] %v2046_v50 }
 0x60c   : > { %2055 = vst [vmem:[%s3469_s21 + $0x28] sm:$0xff] %v2047_v62  ;;  %v1861_v63 = vpop.f32.mrb[16].mxu0  ;;  %v2021_v53 = vpop.f32.mrb[22].mxu1 }
 0x60d   : > { %v2028_v55 = vmul.f32 %v1861_v63, %v1553_v34  ;;  %v2048_v58 = vmul.f32 %v2021_v53, %v1713_v45  ;;  %v1863_v49 = vpop.f32.mrb[17].mxu0  ;;  %v2023_v7 = vpop.f32.mrb[23].mxu1 }
 0x60e   : > { %v2029_v59 = vmul.f32 %v1863_v49, %v1555_v37  ;;  %v2049_v15 = vmul.f32 %v2023_v7, %v1715_v51 }
 0x60f   : > { %2036 = vst [vmem:[%s3464_s10 + $0x10] sm:$0xff] %v2028_v55  ;;  %2056 = vst [vmem:[%s3469_s21 + $0x30] sm:$0xff] %v2048_v58 }
 0x610   : > { %2037 = vst [vmem:[%s3464_s10 + $0x18] sm:$0xff] %v2029_v59  ;;  %2057 = vst [vmem:[%s3469_s21 + $0x38] sm:$0xff] %v2049_v15  ;;  %v1867_v60 = vpop.f32.mrb[18].mxu0 }
 0x611   : > { %v2044_v61 = vmul.f32 %v1867_v60, %v1559_v1  ;;  %v1869_v3 = vpop.f32.mrb[19].mxu0 }
 0x612   : > { %v2045_v54 = vmul.f32 %v1869_v3, %v1561_v40 }
 0x613   : > { %2052 = vst [vmem:[%s3469_s21 + $0x10] sm:$0xff] %v2044_v61 }
 0x614   : > { %2053 = vst [vmem:[%s3469_s21 + $0x18] sm:$0xff] %v2045_v54  ;;  %v2015_v4 = vpop.f32.mrb[20].mxu0 }
 0x615   : > { %v2032_v5 = vmul.f32 %v2015_v4, %v1707_v42  ;;  %v2017_v24 = vpop.f32.mrb[21].mxu0 }
 0x616   : > { %2821 = shalt.err (!%p2818_p8)
}
 0x617   : > { %s2822_s21 = scalar_lea.hbm %s3490_s1, 1024  ;;  %s2826_s29 = scalar_lea.hbm %s3615_s14, 2048 }
 0x618   : > { %p2823_p4 = scmp.ne.s32.totalorder %s3490_s1, %s2822_s21  ;;  %p2827_p3 = scmp.lt.u32.totalorder %s3490_s1, %s3615_s14 }
 0x619   : > { %p2828_p5 = scmp.lt.u32.totalorder %s2826_s29, %s2822_s21  ;;  %p2830_p6 = scmp.lt.u32.totalorder %s2822_s21, %s3490_s1 }
 0x61a   : > { %p2824_p10 = pnand %p2823_p4, %p3616_p9 }
 0x61b   : > { %p2829_p7 = por %p2828_p5, %p2827_p3 }
 0x61c   : > { %p2825_p11 = pneg %p2824_p10 }
 0x61d   : > { %p2831_p12 = por %p2830_p6, %p2829_p7 }
 0x61f   : > { %p2832_p1 = pnand %p2831_p12, %p2825_p11 }
 0x621   : > { %2835 = shalt.err (!%p2832_p1)
}
 0x622   : > { %2519 = dma.vmem_to_hbm [thread:$0]  (%p3616_p9), %s3492_s24, 1024, %s3490_s1, %s2064_s26   ;;  %v2033_v6 = vmul.f32 %v2017_v24, %v3473_v46  ;;  %2040 = vst [vmem:[%s3464_s10 + $0x30] sm:$0xff] %v2032_v5 }
 0x623   : > { %s3617_s27 = sshll.u32 %s3017_s23, 10  ;;  %s3618_s30 = sld [smem:[#allocation24_spill]] }
 0x624   : > { %s3619_s12 = sshll.u32 %s3464_s10, 4  ;;  %2041 = vst [vmem:[%s3464_s10 + $0x38] sm:$0xff] %v2033_v6  ;;  %s2059_s29 = scalar_lea.sflag [#allocation4], %s3249_s15  ;;  %s3529_s12 = int_to_ptr.vmem [resolvable:$true] %s3619_s12 }
 0x625   : > { %s2836_s11 = scalar_lea.vmem %s3529_s12, 1024  ;;  %s2935_s23 = smov [#allocation13]  }
 0x626   : > { %p2837_p13 = scmp.ne.s32.totalorder %s3529_s12, %s2836_s11  ;;  %s2840_s24 = sshll.u32 %s2935_s23, 4  ;;  %s2841_s24 = int_to_ptr.vmem [resolvable:$false] %s2840_s24 }
 0x627   : > { %s2842_s1 = scalar_lea.vmem %s2841_s24, 2048  ;;  %p2843_p8 = scmp.lt.s32.totalorder %s3529_s12, %s2841_s24 }
 0x628   : > { %p2838_p0 = pnand %p2837_p13, %p3616_p9  ;;  %p2844_p4 = scmp.lt.s32.totalorder %s2842_s1, %s2836_s11 }
 0x629   : > { %s3525_s21 = scalar_lea.hbm %s3618_s30, %s3617_s27 }
 0x62a   : > { %p2839_p2 = pneg %p2838_p0  ;;  %p2845_p10 = por %p2844_p4, %p2843_p8 }
 0x62c   : > { %p2846_p11 = pnand %p2845_p10, %p2839_p2 }
 0x62e   : > { %2849 = shalt.err (!%p2846_p11)
}
 0x62f   : > { %s2850_s15 = scalar_lea.hbm %s3525_s21, 1024  ;;  %s2854_s27 = scalar_lea.hbm %s3618_s30, 2048 }
 0x630   : > { %p2851_p3 = scmp.ne.s32.totalorder %s3525_s21, %s2850_s15  ;;  %p2855_p6 = scmp.lt.u32.totalorder %s3525_s21, %s3618_s30 }
 0x631   : > { %p2856_p12 = scmp.lt.u32.totalorder %s2854_s27, %s2850_s15  ;;  %p2858_p13 = scmp.lt.u32.totalorder %s2850_s15, %s3525_s21 }
 0x632   : > { %p2852_p5 = pnand %p2851_p3, %p3616_p9 }
 0x633   : > { %p2857_p1 = por %p2856_p12, %p2855_p6 }
 0x634   : > { %p2853_p7 = pneg %p2852_p5 }
 0x635   : > { %p2859_p0 = por %p2858_p13, %p2857_p1 }
 0x637   : > { %p2860_p2 = pnand %p2859_p0, %p2853_p7 }
 0x639   : > { %2863 = shalt.err (!%p2860_p2)
}
 0x63a   : > { %2518 = dma.vmem_to_hbm [thread:$0]  (%p3616_p9), %s3529_s12, 1024, %s3525_s21, %s2059_s29  }
 0x63b PF: > { %s2104_s11 = sand.u32 1, %s2906_s17   ;;  %p3620_p8 = scmp.ne.s32.totalorder %s3604_s28, 0 }
 0x63c   : > { %p3621_p4 = scmp.ge.s32.totalorder %s2918_s20, 2  ;;  %s2105_s23 = scalar_lea.sflag [#allocation4], %s2104_s11 }
 0x63e   : > { %p2543_p10 = pnand %p3621_p4, %p3620_p8 }
 0x640   : > { %2897 = dma.done.wait (!%p2543_p10), %s2105_s23, 1024  }
 0x641   : > { %2899 = vsyncadd (!%p2543_p10), %s2105_s23, 4294966272  ;;  %s2114_s24 = scalar_lea.sflag [#allocation15], %s2104_s11 }
 0x642   : > { %2901 = dma.done.wait (!%p2543_p10), %s2114_s24, 1024  }
 0x643   : > { %2903 = vsyncadd (!%p2543_p10), %s2114_s24, 4294966272  ;;  %p31_p9 = scmp.ge.s32.totalorder %s3167_s16, 4   ;;  %s3622_s17 = smov %s2910_s18 }
 0x644   : > { %s3623_s18 = smov %s2914_s19  ;;  %s3624_s19 = smov %s3178_s13 }
 0x645   : > { %s3625_s20 = smov %s3167_s16  ;;  %33 = sbr.rel (!%p31_p9) target bundleno = 15 (0xf), region = 142 }
 0x64c   :  { %2119 = vsyncpa [#allocation3], 1 }
 0x64d   :  { %2121 = vsyncpa [#allocation3 + $0x1], 1 }
 0x64e   :  { %2122 = vsyncpa [#allocation6], 1 }
 0x64f   :  { %2123 = vsyncpa [#allocation9], 1 }
 0x650   :  { %2124 = vsyncpa [#allocation12], 1 }
 0x651   :  { %2125 = vsyncpa [#allocation4], 1 }
 0x652   :  { %2127 = vsyncpa [#allocation4 + $0x1], 1 }
 0x653   :  { %2128 = vsyncpa [#allocation15], 1 }
 0x654   :  { %2130 = vsyncpa [#allocation15 + $0x1], 1 }

</bundles_post_ra>
